<compile_context>
chip_gen: v7x
topology: tpu7x:2x2x1
jax: 0.10.0
libtpu: 0.0.40
codegen_flags: <defaults>
</compile_context>

<pallas_src>
import functools

import jax
import jax.numpy as jnp
from jax.experimental import pallas as pl
from jax.experimental.pallas import tpu as pltpu


def _round_up(x: int, n: int) -> int:
    return (x + n - 1) // n * n


def _pad2d(a, rows: int, cols: int):
    pr, pc = rows - a.shape[0], cols - a.shape[1]
    if pr or pc:
        a = jnp.pad(a, ((0, pr), (0, pc)))
    return a


def _vision_proj_kernel(ve_p, x_ref, w1_ref, b1_ref, wcat_ref, bcat_ref, o_ref, xh_ref):
    # x_ref:    (tm, ve_p)            row tile of the flattened input
    # w1_ref:   (ve_p, lm_p)          proj[0] weight (in x out), grid-invariant
    # b1_ref:   (1, lm_p)             proj[0] bias (f32), grid-invariant
    # wcat_ref: (ve_p + lm_p, tn)     [wr ; w2] column tile j
    # bcat_ref: (1, tn)               (b2 + br) column tile j (f32)
    # o_ref:    (tm, tn)              output tile (i, j)
    # xh_ref:   (tm, ve_p + lm_p)     VMEM scratch holding [x | relu(x @ w1 + b1)]

    @pl.when(pl.program_id(1) == 0)
    def _compute_h():
        x = x_ref[...]
        h = jnp.dot(x, w1_ref[...], preferred_element_type=jnp.float32) + b1_ref[...]
        h = jnp.maximum(h, 0.0)                      # ReLU
        xh_ref[:, :ve_p] = x.astype(xh_ref.dtype)
        xh_ref[:, ve_p:] = h.astype(xh_ref.dtype)    # cast (e.g. bf16) before 2nd matmul

    acc = jnp.dot(xh_ref[...], wcat_ref[...], preferred_element_type=jnp.float32)
    o_ref[...] = (acc + bcat_ref[...]).astype(o_ref.dtype)


def vision_proj(x, w1, b1, w2, b2, wr, br, *, tm=256, tn=256, compute_dtype=None):
    """x: (..., ve_dim) -> (..., lm_dim).  Weights stored as (in, out)."""
    ve_dim = x.shape[-1]
    lm_dim = w1.shape[1]
    lead = x.shape[:-1]
    out_dtype = x.dtype
    cdt = compute_dtype if compute_dtype is not None else x.dtype

    xf = x.reshape(-1, ve_dim)
    m = xf.shape[0]

    # Lane-dense feature padding (multiples of 128) and tile choices.
    tn = max(128, _round_up(tn, 128))
    tn = min(tn, _round_up(lm_dim, 128))
    lm_p = _round_up(lm_dim, tn)
    ve_p = _round_up(ve_dim, 128)

    tm = _round_up(tm, 8)
    tm_eff = min(tm, _round_up(m, 8))   # don't over-tile tiny inputs
    m_p = _round_up(m, tm_eff)

    # One-time parameter prep (outside the kernel):
    #   * fold br into b2
    #   * stack [wr ; w2] along K so the per-j output matmul is a single MXU stream
    #   * keep biases in f32 (added to the f32 accumulator)
    xf_p = _pad2d(xf, m_p, ve_p).astype(cdt)
    w1_p = _pad2d(w1, ve_p, lm_p).astype(cdt)
    b1_p = _pad2d(b1.reshape(1, -1), 1, lm_p).astype(jnp.float32)
    wcat = jnp.concatenate(
        [_pad2d(wr, ve_p, lm_p), _pad2d(w2, lm_p, lm_p)], axis=0
    ).astype(cdt)                                            # (ve_p + lm_p, lm_p)
    bcat = _pad2d((b2 + br).reshape(1, -1), 1, lm_p).astype(jnp.float32)

    grid_m = m_p // tm_eff
    grid_n = lm_p // tn

    itemsize = jnp.dtype(cdt).itemsize
    flops = 2 * m_p * lm_p * (2 * ve_p + lm_p)
    bytes_accessed = (
        (m_p * ve_p + ve_p * lm_p + (ve_p + lm_p) * lm_p) * itemsize
        + 2 * lm_p * 4
        + m_p * lm_p * jnp.dtype(out_dtype).itemsize
    )

    out = pl.pallas_call(
        functools.partial(_vision_proj_kernel, ve_p),
        out_shape=jax.ShapeDtypeStruct((m_p, lm_p), out_dtype),
        grid_spec=pltpu.PrefetchScalarGridSpec(
            num_scalar_prefetch=0,
            grid=(grid_m, grid_n),
            in_specs=[
                pl.BlockSpec((tm_eff, ve_p), lambda i, j: (i, 0)),        # x row tile
                pl.BlockSpec((ve_p, lm_p), lambda i, j: (0, 0)),          # w1 (invariant)
                pl.BlockSpec((1, lm_p), lambda i, j: (0, 0)),             # b1 (invariant)
                pl.BlockSpec((ve_p + lm_p, tn), lambda i, j: (0, j)),     # [wr ; w2] col tile
                pl.BlockSpec((1, tn), lambda i, j: (0, j)),               # b2 + br col tile
            ],
            out_specs=pl.BlockSpec((tm_eff, tn), lambda i, j: (i, j)),
            scratch_shapes=[pltpu.VMEM((tm_eff, ve_p + lm_p), cdt)],
        ),
        compiler_params=pltpu.CompilerParams(
            dimension_semantics=("parallel", "arbitrary"),
            # Sized against v7x's 64 MiB physical VMEM (v5e/v6e have 128 MiB).
            vmem_limit_bytes=48 * 1024 * 1024,
        ),
        cost_estimate=pl.CostEstimate(
            flops=flops, transcendentals=0, bytes_accessed=bytes_accessed
        ),
    )(xf_p, w1_p, b1_p, wcat, bcat)

    out = out[:m, :lm_dim]
    return out.reshape(*lead, lm_dim)


def _reference(x, w1, b1, w2, b2, wr, br):
    h = jnp.maximum(x @ w1 + b1, 0.0)
    return h @ w2 + b2 + x @ wr + br


if __name__ == "__main__":
    # Small shapes consistent with the module's forward: x (B, S, ve_dim); module defaults
    # ve_dim=768, lm_dim=1024 (already multiples of 128), small batch/seq.
    B, S, ve_dim, lm_dim = 2, 8, 768, 1024

    key = jax.random.PRNGKey(0)
    kx, k1, k2, k3, k4, k5, k6 = jax.random.split(key, 7)

    x = jax.random.normal(kx, (B, S, ve_dim), dtype=jnp.float32)

    # torch Linear stores weight as (out, in); we keep (in, out) for the x @ W convention.
    s1 = 1.0 / jnp.sqrt(ve_dim)
    s2 = 1.0 / jnp.sqrt(lm_dim)
    w1 = jax.random.uniform(k1, (ve_dim, lm_dim), jnp.float32, -s1, s1)
    b1 = jax.random.uniform(k2, (lm_dim,), jnp.float32, -s1, s1)
    w2 = jax.random.uniform(k3, (lm_dim, lm_dim), jnp.float32, -s2, s2)
    b2 = jax.random.uniform(k4, (lm_dim,), jnp.float32, -s2, s2)
    wr = jax.random.uniform(k5, (ve_dim, lm_dim), jnp.float32, -s1, s1)
    br = jax.random.uniform(k6, (lm_dim,), jnp.float32, -s1, s1)

    ref = _reference(x, w1, b1, w2, b2, wr, br)

    # f32 compute path: tight correctness check.
    out = vision_proj(x, w1, b1, w2, b2, wr, br)
    out = jax.block_until_ready(out)
    assert out.shape == (B, S, lm_dim)
    assert jnp.allclose(out, ref, atol=1e-4, rtol=1e-4), "f32 kernel mismatch vs reference"

    # bf16 compute path (v6e/v7x MXU-friendly): loose check (bf16 input rounding only).
    out_bf16 = vision_proj(x, w1, b1, w2, b2, wr, br, compute_dtype=jnp.bfloat16)
    out_bf16 = jax.block_until_ready(out_bf16)
    assert out_bf16.shape == (B, S, lm_dim)
    assert jnp.allclose(out_bf16, ref, atol=2e-1, rtol=1e-1), "bf16 kernel mismatch vs reference"

    print("KERNEL_OK")
</pallas_src>

<mosaic_0001>
module attributes {stable_mosaic.version = 11 : i64} {
  func.func @_vision_proj_kernel(%arg0: i32, %arg1: i32, %arg2: memref<16x768xf32, #tpu.memory_space<vmem>>, %arg3: memref<768x1024xf32, #tpu.memory_space<vmem>>, %arg4: memref<1x1024xf32, #tpu.memory_space<vmem>>, %arg5: memref<1792x256xf32, #tpu.memory_space<vmem>>, %arg6: memref<1x256xf32, #tpu.memory_space<vmem>>, %arg7: memref<16x256xf32, #tpu.memory_space<vmem>>, %arg8: memref<16x1792xf32, #tpu.memory_space<vmem>>) attributes {dimension_semantics = [#tpu.dimension_semantics<parallel>, #tpu.dimension_semantics<arbitrary>], iteration_bounds = array<i64: 1, 4>, scalar_prefetch = 0 : i64, scratch_operands = 1 : i64, tpu.core_type = #tpu.core_type<tc>, window_params = [{transform_indices = @transform_0, window_bounds = array<i64: 16, 768>}, {pipeline_mode = #tpu.pipeline_mode<synchronous>, transform_indices = @transform_1, window_bounds = array<i64: 768, 1024>}, {pipeline_mode = #tpu.pipeline_mode<synchronous>, transform_indices = @transform_2, window_bounds = array<i64: 1, 1024>}, {transform_indices = @transform_3, window_bounds = array<i64: 1792, 256>}, {transform_indices = @transform_4, window_bounds = array<i64: 1, 256>}, {transform_indices = @transform_5, window_bounds = array<i64: 16, 256>}]} {
    %c0_i32 = arith.constant 0 : i32
    %0 = arith.cmpi eq, %arg1, %c0_i32 : i32
    %1 = arith.extui %0 : i1 to i32
    %c0_i32_0 = arith.constant 0 : i32
    %2 = arith.cmpi ne, %1, %c0_i32_0 : i32
    scf.if %2 {
      %c0_8 = arith.constant 0 : index
      %c0_9 = arith.constant 0 : index
      %10 = vector.load %arg2[%c0_8, %c0_9] : memref<16x768xf32, #tpu.memory_space<vmem>>, vector<16x768xf32>
      %c0_10 = arith.constant 0 : index
      %c0_11 = arith.constant 0 : index
      %11 = vector.load %arg3[%c0_10, %c0_11] : memref<768x1024xf32, #tpu.memory_space<vmem>>, vector<768x1024xf32>
      %cst_12 = arith.constant dense<0.000000e+00> : vector<16x1024xf32>
      %12 = tpu.matmul %10, %11, %cst_12 {dimension_numbers = #tpu.dot_dimension_numbers<[1], [0], [0], [1], [0, 0, 1, 1], [], []>} : vector<16x768xf32>, vector<768x1024xf32>, vector<16x1024xf32> -> vector<16x1024xf32>
      %c0_13 = arith.constant 0 : index
      %c0_14 = arith.constant 0 : index
      %13 = vector.load %arg4[%c0_13, %c0_14] : memref<1x1024xf32, #tpu.memory_space<vmem>>, vector<1x1024xf32>
      %14 = vector.broadcast %13 : vector<1x1024xf32> to vector<16x1024xf32>
      %15 = arith.addf %12, %14 : vector<16x1024xf32>
      %cst_15 = arith.constant 0.000000e+00 : f32
      %16 = vector.broadcast %cst_15 : f32 to vector<16x1024xf32>
      %17 = arith.maximumf %15, %16 : vector<16x1024xf32>
      %c0_16 = arith.constant 0 : index
      %c0_17 = arith.constant 0 : index
      %18 = vector.load %arg8[%c0_16, %c0_17] : memref<16x1792xf32, #tpu.memory_space<vmem>>, vector<16x768xf32>
      tpu.vector_store %arg8[%c0_16, %c0_17], %10 {strides = array<i32>} : memref<16x1792xf32, #tpu.memory_space<vmem>>, vector<16x768xf32>,
      %c0_18 = arith.constant 0 : index
      %c768 = arith.constant 768 : index
      %19 = vector.load %arg8[%c0_18, %c768] : memref<16x1792xf32, #tpu.memory_space<vmem>>, vector<16x1024xf32>
      tpu.vector_store %arg8[%c0_18, %c768], %17 {strides = array<i32>} : memref<16x1792xf32, #tpu.memory_space<vmem>>, vector<16x1024xf32>,
    } else {
    }
    %c0 = arith.constant 0 : index
    %c0_1 = arith.constant 0 : index
    %3 = vector.load %arg8[%c0, %c0_1] : memref<16x1792xf32, #tpu.memory_space<vmem>>, vector<16x1792xf32>
    %c0_2 = arith.constant 0 : index
    %c0_3 = arith.constant 0 : index
    %4 = vector.load %arg5[%c0_2, %c0_3] : memref<1792x256xf32, #tpu.memory_space<vmem>>, vector<1792x256xf32>
    %cst = arith.constant dense<0.000000e+00> : vector<16x256xf32>
    %5 = tpu.matmul %3, %4, %cst {dimension_numbers = #tpu.dot_dimension_numbers<[1], [0], [0], [1], [0, 0, 1, 1], [], []>} : vector<16x1792xf32>, vector<1792x256xf32>, vector<16x256xf32> -> vector<16x256xf32>
    %c0_4 = arith.constant 0 : index
    %c0_5 = arith.constant 0 : index
    %6 = vector.load %arg6[%c0_4, %c0_5] : memref<1x256xf32, #tpu.memory_space<vmem>>, vector<1x256xf32>
    %7 = vector.broadcast %6 : vector<1x256xf32> to vector<16x256xf32>
    %8 = arith.addf %5, %7 : vector<16x256xf32>
    %c0_6 = arith.constant 0 : index
    %c0_7 = arith.constant 0 : index
    %9 = vector.load %arg7[%c0_6, %c0_7] : memref<16x256xf32, #tpu.memory_space<vmem>>, vector<16x256xf32>
    tpu.vector_store %arg7[%c0_6, %c0_7], %8 {strides = array<i32>} : memref<16x256xf32, #tpu.memory_space<vmem>>, vector<16x256xf32>,
    return
  }
  func.func @transform_0(%arg0: i32, %arg1: i32) -> (i32, i32) {
    %c0_i32 = arith.constant 0 : i32
    %c0_i32_0 = arith.constant 0 : i32
    return %arg0, %c0_i32 : i32, i32
  }
  func.func @transform_1(%arg0: i32, %arg1: i32) -> (i32, i32) {
    %c0_i32 = arith.constant 0 : i32
    %c0_i32_0 = arith.constant 0 : i32
    %c0_i32_1 = arith.constant 0 : i32
    return %c0_i32, %c0_i32_0 : i32, i32
  }
  func.func @transform_2(%arg0: i32, %arg1: i32) -> (i32, i32) {
    %c0_i32 = arith.constant 0 : i32
    %c0_i32_0 = arith.constant 0 : i32
    %c0_i32_1 = arith.constant 0 : i32
    return %c0_i32, %c0_i32_0 : i32, i32
  }
  func.func @transform_3(%arg0: i32, %arg1: i32) -> (i32, i32) {
    %c0_i32 = arith.constant 0 : i32
    %c0_i32_0 = arith.constant 0 : i32
    return %c0_i32, %arg1 : i32, i32
  }
  func.func @transform_4(%arg0: i32, %arg1: i32) -> (i32, i32) {
    %c0_i32 = arith.constant 0 : i32
    %c0_i32_0 = arith.constant 0 : i32
    return %c0_i32, %arg1 : i32, i32
  }
  func.func @transform_5(%arg0: i32, %arg1: i32) -> (i32, i32) {
    %c0_i32 = arith.constant 0 : i32
    return %arg0, %arg1 : i32, i32
  }
}

</mosaic_0001>

<bundles_post_ra>
// kernel: tpu_custom_call.1
= control target key start
LH: loop header
LB: loop body
LE: loop exit
PB: predicated region body
PF: predicated region fallthrough
CT: control target
= control target key end

     0   :  { %s5869_s0 = inlined_call_operand.hbm [shape: f32[16,768], index: 0, kind: input, shape index: {}]   ;;  %s5870_s1 = inlined_call_operand.hbm [shape: f32[768,1024], index: 1, kind: input, shape index: {}]   ;;  %s5871_s2 = inlined_call_operand.hbm [shape: f32[1,1024], index: 2, kind: input, shape index: {}]   ;;  %s5872_s3 = inlined_call_operand.hbm [shape: f32[1792,1024], index: 3, kind: input, shape index: {}]   ;;  %s5873_s4 = inlined_call_operand.hbm [shape: f32[1,1024], index: 4, kind: input, shape index: {}]   ;;  %s5874_s5 = inlined_call_operand.hbm [shape: f32[16,1024], index: 5, kind: output, shape index: {}]  }
   0x1   :  { %5891 = sst [smem:[#allocation22_spill]] %s5870_s1 }
   0x2   :  { %5892 = sst [smem:[#allocation23_spill]] %s5872_s3 }
   0x3   :  { %5893 = sst [smem:[#allocation24_spill]] %s5874_s5 }
   0x4   :  { %10 = vsyncpa [#allocation4], 0 }
   0x5   :  { %11 = vsyncpa [#allocation7], 0 }
   0x6   :  { %12 = vsyncpa [#allocation10], 0 }
   0x7   :  { %14 = vsyncpa [#allocation10 + $0x1], 0 }
   0x8   :  { %15 = vsyncpa [#allocation5], 0 }
   0x9   :  { %17 = vsyncpa [#allocation5 + $0x1], 0  ;;  %s5080_s18 = smov 0   ;;  %s5082_s19 = smov 0  }
   0xa   :  { %s5084_s20 = smov 0   ;;  %s5086_s21 = smov 0  }
   0xb   :  { %s5088_s22 = smov 0   ;;  %s5090_s23 = smov 0  }
   0xc LB: > { %5894 = sst [smem:[#allocation17_spill]] %s5013_s18  ;;  %s5111_s24 = sadd.s32 4294967295, %s5033_s23   ;;  %s5033_s23 = sphi %s5090_s23, %s23_s23   ;;  %s5029_s22 = sphi %s5088_s22, %s5934_s22   ;;  %s5025_s21 = sphi %s5086_s21, %s5933_s21   ;;  %s5021_s20 = sphi %s5084_s20, %s5932_s20   ;;  %s5017_s19 = sphi %s5082_s19, %s5931_s19   ;;  %s5013_s18 = sphi %s5080_s18, %s5930_s18  }
   0xd   : > { %s3328_s25 = sadd.s32 4294967294, %s5033_s23   ;;  %p117_p0 = scmp.ne.s32.totalorder %s5021_s20, %s5017_s19 }
   0xe   : > { %p118_p1 = scmp.eq.s32.totalorder %s5033_s23, 0  ;;  %p123_p2 = scmp.ne.s32.totalorder %s5017_s19, %s5013_s18 }
   0xf   : > { %p5875_p3 = scmp.eq.s32.totalorder %s5111_s24, 0  ;;  %p175_p4 = scmp.eq.s32.totalorder %s5111_s24, 3 }
  0x10   : > { %p5122_p5 = por %p118_p1, %p117_p0  ;;  %p181_p6 = scmp.eq.s32.totalorder %s3328_s25, 3 }
  0x11   : > { %p5128_p7 = por %p5875_p3, %p123_p2  ;;  %p5132_p8 = por %p175_p4, %p117_p0 }
  0x12   : > { %p5136_p9 = por %p181_p6, %p123_p2  ;;  %p3329_p10 = scmp.ge.s32.totalorder %s5033_s23, 1 }
  0x13   : > { %s5896_s28 = scalar_select %p5128_p7, 1, 0 }
  0x14   : > { %s5897_s29 = scalar_select %p5132_p8, 1, 0 }
  0x15   : > { %s5899_s30 = scalar_select %p5136_p9, 1, 0 }
  0x16   : > { %5898 = sst [smem:[#allocation18_spill]] %s5897_s29  ;;  %p188_p11 = scmp.lt.s32.totalorder %s5033_s23, 5 }
  0x17   : > { %5900 = sst [smem:[#allocation19_spill]] %s5899_s30  ;;  %s5035_s7 = smov [#allocation6]  }
  0x18   : > { %p5142_p12 = pnand %p3329_p10, %p188_p11  ;;  %s217_s8 = sshll.u32 %s5035_s7, 4  ;;  %s5146_s8 = int_to_ptr.vmem [resolvable:$true] %s217_s8 }
  0x19   : > { %p4722_p0 = scmp.lt.s32.totalorder %s5033_s23, 4  ;;  %s32_s11 = sadd.s32 1, %s5029_s22 }
  0x1a   : > { %s5901_s6 = scalar_select %p5142_p12, 1, 0 }
  0x1b   : > { %p4698_p13 = pneg %p5142_p12  ;;  %p5159_p2 = pnand %p4722_p0, %p5122_p5 }
  0x1c   : > { %p5164_p4 = scmp.ge.s32.totalorder %s32_s11, 4  ;;  %s5905_s1 = sld [smem:[#allocation22_spill]] }
  0x1d   : > { %p5153_p1 = pnand %p4698_p13, %p5875_p3 }
  0x1e   : > { %s5903_s10 = scalar_select %p5159_p2, 1, 0 }
  0x1f   : > { %s5902_s9 = scalar_select %p5153_p1, 1, 0 }
  0x20   : > { %p5176_p10 = pneg %p5153_p1 }
  0x22   : > { %s4799_s15 = scalar_lea.hbm %s5905_s1, 98304 }
  0x23   : > { %p4800_p6 = scmp.ne.s32.totalorder %s5905_s1, %s4799_s15  ;;  %p4806_p13 = scmp.lt.u32.totalorder %s4799_s15, %s5905_s1 }
  0x25   : > { %p4802_p5 = pnand %p5176_p10, %p4800_p6 }
  0x27   : > { %p4803_p11 = pneg %p4802_p5 }
  0x29   : > { %p4808_p0 = pnand %p4806_p13, %p4803_p11 }
  0x2b   : > { %4811 = shalt.err (!%p4808_p0)
}
  0x2c   : > { %s4812_s13 = scalar_lea.vmem %s5146_s8, 98304  ;;  %p4820_p7 = scmp.lt.s32.totalorder %s5146_s8, %s5146_s8 }
  0x2d   : > { %p4813_p3 = scmp.ne.s32.totalorder %s5146_s8, %s4812_s13  ;;  %p4821_p12 = scmp.lt.s32.totalorder %s4812_s13, %s4812_s13 }
  0x2f   : > { %p4815_p9 = pnand %p4813_p3, %p5176_p10  ;;  %p4822_p6 = por %p4821_p12, %p4820_p7 }
  0x31   : > { %p4816_p8 = pneg %p4815_p9 }
  0x33   : > { %p4823_p5 = pnand %p4822_p6, %p4816_p8 }
  0x35   : > { %4826 = shalt.err (!%p4823_p5)
}
  0x36   : > { %s5036_s14 = smov 1024   ;;  %s5037_s15 = smov 64  }
  0x37   : > { %4704 = dma.hbm_to_vmem [thread:$0]  (!%p5153_p1), %s5905_s1, 98304, %s5146_s8, [#allocation7], %s5036_s14, %s5036_s14, %s5037_s15  }
  0x38   : > { %s242_s27 = sand.u32 1, %s5033_s23   ;;  %s5936_s11 = smov (%p5164_p4, %s32_s11), 0 }
  0x39   : > { %5907 = sst [smem:[#allocation20_spill]] %s5936_s11  ;;  %s5884_s7 = sand.u32 1, %s5021_s20  }
  0x3a   : > { %s107_s13 = ssub.s32 %s5029_s22, %s5936_s11  ;;  %s4678_s26 = smul.u32 3584, %s5884_s7 }
  0x3b   : > { %p108_p3 = scmp.eq.s32.totalorder %s107_s13, 0  ;;  %s3351_s30 = sshll.u32 %s5029_s22, 8 }
  0x3c   : > { %s5908_s3 = sld [smem:[#allocation23_spill]]  ;;  %s5909_s16 = sadd.s32 1, %s5021_s20 }
  0x3d   : > { %s5218_s8 = scalar_select %p108_p3, %s5021_s20, %s5909_s16  }
  0x3e   : > { %s246_s12 = scalar_lea.vmem [#allocation9], %s4678_s26  ;;  %s5222_s17 = scalar_lea.sflag [#allocation10], %s242_s27 }
  0x3f   : > { %5910 = sst [smem:[#allocation21_spill]] %s5218_s8  ;;  %s253_s15 = sshll.u32 %s246_s12, 4  ;;  %s5220_s15 = int_to_ptr.vmem [resolvable:$true] %s253_s15 }
  0x40   : > { %p5887_p8 = pneg %p5159_p2 }
  0x42   : > { %s5213_s29 = scalar_lea.hbm %s5908_s3, %s3351_s30  ;;  %s4832_s30 = scalar_lea.hbm %s5908_s3, 229376 }
  0x43   : > { %s4827_s13 = scalar_lea.hbm %s5213_s29, 57344  ;;  %p4833_p4 = scmp.lt.u32.totalorder %s5213_s29, %s5908_s3 }
  0x44   : > { %p4828_p7 = scmp.ne.s32.totalorder %s5213_s29, %s4827_s13  ;;  %p4834_p11 = scmp.lt.u32.totalorder %s4832_s30, %s4827_s13 }
  0x45   : > { %p4836_p0 = scmp.lt.u32.totalorder %s4827_s13, %s5213_s29 }
  0x46   : > { %p4830_p9 = pnand %p5887_p8, %p4828_p7  ;;  %p4835_p13 = por %p4834_p11, %p4833_p4 }
  0x48   : > { %p4831_p12 = pneg %p4830_p9  ;;  %p4837_p6 = por %p4836_p0, %p4835_p13 }
  0x4a   : > { %p4838_p5 = pnand %p4837_p6, %p4831_p12 }
  0x4c   : > { %4841 = shalt.err (!%p4838_p5)
}
  0x4d   : > { %s4842_s26 = scalar_lea.vmem %s5220_s15, 57344  ;;  %s5038_s27 = smov [#allocation9]  }
  0x4e   : > { %p4843_p3 = scmp.ne.s32.totalorder %s5220_s15, %s4842_s26  ;;  %s4847_s12 = sshll.u32 %s5038_s27, 4  ;;  %s4848_s12 = int_to_ptr.vmem [resolvable:$false] %s4847_s12 }
  0x4f   : > { %s4849_s7 = scalar_lea.vmem %s4848_s12, 114688  ;;  %p4850_p1 = scmp.lt.s32.totalorder %s5220_s15, %s4848_s12 }
  0x50   : > { %p4845_p7 = pnand %p4843_p3, %p5887_p8  ;;  %p4851_p4 = scmp.lt.s32.totalorder %s4849_s7, %s4842_s26 }
  0x52   : > { %p4846_p9 = pneg %p4845_p7  ;;  %p4852_p11 = por %p4851_p4, %p4850_p1 }
  0x54   : > { %p4853_p13 = pnand %p4852_p11, %p4846_p9 }
  0x56   : > { %4856 = shalt.err (!%p4853_p13)
}
  0x57   : > { %s5039_s13 = smov 256   ;;  %s5040_s5 = smov 16  }
  0x58   : > { %4711 = dma.hbm_to_vmem [thread:$0]  (!%p5159_p2), %s5213_s29, 57344, %s5220_s15, %s5222_s17, %s5036_s14, %s5039_s13, %s5040_s5  }
  0x59   : > { %s5041_s18 = smov [#allocation3]   ;;  %s4857_s26 = scalar_lea.hbm %s5869_s0, 1536 }
  0x5a   : > { %s204_s30 = sshll.u32 %s5041_s18, 4  ;;  %p4858_p1 = scmp.ne.s32.totalorder %s5869_s0, %s4857_s26  ;;  %s205_s30 = int_to_ptr.vmem [resolvable:$true] %s204_s30 }
  0x5b   : > { %p4864_p6 = scmp.lt.u32.totalorder %s4857_s26, %s5869_s0 }
  0x5c   : > { %p4860_p12 = pnand %p4858_p1, %p5176_p10 }
  0x5e   : > { %p4861_p0 = pneg %p4860_p12 }
  0x60   : > { %p4866_p5 = pnand %p4864_p6, %p4861_p0 }
  0x62   : > { %4869 = shalt.err (!%p4866_p5)
}
  0x63   : > { %s4870_s29 = scalar_lea.vmem %s205_s30, 1536  ;;  %p4878_p4 = scmp.lt.s32.totalorder %s205_s30, %s205_s30 }
  0x64   : > { %p4871_p3 = scmp.ne.s32.totalorder %s205_s30, %s4870_s29  ;;  %p4879_p11 = scmp.lt.s32.totalorder %s4870_s29, %s4870_s29 }
  0x66   : > { %p4873_p7 = pnand %p4871_p3, %p5176_p10  ;;  %p4880_p13 = por %p4879_p11, %p4878_p4 }
  0x68   : > { %p4874_p9 = pneg %p4873_p7 }
  0x6a   : > { %p4881_p8 = pnand %p4880_p13, %p4874_p9 }
  0x6c   : > { %4884 = shalt.err (!%p4881_p8)
}
  0x6d   : > { %s5042_s14 = smov 768   ;;  %s5043_s15 = smov 48  }
  0x6e   : > { %p5911_p1 = scmp.ne.s32.totalorder %s5902_s9, 0  ;;  %s5044_s13 = smov [#allocation8]  }
  0x6f   : > { %s231_s5 = sshll.u32 %s5044_s13, 4  ;;  %s5912_s18 = sand.u32 1, %s5021_s20   ;;  %s232_s5 = int_to_ptr.vmem [resolvable:$true] %s231_s5 }
  0x70   : > { %4701 = dma.hbm_to_vmem [thread:$0]  (!%p5911_p1), %s5869_s0, 1536, %s205_s30, [#allocation4], %s5042_s14, %s5042_s14, %s5043_s15  }
  0x71   : > { %s3336_s16 = sshll.u32 %s5912_s18, 1  ;;  %s4885_s12 = scalar_lea.hbm %s5871_s2, 128 }
  0x72   : > { %p4886_p8 = scmp.ne.s32.totalorder %s5871_s2, %s4885_s12  ;;  %p4892_p6 = scmp.lt.u32.totalorder %s4885_s12, %s5871_s2 }
  0x74   : > { %p4888_p12 = pnand %p4886_p8, %p5176_p10 }
  0x76   : > { %p4889_p0 = pneg %p4888_p12 }
  0x78   : > { %p4894_p5 = pnand %p4892_p6, %p4889_p0 }
  0x7a   : > { %4897 = shalt.err (!%p4894_p5)
}
  0x7b   : > { %s4898_s30 = scalar_lea.vmem %s232_s5, 128  ;;  %p4906_p4 = scmp.lt.s32.totalorder %s232_s5, %s232_s5 }
  0x7c   : > { %p4899_p3 = scmp.ne.s32.totalorder %s232_s5, %s4898_s30  ;;  %p4907_p11 = scmp.lt.s32.totalorder %s4898_s30, %s4898_s30 }
  0x7e   : > { %p4901_p7 = pnand %p4899_p3, %p5176_p10  ;;  %p4908_p13 = por %p4907_p11, %p4906_p4 }
  0x80   : > { %p4902_p9 = pneg %p4901_p7 }
  0x82   : > { %p4909_p2 = pnand %p4908_p13, %p4902_p9 }
  0x84   : > { %4912 = shalt.err (!%p4909_p2)
}
  0x85   : > { %4707 = dma.hbm_to_vmem [thread:$0]  (!%p5911_p1), %s5871_s2, 128, %s232_s5, [#allocation7]  }
  0x86   : > { %s3352_s11 = sshll.u32 %s5029_s22, 5  ;;  %s267_s8 = scalar_lea.vmem [#allocation11], %s3336_s16 }
  0x87   : > { %s275_s1 = sshll.u32 %s267_s8, 4  ;;  %s273_s13 = scalar_lea.hbm %s5873_s4, %s3352_s11  ;;  %s276_s1 = int_to_ptr.vmem [resolvable:$true] %s275_s1 }
  0x88   : > { %s4913_s18 = scalar_lea.hbm %s273_s13, 32  ;;  %p5913_p8 = scmp.ne.s32.totalorder %s5903_s10, 0 }
  0x89   : > { %p4914_p10 = scmp.ne.s32.totalorder %s273_s13, %s4913_s18  ;;  %s4918_s26 = scalar_lea.hbm %s5873_s4, 128 }
  0x8a   : > { %p5914_p2 = pneg %p5913_p8  ;;  %p4919_p1 = scmp.lt.u32.totalorder %s273_s13, %s5873_s4 }
  0x8b   : > { %p4920_p6 = scmp.lt.u32.totalorder %s4918_s26, %s4913_s18  ;;  %p4922_p3 = scmp.lt.u32.totalorder %s4913_s18, %s273_s13 }
  0x8c   : > { %p4916_p12 = pnand %p4914_p10, %p5914_p2 }
  0x8d   : > { %p4921_p5 = por %p4920_p6, %p4919_p1 }
  0x8e   : > { %p4917_p0 = pneg %p4916_p12 }
  0x8f   : > { %p4923_p7 = por %p4922_p3, %p4921_p5 }
  0x91   : > { %p4924_p9 = pnand %p4923_p7, %p4917_p0 }
  0x93   : > { %4927 = shalt.err (!%p4924_p9)
}
  0x94   : > { %s4928_s16 = scalar_lea.vmem %s276_s1, 32  ;;  %p5915_p11 = pmov %p5914_p2 }
  0x95   : > { %p4929_p4 = scmp.ne.s32.totalorder %s276_s1, %s4928_s16  ;;  %s5045_s7 = smov [#allocation11]  }
  0x96   : > { %s4933_s29 = sshll.u32 %s5045_s7, 4  ;;  %s4934_s29 = int_to_ptr.vmem [resolvable:$false] %s4933_s29 }
  0x97   : > { %p4931_p13 = pnand %p4929_p4, %p5915_p11  ;;  %s4935_s30 = scalar_lea.vmem %s4934_s29, 64 }
  0x98   : > { %p4936_p2 = scmp.lt.s32.totalorder %s276_s1, %s4934_s29  ;;  %p4937_p12 = scmp.lt.s32.totalorder %s4935_s30, %s4928_s16 }
  0x99   : > { %p4932_p10 = pneg %p4931_p13 }
  0x9a   : > { %p4938_p1 = por %p4937_p12, %p4936_p2 }
  0x9c   : > { %p4939_p6 = pnand %p4938_p1, %p4932_p10 }
  0x9e   : > { %4942 = shalt.err (!%p4939_p6)
}
  0x9f   : > { %4714 = dma.hbm_to_vmem [thread:$0]  (!%p5913_p8), %s273_s13, 32, %s276_s1, %s5222_s17  }
  0xa0   : > { %p5916_p0 = scmp.ne.s32.totalorder %s5901_s6, 0 }
  0xa1   : > { %p5917_p5 = scmp.eq.s32.totalorder (!%p5916_p0), %s5111_s24, 0 }
  0xa2   : > { %284 = sbr.rel (%p5916_p0) target bundleno = 1284 (0x504), region = 40 }
  0xa9   : > { %4996 = dma.done.wait (%p5917_p5), [#allocation4], 1536   ;;  %p5918_p3 = pmov %p5917_p5 }
  0xab   : > { %4998 = vsyncadd (%p5918_p3), [#allocation4], 4294965760  ;;  %p5919_p7 = pmov %p5918_p3 }
  0xac   : > { %p5920_p9 = pmov %p5918_p3 }
  0xad   : > { %5000 = dma.done.wait (%p5919_p7), [#allocation7], 98432  }
  0xae   : > { %5002 = vsyncadd (%p5920_p9), [#allocation7], 4294868864  ;;  %s298_s10 = sand.u32 1, %s5111_s24   ;;  %s5320_s17 = sand.u32 1, %s5017_s19  }
  0xaf   : > { %s4679_s6 = smul.u32 3584, %s5320_s17  ;;  %s299_s14 = scalar_lea.sflag [#allocation10], %s298_s10 }
  0xb0   : > { %p5921_p8 = scmp.ne.s32.totalorder %s5896_s28, 0 }
  0xb1   : > { %s5323_s15 = scalar_lea.vmem [#allocation9], %s4679_s6 }
  0xb2   : > { %5004 = dma.done.wait (%p5921_p8), %s299_s14, 57376  }
  0xb3   : > { %5006 = vsyncadd (%p5921_p8), %s299_s14, 4294909920  ;;  %s3343_s11 = sshll.u32 %s5320_s17, 1  ;;  %s3344_s8 = sshll.u32 %s5320_s17, 5 }
  0xb4   : > { %s5331_s1 = scalar_lea.vmem [#allocation11], %s3343_s11  ;;  %s5333_s3 = scalar_lea.vmem [#allocation12], %s3344_s8 }
  0xb5   : > { %p3345_p4 = scmp.ne.s32.totalorder %s5025_s21, 0 }
  0xb6   : > { %v365_v0 = vld [vmem:[#allocation6 + $0x8] sm:$0xff] (!%p3345_p4)  ;;  %v367_v2 = vld [vmem:[#allocation6 + $0x18] sm:$0xff] (!%p3345_p4)  ;;  %v364_v5 = vld [vmem:[#allocation6] sm:$0xff] (!%p3345_p4) }
  0xb7   : > { %351 = sbr.rel (%p3345_p4) target bundleno = 793 (0x319), region = 64  ;;  %v373_v1 = vld [vmem:[#allocation6 + $0x48] sm:$0xff] (!%p3345_p4)  ;;  %v375_v4 = vld [vmem:[#allocation6 + $0x58] sm:$0xff] (!%p3345_p4)  ;;  %v372_v6 = vld [vmem:[#allocation6 + $0x40] sm:$0xff] (!%p3345_p4) }
  0xb8   : > { %v3354_v3 = vpack.c.bf16 (!%p3345_p4), %v373_v1, %v365_v0  ;;  %v3546_v7 = vpack.c.bf16 (!%p3345_p4), %v375_v4, %v367_v2  ;;  %v3356_v8 = vpack.c.bf16 (!%p3345_p4), %v372_v6, %v364_v5  ;;  %v366_v9 = vld [vmem:[#allocation6 + $0x10] sm:$0xff] (!%p3345_p4)  ;;  %v381_v11 = vld [vmem:[#allocation6 + $0x88] sm:$0xff] (!%p3345_p4)  ;;  %v383_v14 = vld [vmem:[#allocation6 + $0x98] sm:$0xff] (!%p3345_p4) }
  0xb9   : > { %v374_v10 = vld [vmem:[#allocation6 + $0x50] sm:$0xff] (!%p3345_p4)  ;;  %v389_v13 = vld [vmem:[#allocation6 + $0xc8] sm:$0xff] (!%p3345_p4)  ;;  %v391_v15 = vld [vmem:[#allocation6 + $0xd8] sm:$0xff] (!%p3345_p4) }
  0xba   : > { %3355 = vmatprep.subr.bf16.mxu0 (!%p3345_p4), %v3354_v3  ;;  %v3548_v12 = vpack.c.bf16 (!%p3345_p4), %v374_v10, %v366_v9  ;;  %3547 = vmatprep.subr.bf16.mxu1 (!%p3345_p4), %v3546_v7  ;;  %v3358_v16 = vpack.c.bf16 (!%p3345_p4), %v389_v13, %v381_v11  ;;  %v3550_v17 = vpack.c.bf16 (!%p3345_p4), %v391_v15, %v383_v14  ;;  %v380_v18 = vld [vmem:[#allocation6 + $0x80] sm:$0xff] (!%p3345_p4)  ;;  %v382_v20 = vld [vmem:[#allocation6 + $0x90] sm:$0xff] (!%p3345_p4)  ;;  %v397_v23 = vld [vmem:[#allocation6 + $0x108] sm:$0xff] (!%p3345_p4) }
  0xbb   : > { %3357 = vmatpush1.bf16.msra.mxu0 (!%p3345_p4), %v3356_v8  ;;  %v388_v19 = vld [vmem:[#allocation6 + $0xc0] sm:$0xff] (!%p3345_p4)  ;;  %v390_v22 = vld [vmem:[#allocation6 + $0xd0] sm:$0xff] (!%p3345_p4)  ;;  %v405_v24 = vld [vmem:[#allocation6 + $0x148] sm:$0xff] (!%p3345_p4) }
  0xbc   : > { %3549 = vmatpush1.bf16.msra.mxu1 (!%p3345_p4), %v3548_v12  ;;  %v3360_v21 = vpack.c.bf16 (!%p3345_p4), %v388_v19, %v380_v18  ;;  %3359 = vmatprep.subr.bf16.mxu0 (!%p3345_p4), %v3358_v16  ;;  %v3552_v25 = vpack.c.bf16 (!%p3345_p4), %v390_v22, %v382_v20  ;;  %v3362_v26 = vpack.c.bf16 (!%p3345_p4), %v405_v24, %v397_v23  ;;  %v399_v27 = vld [vmem:[#allocation6 + $0x118] sm:$0xff] (!%p3345_p4)  ;;  %v396_v29 = vld [vmem:[#allocation6 + $0x100] sm:$0xff] (!%p3345_p4)  ;;  %v398_v32 = vld [vmem:[#allocation6 + $0x110] sm:$0xff] (!%p3345_p4) }
  0xbd   : > { %3551 = vmatprep.subr.bf16.mxu1 (!%p3345_p4), %v3550_v17  ;;  %v407_v28 = vld [vmem:[#allocation6 + $0x158] sm:$0xff] (!%p3345_p4)  ;;  %v404_v31 = vld [vmem:[#allocation6 + $0x140] sm:$0xff] (!%p3345_p4)  ;;  %v406_v33 = vld [vmem:[#allocation6 + $0x150] sm:$0xff] (!%p3345_p4) }
  0xbe   : > { %v3554_v30 = vpack.c.bf16 %v407_v28, %v399_v27  ;;  %v3364_v34 = vpack.c.bf16 %v404_v31, %v396_v29  ;;  %v413_v35 = vld [vmem:[#allocation6 + $0x188] sm:$0xff]  ;;  %v415_v37 = vld [vmem:[#allocation6 + $0x198] sm:$0xff]  ;;  %v3556_v38 = vpack.c.bf16 %v406_v33, %v398_v32  ;;  %v412_v41 = vld [vmem:[#allocation6 + $0x180] sm:$0xff] }
  0xbf   : > { %3361 = vmatpush1.bf16.msra.mxu0 %v3360_v21  ;;  %v421_v36 = vld [vmem:[#allocation6 + $0x1c8] sm:$0xff]  ;;  %v423_v40 = vld [vmem:[#allocation6 + $0x1d8] sm:$0xff]  ;;  %v420_v42 = vld [vmem:[#allocation6 + $0x1c0] sm:$0xff] }
  0xc0   : > { %3553 = vmatpush1.bf16.msra.mxu1 %v3552_v25  ;;  %3363 = vmatprep.subr.bf16.mxu0 %v3362_v26  ;;  %v3366_v39 = vpack.c.bf16 %v421_v36, %v413_v35  ;;  %v3558_v43 = vpack.c.bf16 %v423_v40, %v415_v37  ;;  %v414_v44 = vld [vmem:[#allocation6 + $0x190] sm:$0xff]  ;;  %v429_v46 = vld [vmem:[#allocation6 + $0x208] sm:$0xff]  ;;  %v431_v48 = vld [vmem:[#allocation6 + $0x218] sm:$0xff]  ;;  %v3368_v50 = vpack.c.bf16 %v420_v42, %v412_v41 }
  0xc1   : > { %3555 = vmatprep.subr.bf16.mxu1 %v3554_v30  ;;  %v422_v45 = vld [vmem:[#allocation6 + $0x1d0] sm:$0xff]  ;;  %v437_v47 = vld [vmem:[#allocation6 + $0x248] sm:$0xff]  ;;  %v439_v49 = vld [vmem:[#allocation6 + $0x258] sm:$0xff] }
  0xc2   : > { %v3560_v51 = vpack.c.bf16 %v422_v45, %v414_v44  ;;  %v3370_v52 = vpack.c.bf16 %v437_v47, %v429_v46  ;;  %v428_v53 = vld [vmem:[#allocation6 + $0x200] sm:$0xff]  ;;  %v430_v55 = vld [vmem:[#allocation6 + $0x210] sm:$0xff]  ;;  %v3562_v56 = vpack.c.bf16 %v439_v49, %v431_v48  ;;  %v445_v58 = vld [vmem:[#allocation6 + $0x288] sm:$0xff] }
  0xc3   : > { %3365 = vmatpush1.bf16.msra.mxu0 %v3364_v34  ;;  %v436_v54 = vld [vmem:[#allocation6 + $0x240] sm:$0xff]  ;;  %v438_v57 = vld [vmem:[#allocation6 + $0x250] sm:$0xff]  ;;  %v453_v59 = vld [vmem:[#allocation6 + $0x2c8] sm:$0xff] }
  0xc4   : > { %3557 = vmatpush1.bf16.msra.mxu1 %v3556_v38  ;;  %3367 = vmatprep.subr.bf16.mxu0 %v3366_v39  ;;  %v447_v60 = vld [vmem:[#allocation6 + $0x298] sm:$0xff]  ;;  %v3372_v62 = vpack.c.bf16 %v436_v54, %v428_v53  ;;  %v3564_v63 = vpack.c.bf16 %v438_v57, %v430_v55  ;;  %v3374_v0 = vpack.c.bf16 %v453_v59, %v445_v58  ;;  %v444_v1 = vld [vmem:[#allocation6 + $0x280] sm:$0xff]  ;;  %v446_v3 = vld [vmem:[#allocation6 + $0x290] sm:$0xff] }
  0xc5   : > { %3559 = vmatprep.subr.bf16.mxu1 %v3558_v43  ;;  %v455_v61 = vld [vmem:[#allocation6 + $0x2d8] sm:$0xff]  ;;  %v452_v2 = vld [vmem:[#allocation6 + $0x2c0] sm:$0xff]  ;;  %v454_v5 = vld [vmem:[#allocation6 + $0x2d0] sm:$0xff] }
  0xc6   : > { %v3566_v4 = vpack.c.bf16 %v455_v61, %v447_v60  ;;  %v461_v6 = vld [vmem:[#allocation6 + $0x308] sm:$0xff]  ;;  %v463_v8 = vld [vmem:[#allocation6 + $0x318] sm:$0xff]  ;;  %v3376_v10 = vpack.c.bf16 %v452_v2, %v444_v1  ;;  %v3568_v11 = vpack.c.bf16 %v454_v5, %v446_v3  ;;  %v460_v13 = vld [vmem:[#allocation6 + $0x300] sm:$0xff] }
  0xc7   : > { %3369 = vmatpush1.bf16.msra.mxu0 %v3368_v50  ;;  %v469_v7 = vld [vmem:[#allocation6 + $0x348] sm:$0xff]  ;;  %v471_v9 = vld [vmem:[#allocation6 + $0x358] sm:$0xff]  ;;  %v468_v14 = vld [vmem:[#allocation6 + $0x340] sm:$0xff] }
  0xc8   : > { %3561 = vmatpush1.bf16.msra.mxu1 %v3560_v51  ;;  %3371 = vmatprep.subr.bf16.mxu0 %v3370_v52  ;;  %v3378_v12 = vpack.c.bf16 %v469_v7, %v461_v6  ;;  %v462_v15 = vld [vmem:[#allocation6 + $0x310] sm:$0xff]  ;;  %v3570_v16 = vpack.c.bf16 %v471_v9, %v463_v8  ;;  %v477_v18 = vld [vmem:[#allocation6 + $0x388] sm:$0xff]  ;;  %v479_v20 = vld [vmem:[#allocation6 + $0x398] sm:$0xff]  ;;  %v3380_v22 = vpack.c.bf16 %v468_v14, %v460_v13 }
  0xc9   : > { %3563 = vmatprep.subr.bf16.mxu1 %v3562_v56  ;;  %v470_v17 = vld [vmem:[#allocation6 + $0x350] sm:$0xff]  ;;  %v485_v19 = vld [vmem:[#allocation6 + $0x3c8] sm:$0xff]  ;;  %v487_v21 = vld [vmem:[#allocation6 + $0x3d8] sm:$0xff] }
  0xca   : > { %v3572_v23 = vpack.c.bf16 %v470_v17, %v462_v15  ;;  %v3382_v24 = vpack.c.bf16 %v485_v19, %v477_v18  ;;  %v476_v25 = vld [vmem:[#allocation6 + $0x380] sm:$0xff]  ;;  %v478_v27 = vld [vmem:[#allocation6 + $0x390] sm:$0xff]  ;;  %v3574_v28 = vpack.c.bf16 %v487_v21, %v479_v20  ;;  %v493_v30 = vld [vmem:[#allocation6 + $0x408] sm:$0xff] }
  0xcb   : > { %3373 = vmatpush1.bf16.msra.mxu0 %v3372_v62  ;;  %v484_v26 = vld [vmem:[#allocation6 + $0x3c0] sm:$0xff]  ;;  %v486_v29 = vld [vmem:[#allocation6 + $0x3d0] sm:$0xff]  ;;  %v501_v31 = vld [vmem:[#allocation6 + $0x448] sm:$0xff] }
  0xcc   : > { %3565 = vmatpush1.bf16.msra.mxu1 %v3564_v63  ;;  %3375 = vmatprep.subr.bf16.mxu0 %v3374_v0  ;;  %v495_v32 = vld [vmem:[#allocation6 + $0x418] sm:$0xff]  ;;  %v3384_v34 = vpack.c.bf16 %v484_v26, %v476_v25  ;;  %v3576_v35 = vpack.c.bf16 %v486_v29, %v478_v27  ;;  %v3386_v36 = vpack.c.bf16 %v501_v31, %v493_v30  ;;  %v492_v37 = vld [vmem:[#allocation6 + $0x400] sm:$0xff]  ;;  %v494_v39 = vld [vmem:[#allocation6 + $0x410] sm:$0xff] }
  0xcd   : > { %3567 = vmatprep.subr.bf16.mxu1 %v3566_v4  ;;  %v503_v33 = vld [vmem:[#allocation6 + $0x458] sm:$0xff]  ;;  %v500_v38 = vld [vmem:[#allocation6 + $0x440] sm:$0xff]  ;;  %v502_v41 = vld [vmem:[#allocation6 + $0x450] sm:$0xff] }
  0xce   : > { %v3578_v40 = vpack.c.bf16 %v503_v33, %v495_v32  ;;  %v509_v42 = vld [vmem:[#allocation6 + $0x488] sm:$0xff]  ;;  %v511_v44 = vld [vmem:[#allocation6 + $0x498] sm:$0xff]  ;;  %v3388_v46 = vpack.c.bf16 %v500_v38, %v492_v37  ;;  %v3580_v47 = vpack.c.bf16 %v502_v41, %v494_v39  ;;  %v508_v49 = vld [vmem:[#allocation6 + $0x480] sm:$0xff] }
  0xcf   : > { %3377 = vmatpush1.bf16.msra.mxu0 %v3376_v10  ;;  %v517_v43 = vld [vmem:[#allocation6 + $0x4c8] sm:$0xff]  ;;  %v519_v45 = vld [vmem:[#allocation6 + $0x4d8] sm:$0xff]  ;;  %v516_v50 = vld [vmem:[#allocation6 + $0x4c0] sm:$0xff] }
  0xd0   : > { %3569 = vmatpush1.bf16.msra.mxu1 %v3568_v11  ;;  %3379 = vmatprep.subr.bf16.mxu0 %v3378_v12  ;;  %v3390_v48 = vpack.c.bf16 %v517_v43, %v509_v42  ;;  %v510_v51 = vld [vmem:[#allocation6 + $0x490] sm:$0xff]  ;;  %v3582_v52 = vpack.c.bf16 %v519_v45, %v511_v44  ;;  %v525_v54 = vld [vmem:[#allocation6 + $0x508] sm:$0xff]  ;;  %v527_v56 = vld [vmem:[#allocation6 + $0x518] sm:$0xff]  ;;  %v3392_v58 = vpack.c.bf16 %v516_v50, %v508_v49 }
  0xd1   : > { %3571 = vmatprep.subr.bf16.mxu1 %v3570_v16  ;;  %v518_v53 = vld [vmem:[#allocation6 + $0x4d0] sm:$0xff]  ;;  %v533_v55 = vld [vmem:[#allocation6 + $0x548] sm:$0xff]  ;;  %v535_v57 = vld [vmem:[#allocation6 + $0x558] sm:$0xff] }
  0xd2   : > { %v3584_v59 = vpack.c.bf16 %v518_v53, %v510_v51  ;;  %v3394_v60 = vpack.c.bf16 %v533_v55, %v525_v54  ;;  %v524_v61 = vld [vmem:[#allocation6 + $0x500] sm:$0xff]  ;;  %v526_v63 = vld [vmem:[#allocation6 + $0x510] sm:$0xff]  ;;  %v3586_v0 = vpack.c.bf16 %v535_v57, %v527_v56  ;;  %v541_v2 = vld [vmem:[#allocation6 + $0x588] sm:$0xff] }
  0xd3   : > { %3381 = vmatpush1.bf16.msra.mxu0 %v3380_v22  ;;  %v532_v62 = vld [vmem:[#allocation6 + $0x540] sm:$0xff]  ;;  %v534_v1 = vld [vmem:[#allocation6 + $0x550] sm:$0xff]  ;;  %v549_v3 = vld [vmem:[#allocation6 + $0x5c8] sm:$0xff] }
  0xd4   : > { %3573 = vmatpush1.bf16.msra.mxu1 %v3572_v23  ;;  %3383 = vmatprep.subr.bf16.mxu0 %v3382_v24  ;;  %v543_v4 = vld [vmem:[#allocation6 + $0x598] sm:$0xff]  ;;  %v3396_v6 = vpack.c.bf16 %v532_v62, %v524_v61  ;;  %v540_v7 = vld [vmem:[#allocation6 + $0x580] sm:$0xff]  ;;  %v3588_v8 = vpack.c.bf16 %v534_v1, %v526_v63  ;;  %v3398_v9 = vpack.c.bf16 %v549_v3, %v541_v2  ;;  %v542_v11 = vld [vmem:[#allocation6 + $0x590] sm:$0xff] }
  0xd5   : > { %3575 = vmatprep.subr.bf16.mxu1 %v3574_v28  ;;  %v551_v5 = vld [vmem:[#allocation6 + $0x5d8] sm:$0xff]  ;;  %v548_v10 = vld [vmem:[#allocation6 + $0x5c0] sm:$0xff]  ;;  %v550_v12 = vld [vmem:[#allocation6 + $0x5d0] sm:$0xff] }
  0xd6   : > { %v3590_v13 = vpack.c.bf16 %v551_v5, %v543_v4  ;;  %v557_v14 = vld [vmem:[#allocation6 + $0x608] sm:$0xff]  ;;  %v559_v17 = vld [vmem:[#allocation6 + $0x618] sm:$0xff]  ;;  %v3400_v19 = vpack.c.bf16 %v548_v10, %v540_v7  ;;  %v5336_v20 = vld [vmem:[#allocation3] sm:$0xff]  ;;  %v3592_v21 = vpack.c.bf16 %v550_v12, %v542_v11 }
  0xd7   : > { %3385 = vmatpush1.bf16.msra.mxu0 %v3384_v34  ;;  %v565_v15 = vld [vmem:[#allocation6 + $0x648] sm:$0xff]  ;;  %v567_v18 = vld [vmem:[#allocation6 + $0x658] sm:$0xff]  ;;  %v556_v23 = vld [vmem:[#allocation6 + $0x600] sm:$0xff]  ;;  %2114 = vst [vmem:[#allocation2] sm:$0xff] %v5336_v20 }
  0xd8   : > { %3577 = vmatpush1.bf16.msra.mxu1 %v3576_v35  ;;  %3387 = vmatprep.subr.bf16.mxu0 %v3386_v36  ;;  %v353_v16 = vld [vmem:[#allocation3 + $0x8] sm:$0xff]  ;;  %v3402_v22 = vpack.c.bf16 %v565_v15, %v557_v14  ;;  %v564_v24 = vld [vmem:[#allocation6 + $0x640] sm:$0xff]  ;;  %v558_v25 = vld [vmem:[#allocation6 + $0x610] sm:$0xff]  ;;  %v3594_v26 = vpack.c.bf16 %v567_v18, %v559_v17 }
  0xd9   : > { %3579 = vmatprep.subr.bf16.mxu1 %v3578_v40  ;;  %1238 = vmatprep.mubr.f32.mxu0 %v353_v16  ;;  %2115 = vst [vmem:[#allocation2 + $0x8] sm:$0xff] %v353_v16  ;;  %v566_v27 = vld [vmem:[#allocation6 + $0x650] sm:$0xff]  ;;  %v573_v28 = vld [vmem:[#allocation6 + $0x688] sm:$0xff]  ;;  %v575_v30 = vld [vmem:[#allocation6 + $0x698] sm:$0xff]  ;;  %v3404_v32 = vpack.c.bf16 %v564_v24, %v556_v23 }
  0xda   : > { %1469 = vmatprep.mubr.f32.mxu1 %v353_v16  ;;  %v581_v29 = vld [vmem:[#allocation6 + $0x6c8] sm:$0xff]  ;;  %v583_v31 = vld [vmem:[#allocation6 + $0x6d8] sm:$0xff]  ;;  %v3596_v33 = vpack.c.bf16 %v566_v27, %v558_v25  ;;  %v572_v35 = vld [vmem:[#allocation6 + $0x680] sm:$0xff] }
  0xdb   : > { %3389 = vmatpush1.bf16.msra.mxu0 %v3388_v46  ;;  %v3406_v34 = vpack.c.bf16 %v581_v29, %v573_v28  ;;  %v580_v36 = vld [vmem:[#allocation6 + $0x6c0] sm:$0xff]  ;;  %v574_v37 = vld [vmem:[#allocation6 + $0x690] sm:$0xff]  ;;  %v3598_v38 = vpack.c.bf16 %v583_v31, %v575_v30  ;;  %v589_v40 = vld [vmem:[#allocation6 + $0x708] sm:$0xff] }
  0xdc   : > { %3581 = vmatpush1.bf16.msra.mxu1 %v3580_v47  ;;  %3391 = vmatprep.subr.bf16.mxu0 %v3390_v48  ;;  %v582_v39 = vld [vmem:[#allocation6 + $0x6d0] sm:$0xff]  ;;  %v597_v41 = vld [vmem:[#allocation6 + $0x748] sm:$0xff]  ;;  %v591_v42 = vld [vmem:[#allocation6 + $0x718] sm:$0xff]  ;;  %v3408_v44 = vpack.c.bf16 %v580_v36, %v572_v35 }
  0xdd   : > { %3583 = vmatprep.subr.bf16.mxu1 %v3582_v52  ;;  %v599_v43 = vld [vmem:[#allocation6 + $0x758] sm:$0xff]  ;;  %v3600_v45 = vpack.c.bf16 %v582_v39, %v574_v37  ;;  %v3410_v46 = vpack.c.bf16 %v597_v41, %v589_v40  ;;  %v588_v47 = vld [vmem:[#allocation6 + $0x700] sm:$0xff]  ;;  %v590_v49 = vld [vmem:[#allocation6 + $0x710] sm:$0xff] }
  0xde   : > { %v596_v48 = vld [vmem:[#allocation6 + $0x740] sm:$0xff]  ;;  %v3602_v50 = vpack.c.bf16 %v599_v43, %v591_v42  ;;  %v598_v51 = vld [vmem:[#allocation6 + $0x750] sm:$0xff]  ;;  %v605_v52 = vld [vmem:[#allocation6 + $0x788] sm:$0xff] }
  0xdf   : > { %3393 = vmatpush1.bf16.msra.mxu0 %v3392_v58  ;;  %v613_v53 = vld [vmem:[#allocation6 + $0x7c8] sm:$0xff]  ;;  %v607_v54 = vld [vmem:[#allocation6 + $0x798] sm:$0xff]  ;;  %v3412_v56 = vpack.c.bf16 %v596_v48, %v588_v47  ;;  %v3604_v57 = vpack.c.bf16 %v598_v51, %v590_v49  ;;  %v606_v61 = vld [vmem:[#allocation6 + $0x790] sm:$0xff] }
  0xe0   : > { %3585 = vmatpush1.bf16.msra.mxu1 %v3584_v59  ;;  %3395 = vmatprep.subr.bf16.mxu0 %v3394_v60  ;;  %v615_v55 = vld [vmem:[#allocation6 + $0x7d8] sm:$0xff]  ;;  %v3414_v58 = vpack.c.bf16 %v613_v53, %v605_v52  ;;  %v604_v59 = vld [vmem:[#allocation6 + $0x780] sm:$0xff]  ;;  %v614_v63 = vld [vmem:[#allocation6 + $0x7d0] sm:$0xff] }
  0xe1   : > { %3587 = vmatprep.subr.bf16.mxu1 %v3586_v0  ;;  %v612_v60 = vld [vmem:[#allocation6 + $0x7c0] sm:$0xff]  ;;  %v3606_v62 = vpack.c.bf16 %v615_v55, %v607_v54  ;;  %v621_v0 = vld [vmem:[#allocation6 + $0x808] sm:$0xff]  ;;  %v623_v2 = vld [vmem:[#allocation6 + $0x818] sm:$0xff]  ;;  %v3608_v5 = vpack.c.bf16 %v614_v63, %v606_v61 }
  0xe2   : > { %v629_v1 = vld [vmem:[#allocation6 + $0x848] sm:$0xff]  ;;  %v631_v3 = vld [vmem:[#allocation6 + $0x858] sm:$0xff]  ;;  %v3416_v4 = vpack.c.bf16 %v612_v60, %v604_v59  ;;  %v620_v7 = vld [vmem:[#allocation6 + $0x800] sm:$0xff] }
  0xe3   : > { %3397 = vmatpush1.bf16.msra.mxu0 %v3396_v6  ;;  %v3418_v6 = vpack.c.bf16 %v629_v1, %v621_v0  ;;  %v3610_v10 = vpack.c.bf16 %v631_v3, %v623_v2  ;;  %v630_v11 = vld [vmem:[#allocation6 + $0x850] sm:$0xff]  ;;  %v637_v12 = vld [vmem:[#allocation6 + $0x888] sm:$0xff]  ;;  %v639_v14 = vld [vmem:[#allocation6 + $0x898] sm:$0xff] }
  0xe4   : > { %3589 = vmatpush1.bf16.msra.mxu1 %v3588_v8  ;;  %3399 = vmatprep.subr.bf16.mxu0 %v3398_v9  ;;  %v628_v8 = vld [vmem:[#allocation6 + $0x840] sm:$0xff]  ;;  %v622_v9 = vld [vmem:[#allocation6 + $0x810] sm:$0xff]  ;;  %v647_v15 = vld [vmem:[#allocation6 + $0x8d8] sm:$0xff] }
  0xe5   : > { %3591 = vmatprep.subr.bf16.mxu1 %v3590_v13  ;;  %v645_v13 = vld [vmem:[#allocation6 + $0x8c8] sm:$0xff]  ;;  %v3420_v16 = vpack.c.bf16 %v628_v8, %v620_v7  ;;  %v3612_v17 = vpack.c.bf16 %v630_v11, %v622_v9  ;;  %v3614_v23 = vpack.c.bf16 %v647_v15, %v639_v14  ;;  %v646_v24 = vld [vmem:[#allocation6 + $0x8d0] sm:$0xff]  ;;  %v655_v27 = vld [vmem:[#allocation6 + $0x918] sm:$0xff] }
  0xe6   : > { %v3422_v18 = vpack.c.bf16 %v645_v13, %v637_v12  ;;  %v653_v25 = vld [vmem:[#allocation6 + $0x908] sm:$0xff]  ;;  %v663_v28 = vld [vmem:[#allocation6 + $0x958] sm:$0xff]  ;;  %v662_v36 = vld [vmem:[#allocation6 + $0x950] sm:$0xff] }
  0xe7   : > { %3401 = vmatpush1.bf16.msra.mxu0 %v3400_v19  ;;  %v636_v19 = vld [vmem:[#allocation6 + $0x880] sm:$0xff]  ;;  %v3618_v35 = vpack.c.bf16 %v663_v28, %v655_v27  ;;  %v669_v37 = vld [vmem:[#allocation6 + $0x988] sm:$0xff]  ;;  %v671_v39 = vld [vmem:[#allocation6 + $0x998] sm:$0xff] }
  0xe8   : > { %3593 = vmatpush1.bf16.msra.mxu1 %v3592_v21  ;;  %3403 = vmatprep.subr.bf16.mxu0 %v3402_v22  ;;  %v644_v21 = vld [vmem:[#allocation6 + $0x8c0] sm:$0xff]  ;;  %v638_v22 = vld [vmem:[#allocation6 + $0x890] sm:$0xff]  ;;  %v679_v40 = vld [vmem:[#allocation6 + $0x9d8] sm:$0xff] }
  0xe9   : > { %3595 = vmatprep.subr.bf16.mxu1 %v3594_v26  ;;  %v661_v26 = vld [vmem:[#allocation6 + $0x948] sm:$0xff]  ;;  %v3424_v29 = vpack.c.bf16 %v644_v21, %v636_v19  ;;  %v3616_v30 = vpack.c.bf16 %v646_v24, %v638_v22  ;;  %v668_v43 = vld [vmem:[#allocation6 + $0x980] sm:$0xff]  ;;  %v678_v47 = vld [vmem:[#allocation6 + $0x9d0] sm:$0xff] }
  0xea   : > { %v3426_v31 = vpack.c.bf16 %v661_v26, %v653_v25  ;;  %v685_v48 = vld [vmem:[#allocation6 + $0xa08] sm:$0xff]  ;;  %v695_v51 = vld [vmem:[#allocation6 + $0xa58] sm:$0xff]  ;;  %v684_v55 = vld [vmem:[#allocation6 + $0xa00] sm:$0xff] }
  0xeb   : > { %3405 = vmatpush1.bf16.msra.mxu0 %v3404_v32  ;;  %v652_v32 = vld [vmem:[#allocation6 + $0x900] sm:$0xff]  ;;  %v693_v49 = vld [vmem:[#allocation6 + $0xa48] sm:$0xff]  ;;  %v694_v59 = vld [vmem:[#allocation6 + $0xa50] sm:$0xff] }
  0xec   : > { %3597 = vmatpush1.bf16.msra.mxu1 %v3596_v33  ;;  %3407 = vmatprep.subr.bf16.mxu0 %v3406_v34  ;;  %v660_v33 = vld [vmem:[#allocation6 + $0x940] sm:$0xff]  ;;  %v654_v34 = vld [vmem:[#allocation6 + $0x910] sm:$0xff]  ;;  %v3434_v54 = vpack.c.bf16 %v693_v49, %v685_v48  ;;  %v701_v60 = vld [vmem:[#allocation6 + $0xa88] sm:$0xff] }
  0xed   : > { %3599 = vmatprep.subr.bf16.mxu1 %v3598_v38  ;;  %v677_v38 = vld [vmem:[#allocation6 + $0x9c8] sm:$0xff]  ;;  %v3428_v41 = vpack.c.bf16 %v660_v33, %v652_v32  ;;  %v711_v63 = vld [vmem:[#allocation6 + $0xad8] sm:$0xff]  ;;  %v700_v3 = vld [vmem:[#allocation6 + $0xa80] sm:$0xff] }
  0xee   : > { %v3430_v42 = vpack.c.bf16 %v677_v38, %v669_v37  ;;  %v709_v61 = vld [vmem:[#allocation6 + $0xac8] sm:$0xff]  ;;  %v710_v7 = vld [vmem:[#allocation6 + $0xad0] sm:$0xff]  ;;  %v727_v11 = vld [vmem:[#allocation6 + $0xb58] sm:$0xff] }
  0xef   : > { %3409 = vmatpush1.bf16.msra.mxu0 %v3408_v44  ;;  %v676_v44 = vld [vmem:[#allocation6 + $0x9c0] sm:$0xff]  ;;  %v3438_v2 = vpack.c.bf16 %v709_v61, %v701_v60  ;;  %v717_v8 = vld [vmem:[#allocation6 + $0xb08] sm:$0xff]  ;;  %v359_v12 = vld [vmem:[#allocation3 + $0x38] sm:$0xff] }
  0xf0   : > { %3601 = vmatpush1.bf16.msra.mxu1 %v3600_v45  ;;  %3411 = vmatprep.subr.bf16.mxu0 %v3410_v46  ;;  %v670_v45 = vld [vmem:[#allocation6 + $0x990] sm:$0xff]  ;;  %v3622_v46 = vpack.c.bf16 %v679_v40, %v671_v39  ;;  %v3432_v52 = vpack.c.bf16 %v676_v44, %v668_v43  ;;  %v725_v9 = vld [vmem:[#allocation6 + $0xb48] sm:$0xff]  ;;  %v716_v14 = vld [vmem:[#allocation6 + $0xb00] sm:$0xff]  ;;  %2121 = vst [vmem:[#allocation2 + $0x78] sm:$0xff] %v359_v12 }
  0xf1   : > { %3603 = vmatprep.subr.bf16.mxu1 %v3602_v50  ;;  %v687_v50 = vld [vmem:[#allocation6 + $0xa18] sm:$0xff]  ;;  %v3624_v53 = vpack.c.bf16 %v678_v47, %v670_v45  ;;  %v724_v15 = vld [vmem:[#allocation6 + $0xb40] sm:$0xff]  ;;  %v726_v19 = vld [vmem:[#allocation6 + $0xb50] sm:$0xff] }
  0xf2   : > { %v358_v21 = vld [vmem:[#allocation3 + $0x30] sm:$0xff]  ;;  %v741_v24 = vld [vmem:[#allocation6 + $0xbc8] sm:$0xff]  ;;  %v355_v25 = vld [vmem:[#allocation3 + $0x18] sm:$0xff]  ;;  %v3444_v28 = vpack.c.bf16 %v724_v15, %v716_v14 }
  0xf3   : > { %3413 = vmatpush1.bf16.msra.mxu0 %v3412_v56  ;;  %v692_v56 = vld [vmem:[#allocation6 + $0xa40] sm:$0xff]  ;;  %2120 = vst [vmem:[#allocation2 + $0x70] sm:$0xff] %v358_v21  ;;  %v735_v26 = vld [vmem:[#allocation6 + $0xb98] sm:$0xff]  ;;  %2117 = vst [vmem:[#allocation2 + $0x18] sm:$0xff] %v355_v25 }
  0xf4   : > { %3605 = vmatpush1.bf16.msra.mxu1 %v3604_v57  ;;  %3415 = vmatprep.subr.bf16.mxu0 %v3414_v58  ;;  %v686_v57 = vld [vmem:[#allocation6 + $0xa10] sm:$0xff]  ;;  %v3626_v58 = vpack.c.bf16 %v695_v51, %v687_v50  ;;  %v3436_v0 = vpack.c.bf16 %v692_v56, %v684_v55  ;;  %v743_v27 = vld [vmem:[#allocation6 + $0xbd8] sm:$0xff]  ;;  %v732_v32 = vld [vmem:[#allocation6 + $0xb80] sm:$0xff] }
  0xf5   : > { %3607 = vmatprep.subr.bf16.mxu1 %v3606_v62  ;;  %v703_v62 = vld [vmem:[#allocation6 + $0xa98] sm:$0xff]  ;;  %v3628_v1 = vpack.c.bf16 %v694_v59, %v686_v57  ;;  %v740_v33 = vld [vmem:[#allocation6 + $0xbc0] sm:$0xff]  ;;  %v749_v37 = vld [vmem:[#allocation6 + $0xc08] sm:$0xff] }
  0xf6   : > { %v757_v38 = vld [vmem:[#allocation6 + $0xc48] sm:$0xff]  ;;  %v751_v39 = vld [vmem:[#allocation6 + $0xc18] sm:$0xff]  ;;  %v748_v43 = vld [vmem:[#allocation6 + $0xc00] sm:$0xff] }
  0xf7   : > { %3417 = vmatpush1.bf16.msra.mxu0 %v3416_v4  ;;  %v708_v4 = vld [vmem:[#allocation6 + $0xac0] sm:$0xff]  ;;  %v759_v40 = vld [vmem:[#allocation6 + $0xc58] sm:$0xff]  ;;  %v750_v45 = vld [vmem:[#allocation6 + $0xc10] sm:$0xff] }
  0xf8   : > { %3609 = vmatpush1.bf16.msra.mxu1 %v3608_v5  ;;  %3419 = vmatprep.subr.bf16.mxu0 %v3418_v6  ;;  %v702_v5 = vld [vmem:[#allocation6 + $0xa90] sm:$0xff]  ;;  %v3630_v6 = vpack.c.bf16 %v711_v63, %v703_v62  ;;  %v3440_v13 = vpack.c.bf16 %v708_v4, %v700_v3  ;;  %v756_v44 = vld [vmem:[#allocation6 + $0xc40] sm:$0xff]  ;;  %v765_v48 = vld [vmem:[#allocation6 + $0xc88] sm:$0xff] }
  0xf9   : > { %3611 = vmatprep.subr.bf16.mxu1 %v3610_v10  ;;  %v719_v10 = vld [vmem:[#allocation6 + $0xb18] sm:$0xff]  ;;  %v758_v47 = vld [vmem:[#allocation6 + $0xc50] sm:$0xff]  ;;  %v773_v49 = vld [vmem:[#allocation6 + $0xcc8] sm:$0xff] }
  0xfa   : > { %1239 = vmatmul.mubr.f32.vlgmr.msra.gmra.mrb[0].mxu0 %v5336_v20  ;;  %v3634_v22 = vpack.c.bf16 %v727_v11, %v719_v10  ;;  %v767_v50 = vld [vmem:[#allocation6 + $0xc98] sm:$0xff]  ;;  %v764_v55 = vld [vmem:[#allocation6 + $0xc80] sm:$0xff]  ;;  %v766_v57 = vld [vmem:[#allocation6 + $0xc90] sm:$0xff] }
  0xfb   : > { %3421 = vmatpush1.bf16.msra.mxu0 %v3420_v16  ;;  %1470 = vmatmul.mubr.f32.vlgmr.msra.gmra.mrb[0].mxu1 %v5336_v20  ;;  %v3620_v20 = vpack.c.bf16 %v662_v36, %v654_v34  ;;  %v3632_v16 = vpack.c.bf16 %v710_v7, %v702_v5  ;;  %v734_v34 = vld [vmem:[#allocation6 + $0xb90] sm:$0xff]  ;;  %v775_v51 = vld [vmem:[#allocation6 + $0xcd8] sm:$0xff]  ;;  %v772_v56 = vld [vmem:[#allocation6 + $0xcc0] sm:$0xff] }
  0xfc   : > { %3613 = vmatpush1.bf16.msra.mxu1 %v3612_v17  ;;  %3423 = vmatprep.subr.bf16.mxu0 %v3422_v18  ;;  %v3442_v17 = vpack.c.bf16 %v725_v9, %v717_v8  ;;  %v718_v18 = vld [vmem:[#allocation6 + $0xb10] sm:$0xff]  ;;  %v781_v60 = vld [vmem:[#allocation6 + $0xd08] sm:$0xff]  ;;  %v783_v62 = vld [vmem:[#allocation6 + $0xd18] sm:$0xff] }
  0xfd   : > { %3615 = vmatprep.subr.bf16.mxu1 %v3614_v23  ;;  %1244 = vmatprep.mubr.f32.mxu0 %v359_v12  ;;  %v733_v23 = vld [vmem:[#allocation6 + $0xb88] sm:$0xff]  ;;  %v742_v36 = vld [vmem:[#allocation6 + $0xbd0] sm:$0xff]  ;;  %v791_v63 = vld [vmem:[#allocation6 + $0xd58] sm:$0xff] }
  0xfe   : > { %1475 = vmatprep.mubr.f32.mxu1 %v359_v12  ;;  %1245 = vmatmul.mubr.f32.gmra.mrb[2].mxu0 %v358_v21  ;;  %v774_v59 = vld [vmem:[#allocation6 + $0xcd0] sm:$0xff]  ;;  %v789_v61 = vld [vmem:[#allocation6 + $0xd48] sm:$0xff]  ;;  %v780_v3 = vld [vmem:[#allocation6 + $0xd00] sm:$0xff] }
  0xff   : > { %3425 = vmatpush1.bf16.msra.mxu0 %v3424_v29  ;;  %1476 = vmatmul.mubr.f32.gmra.mrb[2].mxu1 %v358_v21  ;;  %v5341_v29 = vld [vmem:[#allocation3 + $0x10] sm:$0xff]  ;;  %v788_v4 = vld [vmem:[#allocation6 + $0xd40] sm:$0xff]  ;;  %v797_v8 = vld [vmem:[#allocation6 + $0xd88] sm:$0xff] }
 0x100   : > { %3617 = vmatpush1.bf16.msra.mxu1 %v3616_v30  ;;  %3427 = vmatprep.subr.bf16.mxu0 %v3426_v31  ;;  %v3636_v30 = vpack.c.bf16 %v726_v19, %v718_v18  ;;  %v3446_v31 = vpack.c.bf16 %v741_v24, %v733_v23  ;;  %2116 = vst [vmem:[#allocation2 + $0x10] sm:$0xff] %v5341_v29  ;;  %v782_v5 = vld [vmem:[#allocation6 + $0xd10] sm:$0xff]  ;;  %v805_v9 = vld [vmem:[#allocation6 + $0xdc8] sm:$0xff]  ;;  %v799_v10 = vld [vmem:[#allocation6 + $0xd98] sm:$0xff] }
 0x101   : > { %3619 = vmatprep.subr.bf16.mxu1 %v3618_v35  ;;  %1315 = vmatprep.mubr.f32.mxu0 %v355_v25  ;;  %v3638_v35 = vpack.c.bf16 %v743_v27, %v735_v26  ;;  %v790_v7 = vld [vmem:[#allocation6 + $0xd50] sm:$0xff]  ;;  %v807_v11 = vld [vmem:[#allocation6 + $0xdd8] sm:$0xff]  ;;  %v3460_v12 = vpack.c.bf16 %v788_v4, %v780_v3  ;;  %v3462_v14 = vpack.c.bf16 %v805_v9, %v797_v8  ;;  %v796_v15 = vld [vmem:[#allocation6 + $0xd80] sm:$0xff] }
 0x102   : > { %1546 = vmatprep.mubr.f32.mxu1 %v355_v25  ;;  %v3654_v18 = vpack.c.bf16 %v807_v11, %v799_v10  ;;  %v806_v19 = vld [vmem:[#allocation6 + $0xdd0] sm:$0xff]  ;;  %v813_v21 = vld [vmem:[#allocation6 + $0xe08] sm:$0xff]  ;;  %v815_v23 = vld [vmem:[#allocation6 + $0xe18] sm:$0xff] }
 0x103   : > { %3429 = vmatpush1.bf16.msra.mxu0 %v3428_v41  ;;  %v3448_v41 = vpack.c.bf16 %v740_v33, %v732_v32  ;;  %v823_v24 = vld [vmem:[#allocation6 + $0xe58] sm:$0xff]  ;;  %v822_v33 = vld [vmem:[#allocation6 + $0xe50] sm:$0xff]  ;;  %v876_v10 = vld [vmem:[#allocation6 + $0x1000] sm:$0xff] }
 0x104   : > { %3621 = vmatpush1.bf16.msra.mxu1 %v3620_v20  ;;  %3431 = vmatprep.subr.bf16.mxu0 %v3430_v42  ;;  %v3640_v20 = vpack.c.bf16 %v742_v36, %v734_v34  ;;  %v3450_v42 = vpack.c.bf16 %v757_v38, %v749_v37  ;;  %v3658_v32 = vpack.c.bf16 %v823_v24, %v815_v23  ;;  %v829_v34 = vld [vmem:[#allocation6 + $0xe88] sm:$0xff]  ;;  %v831_v36 = vld [vmem:[#allocation6 + $0xe98] sm:$0xff]  ;;  %v870_v4 = vld [vmem:[#allocation6 + $0xfd0] sm:$0xff] }
 0x105   : > { %3623 = vmatprep.subr.bf16.mxu1 %v3622_v46  ;;  %v3642_v46 = vpack.c.bf16 %v759_v40, %v751_v39  ;;  %v839_v37 = vld [vmem:[#allocation6 + $0xed8] sm:$0xff]  ;;  %v360_v23 = vld [vmem:[#allocation3 + $0x40] sm:$0xff] }
 0x106   : > { %v887_v8 = vld [vmem:[#allocation6 + $0x1058] sm:$0xff]  ;;  %2122 = vst [vmem:[#allocation2 + $0x80] sm:$0xff] %v360_v23 }
 0x107   : > { %3433 = vmatpush1.bf16.msra.mxu0 %v3432_v52  ;;  %v3452_v52 = vpack.c.bf16 %v756_v44, %v748_v43  ;;  %v3662_v43 = vpack.c.bf16 %v839_v37, %v831_v36  ;;  %v838_v44 = vld [vmem:[#allocation6 + $0xed0] sm:$0xff]  ;;  %v911_v36 = vld [vmem:[#allocation6 + $0x1118] sm:$0xff] }
 0x108   : > { %3625 = vmatpush1.bf16.msra.mxu1 %v3624_v53  ;;  %3435 = vmatprep.subr.bf16.mxu0 %v3434_v54  ;;  %v3644_v53 = vpack.c.bf16 %v758_v47, %v750_v45  ;;  %v3454_v54 = vpack.c.bf16 %v773_v49, %v765_v48  ;;  %v845_v45 = vld [vmem:[#allocation6 + $0xf08] sm:$0xff]  ;;  %v847_v47 = vld [vmem:[#allocation6 + $0xf18] sm:$0xff] }
 0x109   : > { %3627 = vmatprep.subr.bf16.mxu1 %v3626_v58  ;;  %v3646_v58 = vpack.c.bf16 %v775_v51, %v767_v50  ;;  %v855_v48 = vld [vmem:[#allocation6 + $0xf58] sm:$0xff] }
 0x10a   : > { %v919_v37 = vld [vmem:[#allocation6 + $0x1158] sm:$0xff] }
 0x10b   : > { %3437 = vmatpush1.bf16.msra.mxu0 %v3436_v0  ;;  %v3456_v0 = vpack.c.bf16 %v772_v56, %v764_v55  ;;  %v3666_v55 = vpack.c.bf16 %v855_v48, %v847_v47  ;;  %v854_v56 = vld [vmem:[#allocation6 + $0xf50] sm:$0xff]  ;;  %v933_v47 = vld [vmem:[#allocation6 + $0x11c8] sm:$0xff]  ;;  %v5349_v48 = vld [vmem:[#allocation3 + $0x58] sm:$0xff] }
 0x10c   : > { %3629 = vmatpush1.bf16.msra.mxu1 %v3628_v1  ;;  %3439 = vmatprep.subr.bf16.mxu0 %v3438_v2  ;;  %v3648_v1 = vpack.c.bf16 %v774_v59, %v766_v57  ;;  %v3458_v2 = vpack.c.bf16 %v789_v61, %v781_v60  ;;  %v861_v57 = vld [vmem:[#allocation6 + $0xf88] sm:$0xff]  ;;  %v863_v59 = vld [vmem:[#allocation6 + $0xf98] sm:$0xff]  ;;  %2125 = vst [vmem:[#allocation2 + $0x98] sm:$0xff] %v5349_v48 }
 0x10d   : > { %3631 = vmatprep.subr.bf16.mxu1 %v3630_v6  ;;  %v3650_v6 = vpack.c.bf16 %v791_v63, %v783_v62  ;;  %v871_v60 = vld [vmem:[#allocation6 + $0xfd8] sm:$0xff] }
 0x10e   : > { %v3670_v3 = vpack.c.bf16 %v871_v60, %v863_v59  ;;  %v941_v59 = vld [vmem:[#allocation6 + $0x1208] sm:$0xff] }
 0x10f   : > { %3441 = vmatpush1.bf16.msra.mxu0 %v3440_v13  ;;  %v3652_v13 = vpack.c.bf16 %v790_v7, %v782_v5  ;;  %v877_v5 = vld [vmem:[#allocation6 + $0x1008] sm:$0xff]  ;;  %v879_v7 = vld [vmem:[#allocation6 + $0x1018] sm:$0xff] }
 0x110   : > { %3633 = vmatpush1.bf16.msra.mxu1 %v3632_v16  ;;  %3443 = vmatprep.subr.bf16.mxu0 %v3442_v17  ;;  %v804_v16 = vld [vmem:[#allocation6 + $0xdc0] sm:$0xff]  ;;  %v798_v17 = vld [vmem:[#allocation6 + $0xd90] sm:$0xff]  ;;  %v949_v60 = vld [vmem:[#allocation6 + $0x1248] sm:$0xff] }
 0x111   : > { %3635 = vmatprep.subr.bf16.mxu1 %v3634_v22  ;;  %v821_v22 = vld [vmem:[#allocation6 + $0xe48] sm:$0xff]  ;;  %v3464_v25 = vpack.c.bf16 %v804_v16, %v796_v15  ;;  %v3656_v26 = vpack.c.bf16 %v806_v19, %v798_v17  ;;  %v886_v15 = vld [vmem:[#allocation6 + $0x1050] sm:$0xff]  ;;  %v3674_v16 = vpack.c.bf16 %v887_v8, %v879_v7  ;;  %v895_v19 = vld [vmem:[#allocation6 + $0x1098] sm:$0xff] }
 0x112   : > { %v3466_v27 = vpack.c.bf16 %v821_v22, %v813_v21  ;;  %v893_v17 = vld [vmem:[#allocation6 + $0x1088] sm:$0xff]  ;;  %v903_v21 = vld [vmem:[#allocation6 + $0x10d8] sm:$0xff] }
 0x113   : > { %3445 = vmatpush1.bf16.msra.mxu0 %v3444_v28  ;;  %v812_v28 = vld [vmem:[#allocation6 + $0xe00] sm:$0xff]  ;;  %v361_v22 = vld [vmem:[#allocation3 + $0x48] sm:$0xff] }
 0x114   : > { %3637 = vmatpush1.bf16.msra.mxu1 %v3636_v30  ;;  %3447 = vmatprep.subr.bf16.mxu0 %v3446_v31  ;;  %v820_v30 = vld [vmem:[#allocation6 + $0xe40] sm:$0xff]  ;;  %v814_v31 = vld [vmem:[#allocation6 + $0xe10] sm:$0xff]  ;;  %2123 = vst [vmem:[#allocation2 + $0x88] sm:$0xff] %v361_v22  ;;  %v957_v7 = vld [vmem:[#allocation6 + $0x1288] sm:$0xff] }
 0x115   : > { %3639 = vmatprep.subr.bf16.mxu1 %v3638_v35  ;;  %v837_v35 = vld [vmem:[#allocation6 + $0xec8] sm:$0xff]  ;;  %v3468_v38 = vpack.c.bf16 %v820_v30, %v812_v28  ;;  %v3660_v39 = vpack.c.bf16 %v822_v33, %v814_v31  ;;  %v900_v28 = vld [vmem:[#allocation6 + $0x10c0] sm:$0xff]  ;;  %v894_v30 = vld [vmem:[#allocation6 + $0x1090] sm:$0xff] }
 0x116   : > { %v3470_v40 = vpack.c.bf16 %v837_v35, %v829_v34  ;;  %v902_v31 = vld [vmem:[#allocation6 + $0x10d0] sm:$0xff]  ;;  %v909_v33 = vld [vmem:[#allocation6 + $0x1108] sm:$0xff] }
 0x117   : > { %3449 = vmatpush1.bf16.msra.mxu0 %v3448_v41  ;;  %v828_v41 = vld [vmem:[#allocation6 + $0xe80] sm:$0xff]  ;;  %v917_v34 = vld [vmem:[#allocation6 + $0x1148] sm:$0xff] }
 0x118   : > { %3641 = vmatpush1.bf16.msra.mxu1 %v3640_v20  ;;  %3451 = vmatprep.subr.bf16.mxu0 %v3450_v42  ;;  %v836_v20 = vld [vmem:[#allocation6 + $0xec0] sm:$0xff]  ;;  %v830_v42 = vld [vmem:[#allocation6 + $0xe90] sm:$0xff]  ;;  %v357_v35 = vld [vmem:[#allocation3 + $0x28] sm:$0xff] }
 0x119   : > { %3643 = vmatprep.subr.bf16.mxu1 %v3642_v46  ;;  %v853_v46 = vld [vmem:[#allocation6 + $0xf48] sm:$0xff]  ;;  %v3472_v49 = vpack.c.bf16 %v836_v20, %v828_v41  ;;  %v3664_v50 = vpack.c.bf16 %v838_v44, %v830_v42  ;;  %2119 = vst [vmem:[#allocation2 + $0x28] sm:$0xff] %v357_v35  ;;  %v916_v41 = vld [vmem:[#allocation6 + $0x1140] sm:$0xff]  ;;  %v3680_v20 = vpack.c.bf16 %v902_v31, %v894_v30  ;;  %v918_v44 = vld [vmem:[#allocation6 + $0x1150] sm:$0xff] }
 0x11a   : > { %v3474_v51 = vpack.c.bf16 %v853_v46, %v845_v45  ;;  %v3490_v42 = vpack.c.bf16 %v917_v34, %v909_v33  ;;  %v925_v45 = vld [vmem:[#allocation6 + $0x1188] sm:$0xff]  ;;  %v3682_v46 = vpack.c.bf16 %v919_v37, %v911_v36  ;;  %v974_v30 = vld [vmem:[#allocation6 + $0x1310] sm:$0xff]  ;;  %v999_v36 = vld [vmem:[#allocation6 + $0x13d8] sm:$0xff] }
 0x11b   : > { %3453 = vmatpush1.bf16.msra.mxu0 %v3452_v52  ;;  %v844_v52 = vld [vmem:[#allocation6 + $0xf00] sm:$0xff]  ;;  %v965_v8 = vld [vmem:[#allocation6 + $0x12c8] sm:$0xff] }
 0x11c   : > { %3645 = vmatpush1.bf16.msra.mxu1 %v3644_v53  ;;  %3455 = vmatprep.subr.bf16.mxu0 %v3454_v54  ;;  %v852_v53 = vld [vmem:[#allocation6 + $0xf40] sm:$0xff]  ;;  %v846_v54 = vld [vmem:[#allocation6 + $0xf10] sm:$0xff]  ;;  %v989_v33 = vld [vmem:[#allocation6 + $0x1388] sm:$0xff] }
 0x11d   : > { %3647 = vmatprep.subr.bf16.mxu1 %v3646_v58  ;;  %v869_v58 = vld [vmem:[#allocation6 + $0xfc8] sm:$0xff]  ;;  %v3476_v61 = vpack.c.bf16 %v852_v53, %v844_v52  ;;  %v3668_v62 = vpack.c.bf16 %v854_v56, %v846_v54  ;;  %v3494_v53 = vpack.c.bf16 %v933_v47, %v925_v45  ;;  %v924_v54 = vld [vmem:[#allocation6 + $0x1180] sm:$0xff]  ;;  %v926_v56 = vld [vmem:[#allocation6 + $0x1190] sm:$0xff] }
 0x11e   : > { %v3478_v63 = vpack.c.bf16 %v869_v58, %v861_v57  ;;  %v934_v58 = vld [vmem:[#allocation6 + $0x11d0] sm:$0xff]  ;;  %v997_v34 = vld [vmem:[#allocation6 + $0x13c8] sm:$0xff]  ;;  %v1007_v47 = vld [vmem:[#allocation6 + $0x1418] sm:$0xff] }
 0x11f   : > { %3457 = vmatpush1.bf16.msra.mxu0 %v3456_v0  ;;  %v860_v0 = vld [vmem:[#allocation6 + $0xf80] sm:$0xff]  ;;  %v1005_v45 = vld [vmem:[#allocation6 + $0x1408] sm:$0xff] }
 0x120   : > { %3649 = vmatpush1.bf16.msra.mxu1 %v3648_v1  ;;  %3459 = vmatprep.subr.bf16.mxu0 %v3458_v2  ;;  %v868_v1 = vld [vmem:[#allocation6 + $0xfc0] sm:$0xff]  ;;  %v862_v2 = vld [vmem:[#allocation6 + $0xf90] sm:$0xff] }
 0x121   : > { %3651 = vmatprep.subr.bf16.mxu1 %v3650_v6  ;;  %v885_v6 = vld [vmem:[#allocation6 + $0x1048] sm:$0xff]  ;;  %v3480_v9 = vpack.c.bf16 %v868_v1, %v860_v0  ;;  %v3672_v11 = vpack.c.bf16 %v870_v4, %v862_v2  ;;  %v3688_v0 = vpack.c.bf16 %v934_v58, %v926_v56  ;;  %v3498_v1 = vpack.c.bf16 %v949_v60, %v941_v59  ;;  %v940_v2 = vld [vmem:[#allocation6 + $0x1200] sm:$0xff]  ;;  %v942_v4 = vld [vmem:[#allocation6 + $0x1210] sm:$0xff] }
 0x122   : > { %v1021_v58 = vld [vmem:[#allocation6 + $0x1488] sm:$0xff]  ;;  %v1023_v60 = vld [vmem:[#allocation6 + $0x1498] sm:$0xff] }
 0x123   : > { %3461 = vmatpush1.bf16.msra.mxu0 %v3460_v12  ;;  %v3482_v12 = vpack.c.bf16 %v885_v6, %v877_v5  ;;  %v950_v6 = vld [vmem:[#allocation6 + $0x1250] sm:$0xff]  ;;  %v1029_v59 = vld [vmem:[#allocation6 + $0x14c8] sm:$0xff] }
 0x124   : > { %3653 = vmatpush1.bf16.msra.mxu1 %v3652_v13  ;;  %3463 = vmatprep.subr.bf16.mxu0 %v3462_v14  ;;  %v884_v13 = vld [vmem:[#allocation6 + $0x1040] sm:$0xff]  ;;  %v878_v14 = vld [vmem:[#allocation6 + $0x1010] sm:$0xff] }
 0x125   : > { %3655 = vmatprep.subr.bf16.mxu1 %v3654_v18  ;;  %v901_v18 = vld [vmem:[#allocation6 + $0x10c8] sm:$0xff]  ;;  %v3484_v24 = vpack.c.bf16 %v884_v13, %v876_v10  ;;  %v967_v10 = vld [vmem:[#allocation6 + $0x12d8] sm:$0xff]  ;;  %v3502_v13 = vpack.c.bf16 %v965_v8, %v957_v7 }
 0x126   : > { %v1045_v7 = vld [vmem:[#allocation6 + $0x1548] sm:$0xff]  ;;  %v1039_v8 = vld [vmem:[#allocation6 + $0x1518] sm:$0xff] }
 0x127   : > { %3465 = vmatpush1.bf16.msra.mxu0 %v3464_v25  ;;  %v892_v25 = vld [vmem:[#allocation6 + $0x1080] sm:$0xff] }
 0x128   : > { %3657 = vmatpush1.bf16.msra.mxu1 %v3656_v26  ;;  %3467 = vmatprep.subr.bf16.mxu0 %v3466_v27  ;;  %v3676_v26 = vpack.c.bf16 %v886_v15, %v878_v14  ;;  %v3486_v27 = vpack.c.bf16 %v901_v18, %v893_v17  ;;  %v956_v14 = vld [vmem:[#allocation6 + $0x1280] sm:$0xff]  ;;  %v966_v18 = vld [vmem:[#allocation6 + $0x12d0] sm:$0xff] }
 0x129   : > { %3659 = vmatprep.subr.bf16.mxu1 %v3658_v32  ;;  %v3678_v32 = vpack.c.bf16 %v903_v21, %v895_v19  ;;  %v964_v15 = vld [vmem:[#allocation6 + $0x12c0] sm:$0xff]  ;;  %v973_v19 = vld [vmem:[#allocation6 + $0x1308] sm:$0xff] }
 0x12a   : > { %v981_v21 = vld [vmem:[#allocation6 + $0x1348] sm:$0xff] }
 0x12b   : > { %3469 = vmatpush1.bf16.msra.mxu0 %v3468_v38  ;;  %v5345_v38 = vld [vmem:[#allocation3 + $0x20] sm:$0xff] }
 0x12c   : > { %3661 = vmatpush1.bf16.msra.mxu1 %v3660_v39  ;;  %3471 = vmatprep.subr.bf16.mxu0 %v3470_v40  ;;  %v3488_v39 = vpack.c.bf16 %v900_v28, %v892_v25  ;;  %v908_v40 = vld [vmem:[#allocation6 + $0x1100] sm:$0xff]  ;;  %2118 = vst [vmem:[#allocation2 + $0x20] sm:$0xff] %v5345_v38 }
 0x12d   : > { %3663 = vmatprep.subr.bf16.mxu1 %v3662_v43  ;;  %v910_v43 = vld [vmem:[#allocation6 + $0x1110] sm:$0xff]  ;;  %v980_v28 = vld [vmem:[#allocation6 + $0x1340] sm:$0xff] }
 0x12e   : > { %v3684_v52 = vpack.c.bf16 %v918_v44, %v910_v43  ;;  %v998_v44 = vld [vmem:[#allocation6 + $0x13d0] sm:$0xff] }
 0x12f   : > { %3473 = vmatpush1.bf16.msra.mxu0 %v3472_v49  ;;  %v5351_v49 = vld [vmem:[#allocation3 + $0x50] sm:$0xff] }
 0x130   : > { %3665 = vmatpush1.bf16.msra.mxu1 %v3664_v50  ;;  %3475 = vmatprep.subr.bf16.mxu0 %v3474_v51  ;;  %v935_v50 = vld [vmem:[#allocation6 + $0x11d8] sm:$0xff]  ;;  %2124 = vst [vmem:[#allocation2 + $0x90] sm:$0xff] %v5351_v49  ;;  %v3492_v51 = vpack.c.bf16 %v916_v41, %v908_v40  ;;  %v3510_v40 = vpack.c.bf16 %v997_v34, %v989_v33  ;;  %v988_v41 = vld [vmem:[#allocation6 + $0x1380] sm:$0xff]  ;;  %v1077_v33 = vld [vmem:[#allocation6 + $0x1648] sm:$0xff] }
 0x131   : > { %3667 = vmatprep.subr.bf16.mxu1 %v3666_v55  ;;  %v932_v55 = vld [vmem:[#allocation6 + $0x11c0] sm:$0xff]  ;;  %v1071_v34 = vld [vmem:[#allocation6 + $0x1618] sm:$0xff] }
 0x133   : > { %3477 = vmatpush1.bf16.msra.mxu0 %v3476_v61  ;;  %v943_v61 = vld [vmem:[#allocation6 + $0x1218] sm:$0xff] }
 0x134   : > { %3669 = vmatpush1.bf16.msra.mxu1 %v3668_v62  ;;  %3479 = vmatprep.subr.bf16.mxu0 %v3478_v63  ;;  %v951_v62 = vld [vmem:[#allocation6 + $0x1258] sm:$0xff]  ;;  %v3496_v63 = vpack.c.bf16 %v932_v55, %v924_v54  ;;  %v1012_v54 = vld [vmem:[#allocation6 + $0x1440] sm:$0xff]  ;;  %v1006_v55 = vld [vmem:[#allocation6 + $0x1410] sm:$0xff] }
 0x135   : > { %3671 = vmatprep.subr.bf16.mxu1 %v3670_v3  ;;  %v948_v3 = vld [vmem:[#allocation6 + $0x1240] sm:$0xff]  ;;  %v3690_v5 = vpack.c.bf16 %v951_v62, %v943_v61  ;;  %v1031_v61 = vld [vmem:[#allocation6 + $0x14d8] sm:$0xff] }
 0x137   : > { %3481 = vmatpush1.bf16.msra.mxu0 %v3480_v9  ;;  %v959_v9 = vld [vmem:[#allocation6 + $0x1298] sm:$0xff] }
 0x138   : > { %3673 = vmatpush1.bf16.msra.mxu1 %v3672_v11  ;;  %3483 = vmatprep.subr.bf16.mxu0 %v3482_v12  ;;  %v3500_v11 = vpack.c.bf16 %v948_v3, %v940_v2  ;;  %v3692_v12 = vpack.c.bf16 %v950_v6, %v942_v4  ;;  %v3694_v17 = vpack.c.bf16 %v967_v10, %v959_v9  ;;  %v1028_v2 = vld [vmem:[#allocation6 + $0x14c0] sm:$0xff]  ;;  %v1022_v3 = vld [vmem:[#allocation6 + $0x1490] sm:$0xff]  ;;  %v1037_v6 = vld [vmem:[#allocation6 + $0x1508] sm:$0xff] }
 0x139   : > { %3675 = vmatprep.subr.bf16.mxu1 %v3674_v16  ;;  %v958_v16 = vld [vmem:[#allocation6 + $0x1290] sm:$0xff]  ;;  %v3710_v4 = vpack.c.bf16 %v1031_v61, %v1023_v60  ;;  %v1047_v9 = vld [vmem:[#allocation6 + $0x1558] sm:$0xff] }
 0x13a   : > { %1316 = vmatmul.mubr.f32.vlgmr.msra.gmra.mrb[0].mxu0 %v5341_v29  ;;  %v3696_v25 = vpack.c.bf16 %v966_v18, %v958_v16  ;;  %v3714_v16 = vpack.c.bf16 %v1047_v9, %v1039_v8  ;;  %v1053_v18 = vld [vmem:[#allocation6 + $0x1588] sm:$0xff]  ;;  %v1111_v60 = vld [vmem:[#allocation6 + $0x1758] sm:$0xff] }
 0x13b   : > { %3485 = vmatpush1.bf16.msra.mxu0 %v3484_v24  ;;  %1547 = vmatmul.mubr.f32.vlgmr.msra.gmra.mrb[0].mxu1 %v5341_v29  ;;  %v927_v29 = vld [vmem:[#allocation6 + $0x1198] sm:$0xff]  ;;  %v3504_v24 = vpack.c.bf16 %v964_v15, %v956_v14  ;;  %v1044_v14 = vld [vmem:[#allocation6 + $0x1540] sm:$0xff]  ;;  %v1038_v15 = vld [vmem:[#allocation6 + $0x1510] sm:$0xff] }
 0x13c   : > { %3677 = vmatpush1.bf16.msra.mxu1 %v3676_v26  ;;  %3487 = vmatprep.subr.bf16.mxu0 %v3486_v27  ;;  %v3686_v57 = vpack.c.bf16 %v935_v50, %v927_v29  ;;  %v3506_v26 = vpack.c.bf16 %v981_v21, %v973_v19  ;;  %v972_v27 = vld [vmem:[#allocation6 + $0x1300] sm:$0xff]  ;;  %v1015_v29 = vld [vmem:[#allocation6 + $0x1458] sm:$0xff]  ;;  %v1061_v19 = vld [vmem:[#allocation6 + $0x15c8] sm:$0xff] }
 0x13d   : > { %3679 = vmatprep.subr.bf16.mxu1 %v3678_v32  ;;  %1321 = vmatprep.mubr.f32.mxu0 %v361_v22  ;;  %v982_v32 = vld [vmem:[#allocation6 + $0x1350] sm:$0xff]  ;;  %v3508_v37 = vpack.c.bf16 %v980_v28, %v972_v27  ;;  %v3706_v56 = vpack.c.bf16 %v1015_v29, %v1007_v47  ;;  %v1055_v21 = vld [vmem:[#allocation6 + $0x1598] sm:$0xff]  ;;  %v1060_v27 = vld [vmem:[#allocation6 + $0x15c0] sm:$0xff] }
 0x13e   : > { %1552 = vmatprep.mubr.f32.mxu1 %v361_v22  ;;  %1322 = vmatmul.mubr.f32.gmra.mrb[2].mxu0 %v360_v23  ;;  %v975_v22 = vld [vmem:[#allocation6 + $0x1318] sm:$0xff]  ;;  %v1054_v28 = vld [vmem:[#allocation6 + $0x1590] sm:$0xff] }
 0x13f   : > { %3489 = vmatpush1.bf16.msra.mxu0 %v3488_v39  ;;  %1553 = vmatmul.mubr.f32.gmra.mrb[2].mxu1 %v360_v23  ;;  %v983_v23 = vld [vmem:[#allocation6 + $0x1358] sm:$0xff]  ;;  %v3700_v39 = vpack.c.bf16 %v982_v32, %v974_v30  ;;  %v1069_v32 = vld [vmem:[#allocation6 + $0x1608] sm:$0xff] }
 0x140   : > { %3681 = vmatpush1.bf16.msra.mxu1 %v3680_v20  ;;  %3491 = vmatprep.subr.bf16.mxu0 %v3490_v42  ;;  %v3698_v31 = vpack.c.bf16 %v983_v23, %v975_v22  ;;  %v996_v20 = vld [vmem:[#allocation6 + $0x13c0] sm:$0xff]  ;;  %v990_v42 = vld [vmem:[#allocation6 + $0x1390] sm:$0xff]  ;;  %v1063_v22 = vld [vmem:[#allocation6 + $0x15d8] sm:$0xff] }
 0x141   : > { %3683 = vmatprep.subr.bf16.mxu1 %v3682_v46  ;;  %1392 = vmatprep.mubr.f32.mxu0 %v357_v35  ;;  %v1013_v46 = vld [vmem:[#allocation6 + $0x1448] sm:$0xff]  ;;  %v3512_v50 = vpack.c.bf16 %v996_v20, %v988_v41  ;;  %v3718_v30 = vpack.c.bf16 %v1063_v22, %v1055_v21  ;;  %v1076_v41 = vld [vmem:[#allocation6 + $0x1640] sm:$0xff]  ;;  %v1070_v20 = vld [vmem:[#allocation6 + $0x1610] sm:$0xff] }
 0x142   : > { %1623 = vmatprep.mubr.f32.mxu1 %v357_v35  ;;  %v991_v35 = vld [vmem:[#allocation6 + $0x1398] sm:$0xff] }
 0x143   : > { %3493 = vmatpush1.bf16.msra.mxu0 %v3492_v51  ;;  %v3702_v43 = vpack.c.bf16 %v999_v36, %v991_v35  ;;  %v3704_v51 = vpack.c.bf16 %v998_v44, %v990_v42  ;;  %v1079_v35 = vld [vmem:[#allocation6 + $0x1658] sm:$0xff]  ;;  %v1085_v44 = vld [vmem:[#allocation6 + $0x1688] sm:$0xff] }
 0x144   : > { %3685 = vmatpush1.bf16.msra.mxu1 %v3684_v52  ;;  %3495 = vmatprep.subr.bf16.mxu0 %v3494_v53  ;;  %v3514_v52 = vpack.c.bf16 %v1013_v46, %v1005_v45  ;;  %v1004_v53 = vld [vmem:[#allocation6 + $0x1400] sm:$0xff]  ;;  %v3722_v42 = vpack.c.bf16 %v1079_v35, %v1071_v34  ;;  %v1093_v45 = vld [vmem:[#allocation6 + $0x16c8] sm:$0xff]  ;;  %v1087_v46 = vld [vmem:[#allocation6 + $0x1698] sm:$0xff] }
 0x145   : > { %3687 = vmatprep.subr.bf16.mxu1 %v3686_v57  ;;  %v1014_v57 = vld [vmem:[#allocation6 + $0x1450] sm:$0xff]  ;;  %v3516_v62 = vpack.c.bf16 %v1012_v54, %v1004_v53  ;;  %v1095_v47 = vld [vmem:[#allocation6 + $0x16d8] sm:$0xff]  ;;  %v1092_v53 = vld [vmem:[#allocation6 + $0x16c0] sm:$0xff] }
 0x146   : > { %v1086_v54 = vld [vmem:[#allocation6 + $0x1690] sm:$0xff]  ;;  %v1127_v8 = vld [vmem:[#allocation6 + $0x17d8] sm:$0xff] }
 0x147   : > { %3497 = vmatpush1.bf16.msra.mxu0 %v3496_v63  ;;  %v3708_v63 = vpack.c.bf16 %v1014_v57, %v1006_v55  ;;  %v3726_v55 = vpack.c.bf16 %v1095_v47, %v1087_v46  ;;  %v1101_v57 = vld [vmem:[#allocation6 + $0x1708] sm:$0xff]  ;;  %v379_v21 = vld [vmem:[#allocation6 + $0x78] sm:$0xff] }
 0x148   : > { %3689 = vmatpush1.bf16.msra.mxu1 %v3688_v0  ;;  %3499 = vmatprep.subr.bf16.mxu0 %v3498_v1  ;;  %v3518_v0 = vpack.c.bf16 %v1029_v59, %v1021_v58  ;;  %v1020_v1 = vld [vmem:[#allocation6 + $0x1480] sm:$0xff]  ;;  %v1109_v58 = vld [vmem:[#allocation6 + $0x1748] sm:$0xff]  ;;  %v1103_v59 = vld [vmem:[#allocation6 + $0x1718] sm:$0xff] }
 0x149   : > { %3691 = vmatprep.subr.bf16.mxu1 %v3690_v5  ;;  %v1030_v5 = vld [vmem:[#allocation6 + $0x14d0] sm:$0xff]  ;;  %v3520_v10 = vpack.c.bf16 %v1028_v2, %v1020_v1  ;;  %v1108_v1 = vld [vmem:[#allocation6 + $0x1740] sm:$0xff]  ;;  %v387_v34 = vld [vmem:[#allocation6 + $0xb8] sm:$0xff] }
 0x14a   : > { %v1102_v2 = vld [vmem:[#allocation6 + $0x1710] sm:$0xff]  ;;  %v395_v35 = vld [vmem:[#allocation6 + $0xf8] sm:$0xff] }
 0x14b   : > { %3501 = vmatpush1.bf16.msra.mxu0 %v3500_v11  ;;  %v3712_v11 = vpack.c.bf16 %v1030_v5, %v1022_v3  ;;  %v3730_v3 = vpack.c.bf16 %v1111_v60, %v1103_v59  ;;  %v1117_v5 = vld [vmem:[#allocation6 + $0x1788] sm:$0xff]  ;;  %v411_v46 = vld [vmem:[#allocation6 + $0x178] sm:$0xff] }
 0x14c   : > { %3693 = vmatpush1.bf16.msra.mxu1 %v3692_v12  ;;  %3503 = vmatprep.subr.bf16.mxu0 %v3502_v13  ;;  %v3522_v12 = vpack.c.bf16 %v1045_v7, %v1037_v6  ;;  %v1036_v13 = vld [vmem:[#allocation6 + $0x1500] sm:$0xff]  ;;  %v1125_v6 = vld [vmem:[#allocation6 + $0x17c8] sm:$0xff]  ;;  %v1119_v7 = vld [vmem:[#allocation6 + $0x1798] sm:$0xff] }
 0x14d   : > { %3695 = vmatprep.subr.bf16.mxu1 %v3694_v17  ;;  %v1046_v17 = vld [vmem:[#allocation6 + $0x1550] sm:$0xff]  ;;  %v3524_v23 = vpack.c.bf16 %v1044_v14, %v1036_v13  ;;  %v1124_v13 = vld [vmem:[#allocation6 + $0x17c0] sm:$0xff] }
 0x14e   : > { %v1118_v14 = vld [vmem:[#allocation6 + $0x1790] sm:$0xff] }
 0x14f   : > { %3505 = vmatpush1.bf16.msra.mxu0 %v3504_v24  ;;  %v3716_v24 = vpack.c.bf16 %v1046_v17, %v1038_v15  ;;  %v3734_v15 = vpack.c.bf16 %v1127_v8, %v1119_v7  ;;  %v369_v17 = vld [vmem:[#allocation6 + $0x28] sm:$0xff] }
 0x150   : > { %3697 = vmatpush1.bf16.msra.mxu1 %v3696_v25  ;;  %3507 = vmatprep.subr.bf16.mxu0 %v3506_v26  ;;  %v3526_v25 = vpack.c.bf16 %v1061_v19, %v1053_v18  ;;  %v1052_v26 = vld [vmem:[#allocation6 + $0x1580] sm:$0xff]  ;;  %v377_v18 = vld [vmem:[#allocation6 + $0x68] sm:$0xff]  ;;  %v371_v19 = vld [vmem:[#allocation6 + $0x38] sm:$0xff] }
 0x151   : > { %3699 = vmatprep.subr.bf16.mxu1 %v3698_v31  ;;  %v1062_v31 = vld [vmem:[#allocation6 + $0x15d0] sm:$0xff]  ;;  %v3528_v36 = vpack.c.bf16 %v1060_v27, %v1052_v26  ;;  %v376_v26 = vld [vmem:[#allocation6 + $0x60] sm:$0xff]  ;;  %v3930_v27 = vpack.c.bf16 %v379_v21, %v371_v19 }
 0x153   : > { %3509 = vmatpush1.bf16.msra.mxu0 %v3508_v37  ;;  %v3720_v37 = vpack.c.bf16 %v1062_v31, %v1054_v28  ;;  %v370_v28 = vld [vmem:[#allocation6 + $0x30] sm:$0xff]  ;;  %v385_v31 = vld [vmem:[#allocation6 + $0xa8] sm:$0xff] }
 0x154   : > { %3701 = vmatpush1.bf16.msra.mxu1 %v3700_v39  ;;  %3511 = vmatprep.subr.bf16.mxu0 %v3510_v40  ;;  %v3530_v39 = vpack.c.bf16 %v1077_v33, %v1069_v32  ;;  %v1068_v40 = vld [vmem:[#allocation6 + $0x1600] sm:$0xff]  ;;  %v393_v32 = vld [vmem:[#allocation6 + $0xe8] sm:$0xff] }
 0x155   : > { %3703 = vmatprep.subr.bf16.mxu1 %v3702_v43  ;;  %v1078_v43 = vld [vmem:[#allocation6 + $0x1650] sm:$0xff]  ;;  %v3532_v29 = vpack.c.bf16 %v1076_v41, %v1068_v40  ;;  %v3742_v41 = vpack.c.bf16 %v393_v32, %v385_v31  ;;  %v475_v31 = vld [vmem:[#allocation6 + $0x378] sm:$0xff] }
 0x156   : > { %v386_v40 = vld [vmem:[#allocation6 + $0xb0] sm:$0xff] }
 0x157   : > { %3513 = vmatpush1.bf16.msra.mxu0 %v3512_v50  ;;  %v3724_v50 = vpack.c.bf16 %v1078_v43, %v1070_v20  ;;  %v394_v20 = vld [vmem:[#allocation6 + $0xf0] sm:$0xff]  ;;  %v409_v43 = vld [vmem:[#allocation6 + $0x168] sm:$0xff] }
 0x158   : > { %3705 = vmatpush1.bf16.msra.mxu1 %v3704_v51  ;;  %3515 = vmatprep.subr.bf16.mxu0 %v3514_v52  ;;  %v3534_v51 = vpack.c.bf16 %v1093_v45, %v1085_v44  ;;  %v1084_v52 = vld [vmem:[#allocation6 + $0x1680] sm:$0xff]  ;;  %v3934_v44 = vpack.c.bf16 %v395_v35, %v387_v34  ;;  %v403_v45 = vld [vmem:[#allocation6 + $0x138] sm:$0xff] }
 0x159   : > { %3707 = vmatprep.subr.bf16.mxu1 %v3706_v56  ;;  %v1094_v56 = vld [vmem:[#allocation6 + $0x16d0] sm:$0xff]  ;;  %v3536_v61 = vpack.c.bf16 %v1092_v53, %v1084_v52  ;;  %v408_v52 = vld [vmem:[#allocation6 + $0x160] sm:$0xff] }
 0x15a   : > { %v402_v53 = vld [vmem:[#allocation6 + $0x130] sm:$0xff]  ;;  %v464_v35 = vld [vmem:[#allocation6 + $0x320] sm:$0xff] }
 0x15b   : > { %3517 = vmatpush1.bf16.msra.mxu0 %v3516_v62  ;;  %v3728_v62 = vpack.c.bf16 %v1094_v56, %v1086_v54  ;;  %v3938_v54 = vpack.c.bf16 %v411_v46, %v403_v45  ;;  %v417_v56 = vld [vmem:[#allocation6 + $0x1a8] sm:$0xff] }
 0x15c   : > { %3709 = vmatpush1.bf16.msra.mxu1 %v3708_v63  ;;  %3519 = vmatprep.subr.bf16.mxu0 %v3518_v0  ;;  %v3538_v63 = vpack.c.bf16 %v1109_v58, %v1101_v57  ;;  %v1100_v0 = vld [vmem:[#allocation6 + $0x1700] sm:$0xff]  ;;  %v425_v57 = vld [vmem:[#allocation6 + $0x1e8] sm:$0xff]  ;;  %v427_v58 = vld [vmem:[#allocation6 + $0x1f8] sm:$0xff] }
 0x15d   : > { %3711 = vmatprep.subr.bf16.mxu1 %v3710_v4  ;;  %v1110_v4 = vld [vmem:[#allocation6 + $0x1750] sm:$0xff]  ;;  %v3540_v9 = vpack.c.bf16 %v1108_v1, %v1100_v0 }
 0x15e   : > { %v426_v1 = vld [vmem:[#allocation6 + $0x1f0] sm:$0xff] }
 0x15f   : > { %3521 = vmatpush1.bf16.msra.mxu0 %v3520_v10  ;;  %v3732_v10 = vpack.c.bf16 %v1110_v4, %v1102_v2  ;;  %v433_v2 = vld [vmem:[#allocation6 + $0x228] sm:$0xff] }
 0x160   : > { %3713 = vmatpush1.bf16.msra.mxu1 %v3712_v11  ;;  %3523 = vmatprep.subr.bf16.mxu0 %v3522_v12  ;;  %v3542_v11 = vpack.c.bf16 %v1125_v6, %v1117_v5  ;;  %v1116_v12 = vld [vmem:[#allocation6 + $0x1780] sm:$0xff]  ;;  %v4787_v4 = vld [vmem:[#allocation2 + $0x8] sm:$0xff]  ;;  %v435_v5 = vld [vmem:[#allocation6 + $0x238] sm:$0xff] }
 0x161   : > { %3715 = vmatprep.subr.bf16.mxu1 %v3714_v16  ;;  %v1126_v16 = vld [vmem:[#allocation6 + $0x17d0] sm:$0xff]  ;;  %v3544_v22 = vpack.c.bf16 %v1124_v13, %v1116_v12  ;;  %v443_v6 = vld [vmem:[#allocation6 + $0x278] sm:$0xff] }
 0x162   : > { %v3946_v12 = vpack.c.bf16 %v443_v6, %v435_v5  ;;  %v442_v13 = vld [vmem:[#allocation6 + $0x270] sm:$0xff]  ;;  %v512_v6 = vld [vmem:[#allocation6 + $0x4a0] sm:$0xff] }
 0x163   : > { %3525 = vmatpush1.bf16.msra.mxu0 %v3524_v23  ;;  %v3736_v23 = vpack.c.bf16 %v1126_v16, %v1118_v14  ;;  %v449_v14 = vld [vmem:[#allocation6 + $0x2a8] sm:$0xff]  ;;  %v451_v16 = vld [vmem:[#allocation6 + $0x2b8] sm:$0xff] }
 0x164   : > { %3717 = vmatpush1.bf16.msra.mxu1 %v3716_v24  ;;  %3527 = vmatprep.subr.bf16.mxu0 %v3526_v25  ;;  %v3738_v24 = vpack.c.bf16 %v377_v18, %v369_v17  ;;  %v368_v25 = vld [vmem:[#allocation6 + $0x20] sm:$0xff]  ;;  %v459_v17 = vld [vmem:[#allocation6 + $0x2f8] sm:$0xff] }
 0x165   : > { %3719 = vmatprep.subr.bf16.mxu1 %v3718_v30  ;;  %v378_v30 = vld [vmem:[#allocation6 + $0x70] sm:$0xff]  ;;  %v3740_v33 = vpack.c.bf16 %v376_v26, %v368_v25  ;;  %v3950_v25 = vpack.c.bf16 %v459_v17, %v451_v16  ;;  %v528_v17 = vld [vmem:[#allocation6 + $0x520] sm:$0xff] }
 0x166   : > { %v458_v26 = vld [vmem:[#allocation6 + $0x2f0] sm:$0xff] }
 0x167   : > { %3529 = vmatpush1.bf16.msra.mxu0 %v3528_v36  ;;  %v3932_v36 = vpack.c.bf16 %v378_v30, %v370_v28  ;;  %v473_v28 = vld [vmem:[#allocation6 + $0x368] sm:$0xff]  ;;  %v467_v30 = vld [vmem:[#allocation6 + $0x338] sm:$0xff] }
 0x168   : > { %3721 = vmatpush1.bf16.msra.mxu1 %v3720_v37  ;;  %3531 = vmatprep.subr.bf16.mxu0 %v3530_v39  ;;  %v384_v37 = vld [vmem:[#allocation6 + $0xa0] sm:$0xff] }
 0x169   : > { %3723 = vmatprep.subr.bf16.mxu1 %v3722_v42  ;;  %v392_v39 = vld [vmem:[#allocation6 + $0xe0] sm:$0xff]  ;;  %v401_v42 = vld [vmem:[#allocation6 + $0x128] sm:$0xff] }
 0x16a   : > { %v3744_v47 = vpack.c.bf16 %v392_v39, %v384_v37  ;;  %v466_v37 = vld [vmem:[#allocation6 + $0x330] sm:$0xff]  ;;  %v3954_v39 = vpack.c.bf16 %v475_v31, %v467_v30  ;;  %v544_v31 = vld [vmem:[#allocation6 + $0x5a0] sm:$0xff] }
 0x16b   : > { %3533 = vmatpush1.bf16.msra.mxu0 %v3532_v29  ;;  %v3936_v29 = vpack.c.bf16 %v394_v20, %v386_v40  ;;  %v474_v40 = vld [vmem:[#allocation6 + $0x370] sm:$0xff]  ;;  %v489_v20 = vld [vmem:[#allocation6 + $0x3e8] sm:$0xff] }
 0x16c   : > { %3725 = vmatpush1.bf16.msra.mxu1 %v3724_v50  ;;  %3535 = vmatprep.subr.bf16.mxu0 %v3534_v51  ;;  %v3746_v50 = vpack.c.bf16 %v409_v43, %v401_v42  ;;  %v400_v51 = vld [vmem:[#allocation6 + $0x120] sm:$0xff]  ;;  %v483_v42 = vld [vmem:[#allocation6 + $0x3b8] sm:$0xff]  ;;  %v3956_v45 = vpack.c.bf16 %v474_v40, %v466_v37  ;;  %v569_v37 = vld [vmem:[#allocation6 + $0x668] sm:$0xff] }
 0x16d   : > { %3727 = vmatprep.subr.bf16.mxu1 %v3726_v55  ;;  %v410_v55 = vld [vmem:[#allocation6 + $0x170] sm:$0xff]  ;;  %v3748_v59 = vpack.c.bf16 %v408_v52, %v400_v51  ;;  %v491_v43 = vld [vmem:[#allocation6 + $0x3f8] sm:$0xff] }
 0x16e   : > { %v3940_v60 = vpack.c.bf16 %v410_v55, %v402_v53  ;;  %v3958_v51 = vpack.c.bf16 %v491_v43, %v483_v42  ;;  %v490_v52 = vld [vmem:[#allocation6 + $0x3f0] sm:$0xff]  ;;  %v497_v53 = vld [vmem:[#allocation6 + $0x428] sm:$0xff]  ;;  %v499_v55 = vld [vmem:[#allocation6 + $0x438] sm:$0xff] }
 0x16f   : > { %3537 = vmatpush1.bf16.msra.mxu0 %v3536_v61  ;;  %v3750_v61 = vpack.c.bf16 %v425_v57, %v417_v56  ;;  %v507_v56 = vld [vmem:[#allocation6 + $0x478] sm:$0xff]  ;;  %v560_v43 = vld [vmem:[#allocation6 + $0x620] sm:$0xff] }
 0x170   : > { %3729 = vmatpush1.bf16.msra.mxu1 %v3728_v62  ;;  %3539 = vmatprep.subr.bf16.mxu0 %v3538_v63  ;;  %v416_v62 = vld [vmem:[#allocation6 + $0x1a0] sm:$0xff]  ;;  %v418_v63 = vld [vmem:[#allocation6 + $0x1b0] sm:$0xff]  ;;  %v571_v40 = vld [vmem:[#allocation6 + $0x678] sm:$0xff] }
 0x171   : > { %3731 = vmatprep.subr.bf16.mxu1 %v3730_v3  ;;  %v441_v3 = vld [vmem:[#allocation6 + $0x268] sm:$0xff]  ;;  %v3944_v7 = vpack.c.bf16 %v426_v1, %v418_v63  ;;  %v515_v1 = vld [vmem:[#allocation6 + $0x4b8] sm:$0xff] }
 0x172   : > { %v3754_v8 = vpack.c.bf16 %v441_v3, %v433_v2  ;;  %v513_v63 = vld [vmem:[#allocation6 + $0x4a8] sm:$0xff]  ;;  %v523_v2 = vld [vmem:[#allocation6 + $0x4f8] sm:$0xff] }
 0x173   : > { %3541 = vmatpush1.bf16.msra.mxu0 %v3540_v9  ;;  %v432_v9 = vld [vmem:[#allocation6 + $0x220] sm:$0xff] }
 0x174   : > { %3733 = vmatpush1.bf16.msra.mxu1 %v3732_v10  ;;  %3543 = vmatprep.subr.bf16.mxu0 %v3542_v11  ;;  %v440_v10 = vld [vmem:[#allocation6 + $0x260] sm:$0xff]  ;;  %v434_v11 = vld [vmem:[#allocation6 + $0x230] sm:$0xff] }
 0x175   : > { %3735 = vmatprep.subr.bf16.mxu1 %v3734_v15  ;;  %v457_v15 = vld [vmem:[#allocation6 + $0x2e8] sm:$0xff]  ;;  %v3756_v18 = vpack.c.bf16 %v440_v10, %v432_v9  ;;  %v3948_v19 = vpack.c.bf16 %v442_v13, %v434_v11  ;;  %v522_v9 = vld [vmem:[#allocation6 + $0x4f0] sm:$0xff]  ;;  %v539_v13 = vld [vmem:[#allocation6 + $0x578] sm:$0xff] }
 0x176   : > { %v3758_v21 = vpack.c.bf16 %v457_v15, %v449_v14  ;;  %v529_v10 = vld [vmem:[#allocation6 + $0x528] sm:$0xff] }
 0x177   : > { %3545 = vmatpush1.bf16.msra.mxu0 %v3544_v22  ;;  %v448_v22 = vld [vmem:[#allocation6 + $0x2a0] sm:$0xff]  ;;  %v537_v11 = vld [vmem:[#allocation6 + $0x568] sm:$0xff] }
 0x178   : > { %3737 = vmatpush1.bf16.msra.mxu1 %v3736_v23  ;;  %3739 = vmatprep.subr.bf16.mxu0 %v3738_v24  ;;  %v456_v23 = vld [vmem:[#allocation6 + $0x2e0] sm:$0xff]  ;;  %v450_v24 = vld [vmem:[#allocation6 + $0x2b0] sm:$0xff]  ;;  %v3778_v16 = vpack.c.bf16 %v537_v11, %v529_v10 }
 0x179   : > { %3931 = vmatprep.subr.bf16.mxu1 %v3930_v27  ;;  %v465_v27 = vld [vmem:[#allocation6 + $0x328] sm:$0xff]  ;;  %v3760_v32 = vpack.c.bf16 %v456_v23, %v448_v22  ;;  %v538_v22 = vld [vmem:[#allocation6 + $0x570] sm:$0xff] }
 0x17a   : > { %1393 = vmatmul.mubr.f32.vlgmr.msra.gmra.mrb[0].mxu0 %v5345_v38  ;;  %v3762_v34 = vpack.c.bf16 %v473_v28, %v465_v27  ;;  %v545_v23 = vld [vmem:[#allocation6 + $0x5a8] sm:$0xff] }
 0x17b   : > { %1624 = vmatmul.mubr.f32.vlgmr.msra.gmra.mrb[0].mxu1 %v5345_v38  ;;  %3741 = vmatpush1.bf16.msra.mxu0 %v3740_v33  ;;  %v419_v38 = vld [vmem:[#allocation6 + $0x1b8] sm:$0xff]  ;;  %v3952_v33 = vpack.c.bf16 %v458_v26, %v450_v24  ;;  %v553_v24 = vld [vmem:[#allocation6 + $0x5e8] sm:$0xff] }
 0x17c   : > { %3933 = vmatpush1.bf16.msra.mxu1 %v3932_v36  ;;  %1398 = vmatprep.mubr.f32.mxu0 %v5349_v48  ;;  %v3942_v0 = vpack.c.bf16 %v427_v58, %v419_v38  ;;  %v472_v36 = vld [vmem:[#allocation6 + $0x360] sm:$0xff]  ;;  %v555_v26 = vld [vmem:[#allocation6 + $0x5f8] sm:$0xff]  ;;  %v3782_v30 = vpack.c.bf16 %v553_v24, %v545_v23 }
 0x17d   : > { %1629 = vmatprep.mubr.f32.mxu1 %v5349_v48  ;;  %3743 = vmatprep.subr.bf16.mxu0 %v3742_v41  ;;  %v424_v48 = vld [vmem:[#allocation6 + $0x1e0] sm:$0xff]  ;;  %v481_v41 = vld [vmem:[#allocation6 + $0x3a8] sm:$0xff] }
 0x17e   : > { %1399 = vmatmul.mubr.f32.gmra.mrb[2].mxu0 %v5351_v49  ;;  %3935 = vmatprep.subr.bf16.mxu1 %v3934_v44  ;;  %v3764_v44 = vpack.c.bf16 %v472_v36, %v464_v35  ;;  %v3766_v46 = vpack.c.bf16 %v489_v20, %v481_v41  ;;  %v554_v35 = vld [vmem:[#allocation6 + $0x5f0] sm:$0xff]  ;;  %v561_v36 = vld [vmem:[#allocation6 + $0x628] sm:$0xff] }
 0x17f   : > { %1630 = vmatmul.mubr.f32.gmra.mrb[2].mxu1 %v5351_v49  ;;  %3745 = vmatpush1.bf16.msra.mxu0 %v3744_v47  ;;  %v3752_v49 = vpack.c.bf16 %v424_v48, %v416_v62  ;;  %v480_v47 = vld [vmem:[#allocation6 + $0x3a0] sm:$0xff]  ;;  %v3962_v62 = vpack.c.bf16 %v507_v56, %v499_v55  ;;  %v506_v48 = vld [vmem:[#allocation6 + $0x470] sm:$0xff]  ;;  %v3786_v42 = vpack.c.bf16 %v569_v37, %v561_v36 }
 0x180   : > { %3937 = vmatpush1.bf16.msra.mxu1 %v3936_v29  ;;  %3747 = vmatprep.subr.bf16.mxu0 %v3746_v50  ;;  %v488_v29 = vld [vmem:[#allocation6 + $0x3e0] sm:$0xff]  ;;  %v482_v50 = vld [vmem:[#allocation6 + $0x3b0] sm:$0xff] }
 0x181   : > { %3939 = vmatprep.subr.bf16.mxu1 %v3938_v54  ;;  %1700 = vmatprep.mubr.f32.mxu0 %v4787_v4  ;;  %v505_v54 = vld [vmem:[#allocation6 + $0x468] sm:$0xff]  ;;  %v3768_v57 = vpack.c.bf16 %v488_v29, %v480_v47  ;;  %v3960_v38 = vpack.c.bf16 %v490_v52, %v482_v50  ;;  %v570_v47 = vld [vmem:[#allocation6 + $0x670] sm:$0xff]  ;;  %v587_v52 = vld [vmem:[#allocation6 + $0x6f8] sm:$0xff] }
 0x182   : > { %1931 = vmatprep.mubr.f32.mxu1 %v4787_v4  ;;  %v3770_v58 = vpack.c.bf16 %v505_v54, %v497_v53  ;;  %v577_v29 = vld [vmem:[#allocation6 + $0x6a8] sm:$0xff]  ;;  %v576_v56 = vld [vmem:[#allocation6 + $0x6a0] sm:$0xff] }
 0x183   : > { %3749 = vmatpush1.bf16.msra.mxu0 %v3748_v59  ;;  %v496_v59 = vld [vmem:[#allocation6 + $0x420] sm:$0xff]  ;;  %v585_v50 = vld [vmem:[#allocation6 + $0x6e8] sm:$0xff] }
 0x184   : > { %3941 = vmatpush1.bf16.msra.mxu1 %v3940_v60  ;;  %3751 = vmatprep.subr.bf16.mxu0 %v3750_v61  ;;  %v504_v60 = vld [vmem:[#allocation6 + $0x460] sm:$0xff]  ;;  %v498_v61 = vld [vmem:[#allocation6 + $0x430] sm:$0xff]  ;;  %v3790_v55 = vpack.c.bf16 %v585_v50, %v577_v29  ;;  %v667_v29 = vld [vmem:[#allocation6 + $0x978] sm:$0xff] }
 0x185   : > { %3943 = vmatprep.subr.bf16.mxu1 %v3942_v0  ;;  %v521_v0 = vld [vmem:[#allocation6 + $0x4e8] sm:$0xff]  ;;  %v3772_v3 = vpack.c.bf16 %v504_v60, %v496_v59  ;;  %v3964_v4 = vpack.c.bf16 %v506_v48, %v498_v61  ;;  %v586_v59 = vld [vmem:[#allocation6 + $0x6f0] sm:$0xff]  ;;  %v603_v48 = vld [vmem:[#allocation6 + $0x778] sm:$0xff] }
 0x186   : > { %v3774_v5 = vpack.c.bf16 %v521_v0, %v513_v63  ;;  %v593_v60 = vld [vmem:[#allocation6 + $0x728] sm:$0xff] }
 0x187   : > { %3753 = vmatpush1.bf16.msra.mxu0 %v3752_v49  ;;  %v520_v49 = vld [vmem:[#allocation6 + $0x4e0] sm:$0xff]  ;;  %v601_v61 = vld [vmem:[#allocation6 + $0x768] sm:$0xff] }
 0x188   : > { %3945 = vmatpush1.bf16.msra.mxu1 %v3944_v7  ;;  %3755 = vmatprep.subr.bf16.mxu0 %v3754_v8  ;;  %v514_v7 = vld [vmem:[#allocation6 + $0x4b0] sm:$0xff]  ;;  %v3966_v8 = vpack.c.bf16 %v523_v2, %v515_v1  ;;  %v3776_v14 = vpack.c.bf16 %v520_v49, %v512_v6  ;;  %v3794_v1 = vpack.c.bf16 %v601_v61, %v593_v60  ;;  %v592_v2 = vld [vmem:[#allocation6 + $0x720] sm:$0xff]  ;;  %v609_v49 = vld [vmem:[#allocation6 + $0x7a8] sm:$0xff] }
 0x189   : > { %3947 = vmatprep.subr.bf16.mxu1 %v3946_v12  ;;  %v531_v12 = vld [vmem:[#allocation6 + $0x538] sm:$0xff]  ;;  %v3968_v15 = vpack.c.bf16 %v522_v9, %v514_v7  ;;  %v602_v6 = vld [vmem:[#allocation6 + $0x770] sm:$0xff]  ;;  %v617_v7 = vld [vmem:[#allocation6 + $0x7e8] sm:$0xff] }
 0x18a   : > { %v619_v9 = vld [vmem:[#allocation6 + $0x7f8] sm:$0xff] }
 0x18b   : > { %3757 = vmatpush1.bf16.msra.mxu0 %v3756_v18  ;;  %v536_v18 = vld [vmem:[#allocation6 + $0x560] sm:$0xff]  ;;  %v675_v60 = vld [vmem:[#allocation6 + $0x9b8] sm:$0xff] }
 0x18c   : > { %3949 = vmatpush1.bf16.msra.mxu1 %v3948_v19  ;;  %3759 = vmatprep.subr.bf16.mxu0 %v3758_v21  ;;  %v530_v19 = vld [vmem:[#allocation6 + $0x530] sm:$0xff]  ;;  %v3970_v21 = vpack.c.bf16 %v539_v13, %v531_v12  ;;  %v3780_v27 = vpack.c.bf16 %v536_v18, %v528_v17  ;;  %v3798_v12 = vpack.c.bf16 %v617_v7, %v609_v49  ;;  %v608_v13 = vld [vmem:[#allocation6 + $0x7a0] sm:$0xff]  ;;  %v625_v18 = vld [vmem:[#allocation6 + $0x828] sm:$0xff] }
 0x18d   : > { %3951 = vmatprep.subr.bf16.mxu1 %v3950_v25  ;;  %v547_v25 = vld [vmem:[#allocation6 + $0x5b8] sm:$0xff]  ;;  %v3972_v28 = vpack.c.bf16 %v538_v22, %v530_v19  ;;  %v618_v17 = vld [vmem:[#allocation6 + $0x7f0] sm:$0xff]  ;;  %v633_v19 = vld [vmem:[#allocation6 + $0x868] sm:$0xff] }
 0x18e   : > { %v635_v22 = vld [vmem:[#allocation6 + $0x878] sm:$0xff]  ;;  %v697_v49 = vld [vmem:[#allocation6 + $0xa68] sm:$0xff] }
 0x18f   : > { %3761 = vmatpush1.bf16.msra.mxu0 %v3760_v32  ;;  %v552_v32 = vld [vmem:[#allocation6 + $0x5e0] sm:$0xff]  ;;  %v683_v61 = vld [vmem:[#allocation6 + $0x9f8] sm:$0xff] }
 0x190   : > { %3953 = vmatpush1.bf16.msra.mxu1 %v3952_v33  ;;  %3763 = vmatprep.subr.bf16.mxu0 %v3762_v34  ;;  %v546_v33 = vld [vmem:[#allocation6 + $0x5b0] sm:$0xff]  ;;  %v3974_v34 = vpack.c.bf16 %v555_v26, %v547_v25  ;;  %v3784_v41 = vpack.c.bf16 %v552_v32, %v544_v31  ;;  %v3802_v25 = vpack.c.bf16 %v633_v19, %v625_v18  ;;  %v624_v26 = vld [vmem:[#allocation6 + $0x820] sm:$0xff]  ;;  %v641_v32 = vld [vmem:[#allocation6 + $0x8a8] sm:$0xff] }
 0x191   : > { %3955 = vmatprep.subr.bf16.mxu1 %v3954_v39  ;;  %v563_v39 = vld [vmem:[#allocation6 + $0x638] sm:$0xff]  ;;  %v3976_v20 = vpack.c.bf16 %v554_v35, %v546_v33  ;;  %v634_v31 = vld [vmem:[#allocation6 + $0x870] sm:$0xff]  ;;  %v649_v33 = vld [vmem:[#allocation6 + $0x8e8] sm:$0xff] }
 0x192   : > { %v651_v35 = vld [vmem:[#allocation6 + $0x8f8] sm:$0xff]  ;;  %v705_v18 = vld [vmem:[#allocation6 + $0xaa8] sm:$0xff] }
 0x193   : > { %3765 = vmatpush1.bf16.msra.mxu0 %v3764_v44  ;;  %v568_v44 = vld [vmem:[#allocation6 + $0x660] sm:$0xff]  ;;  %v4791_v7 = vld [vmem:[#allocation2 + $0x18] sm:$0xff]  ;;  %v713_v19 = vld [vmem:[#allocation6 + $0xae8] sm:$0xff] }
 0x194   : > { %3957 = vmatpush1.bf16.msra.mxu1 %v3956_v45  ;;  %3767 = vmatprep.subr.bf16.mxu0 %v3766_v46  ;;  %v562_v45 = vld [vmem:[#allocation6 + $0x630] sm:$0xff]  ;;  %v3978_v46 = vpack.c.bf16 %v571_v40, %v563_v39  ;;  %v3788_v53 = vpack.c.bf16 %v568_v44, %v560_v43  ;;  %v3806_v39 = vpack.c.bf16 %v649_v33, %v641_v32  ;;  %v640_v40 = vld [vmem:[#allocation6 + $0x8a0] sm:$0xff]  ;;  %v657_v44 = vld [vmem:[#allocation6 + $0x928] sm:$0xff] }
 0x195   : > { %3959 = vmatprep.subr.bf16.mxu1 %v3958_v51  ;;  %v579_v51 = vld [vmem:[#allocation6 + $0x6b8] sm:$0xff]  ;;  %v3980_v54 = vpack.c.bf16 %v570_v47, %v562_v45  ;;  %v650_v43 = vld [vmem:[#allocation6 + $0x8f0] sm:$0xff]  ;;  %v665_v45 = vld [vmem:[#allocation6 + $0x968] sm:$0xff] }
 0x196   : > { %v659_v47 = vld [vmem:[#allocation6 + $0x938] sm:$0xff]  ;;  %v721_v32 = vld [vmem:[#allocation6 + $0xb28] sm:$0xff] }
 0x197   : > { %3769 = vmatpush1.bf16.msra.mxu0 %v3768_v57  ;;  %v584_v57 = vld [vmem:[#allocation6 + $0x6e0] sm:$0xff]  ;;  %v729_v33 = vld [vmem:[#allocation6 + $0xb68] sm:$0xff] }
 0x198   : > { %3961 = vmatpush1.bf16.msra.mxu1 %v3960_v38  ;;  %3771 = vmatprep.subr.bf16.mxu0 %v3770_v58  ;;  %v578_v38 = vld [vmem:[#allocation6 + $0x6b0] sm:$0xff]  ;;  %v3982_v58 = vpack.c.bf16 %v587_v52, %v579_v51  ;;  %v3792_v63 = vpack.c.bf16 %v584_v57, %v576_v56  ;;  %v3810_v52 = vpack.c.bf16 %v665_v45, %v657_v44  ;;  %v737_v44 = vld [vmem:[#allocation6 + $0xba8] sm:$0xff] }
 0x199   : > { %3963 = vmatprep.subr.bf16.mxu1 %v3962_v62  ;;  %v595_v62 = vld [vmem:[#allocation6 + $0x738] sm:$0xff]  ;;  %v3984_v0 = vpack.c.bf16 %v586_v59, %v578_v38  ;;  %v4002_v56 = vpack.c.bf16 %v667_v29, %v659_v47  ;;  %v666_v57 = vld [vmem:[#allocation6 + $0x970] sm:$0xff]  ;;  %v673_v38 = vld [vmem:[#allocation6 + $0x9a8] sm:$0xff] }
 0x19a   : > { %v4789_v59 = vld [vmem:[#allocation2 + $0x78] sm:$0xff]  ;;  %v745_v45 = vld [vmem:[#allocation6 + $0xbe8] sm:$0xff] }
 0x19b   : > { %3773 = vmatpush1.bf16.msra.mxu0 %v3772_v3  ;;  %v600_v3 = vld [vmem:[#allocation6 + $0x760] sm:$0xff]  ;;  %v747_v47 = vld [vmem:[#allocation6 + $0xbf8] sm:$0xff] }
 0x19c   : > { %3965 = vmatpush1.bf16.msra.mxu1 %v3964_v4  ;;  %3775 = vmatprep.subr.bf16.mxu0 %v3774_v5  ;;  %v594_v4 = vld [vmem:[#allocation6 + $0x730] sm:$0xff]  ;;  %v3986_v5 = vpack.c.bf16 %v603_v48, %v595_v62  ;;  %v3796_v10 = vpack.c.bf16 %v600_v3, %v592_v2  ;;  %v680_v2 = vld [vmem:[#allocation6 + $0x9e0] sm:$0xff] }
 0x19d   : > { %3967 = vmatprep.subr.bf16.mxu1 %v3966_v8  ;;  %v611_v8 = vld [vmem:[#allocation6 + $0x7b8] sm:$0xff]  ;;  %v3988_v11 = vpack.c.bf16 %v602_v6, %v594_v4  ;;  %v4790_v62 = vld [vmem:[#allocation2 + $0x70] sm:$0xff]  ;;  %v4006_v4 = vpack.c.bf16 %v683_v61, %v675_v60  ;;  %v689_v6 = vld [vmem:[#allocation6 + $0xa28] sm:$0xff] }
 0x19e   : > { %v674_v3 = vld [vmem:[#allocation6 + $0x9b0] sm:$0xff] }
 0x19f   : > { %3777 = vmatpush1.bf16.msra.mxu0 %v3776_v14  ;;  %v616_v14 = vld [vmem:[#allocation6 + $0x7e0] sm:$0xff] }
 0x1a0   : > { %3969 = vmatpush1.bf16.msra.mxu1 %v3968_v15  ;;  %3779 = vmatprep.subr.bf16.mxu0 %v3778_v16  ;;  %v610_v15 = vld [vmem:[#allocation6 + $0x7b0] sm:$0xff]  ;;  %v3990_v16 = vpack.c.bf16 %v619_v9, %v611_v8  ;;  %v3800_v23 = vpack.c.bf16 %v616_v14, %v608_v13  ;;  %v691_v8 = vld [vmem:[#allocation6 + $0xa38] sm:$0xff]  ;;  %v688_v13 = vld [vmem:[#allocation6 + $0xa20] sm:$0xff] }
 0x1a1   : > { %3971 = vmatprep.subr.bf16.mxu1 %v3970_v21  ;;  %v627_v21 = vld [vmem:[#allocation6 + $0x838] sm:$0xff]  ;;  %v3992_v24 = vpack.c.bf16 %v618_v17, %v610_v15  ;;  %v696_v14 = vld [vmem:[#allocation6 + $0xa60] sm:$0xff]  ;;  %v690_v15 = vld [vmem:[#allocation6 + $0xa30] sm:$0xff] }
 0x1a2   : > { %v699_v9 = vld [vmem:[#allocation6 + $0xa78] sm:$0xff]  ;;  %v698_v17 = vld [vmem:[#allocation6 + $0xa70] sm:$0xff] }
 0x1a3   : > { %3781 = vmatpush1.bf16.msra.mxu0 %v3780_v27  ;;  %v632_v27 = vld [vmem:[#allocation6 + $0x860] sm:$0xff] }
 0x1a4   : > { %3973 = vmatpush1.bf16.msra.mxu1 %v3972_v28  ;;  %3783 = vmatprep.subr.bf16.mxu0 %v3782_v30  ;;  %v626_v28 = vld [vmem:[#allocation6 + $0x830] sm:$0xff]  ;;  %v3994_v30 = vpack.c.bf16 %v635_v22, %v627_v21  ;;  %v3804_v36 = vpack.c.bf16 %v632_v27, %v624_v26  ;;  %v707_v21 = vld [vmem:[#allocation6 + $0xab8] sm:$0xff]  ;;  %v704_v26 = vld [vmem:[#allocation6 + $0xaa0] sm:$0xff] }
 0x1a5   : > { %3975 = vmatprep.subr.bf16.mxu1 %v3974_v34  ;;  %v643_v34 = vld [vmem:[#allocation6 + $0x8b8] sm:$0xff]  ;;  %v3996_v37 = vpack.c.bf16 %v634_v31, %v626_v28  ;;  %v712_v27 = vld [vmem:[#allocation6 + $0xae0] sm:$0xff]  ;;  %v706_v28 = vld [vmem:[#allocation6 + $0xab0] sm:$0xff] }
 0x1a6   : > { %v715_v22 = vld [vmem:[#allocation6 + $0xaf8] sm:$0xff]  ;;  %v714_v31 = vld [vmem:[#allocation6 + $0xaf0] sm:$0xff] }
 0x1a7   : > { %3785 = vmatpush1.bf16.msra.mxu0 %v3784_v41  ;;  %v648_v41 = vld [vmem:[#allocation6 + $0x8e0] sm:$0xff] }
 0x1a8   : > { %3977 = vmatpush1.bf16.msra.mxu1 %v3976_v20  ;;  %3787 = vmatprep.subr.bf16.mxu0 %v3786_v42  ;;  %v642_v20 = vld [vmem:[#allocation6 + $0x8b0] sm:$0xff]  ;;  %v3998_v42 = vpack.c.bf16 %v651_v35, %v643_v34  ;;  %v3808_v50 = vpack.c.bf16 %v648_v41, %v640_v40  ;;  %v723_v34 = vld [vmem:[#allocation6 + $0xb38] sm:$0xff]  ;;  %v720_v40 = vld [vmem:[#allocation6 + $0xb20] sm:$0xff] }
 0x1a9   : > { %3979 = vmatprep.subr.bf16.mxu1 %v3978_v46  ;;  %v4788_v46 = vld [vmem:[#allocation2] sm:$0xff]  ;;  %v4000_v51 = vpack.c.bf16 %v650_v43, %v642_v20  ;;  %v731_v35 = vld [vmem:[#allocation6 + $0xb78] sm:$0xff]  ;;  %v722_v20 = vld [vmem:[#allocation6 + $0xb30] sm:$0xff] }
 0x1aa   : > { %v728_v41 = vld [vmem:[#allocation6 + $0xb60] sm:$0xff]  ;;  %v730_v43 = vld [vmem:[#allocation6 + $0xb70] sm:$0xff] }
 0x1ab   : > { %3789 = vmatpush1.bf16.msra.mxu0 %v3788_v53  ;;  %v656_v53 = vld [vmem:[#allocation6 + $0x920] sm:$0xff]  ;;  %v3828_v29 = vpack.c.bf16 %v728_v41, %v720_v40  ;;  %v810_v40 = vld [vmem:[#allocation6 + $0xdf0] sm:$0xff]  ;;  %v817_v41 = vld [vmem:[#allocation6 + $0xe28] sm:$0xff] }
 0x1ac   : > { %3981 = vmatpush1.bf16.msra.mxu1 %v3980_v54  ;;  %3791 = vmatprep.subr.bf16.mxu0 %v3790_v55  ;;  %v664_v54 = vld [vmem:[#allocation6 + $0x960] sm:$0xff]  ;;  %v658_v55 = vld [vmem:[#allocation6 + $0x930] sm:$0xff] }
 0x1ad   : > { %3983 = vmatprep.subr.bf16.mxu1 %v3982_v58  ;;  %v681_v58 = vld [vmem:[#allocation6 + $0x9e8] sm:$0xff]  ;;  %v3812_v48 = vpack.c.bf16 %v664_v54, %v656_v53  ;;  %v744_v53 = vld [vmem:[#allocation6 + $0xbe0] sm:$0xff]  ;;  %v738_v54 = vld [vmem:[#allocation6 + $0xbb0] sm:$0xff] }
 0x1af   : > { %3793 = vmatpush1.bf16.msra.mxu0 %v3792_v63  ;;  %v4004_v63 = vpack.c.bf16 %v666_v57, %v658_v55  ;;  %v753_v57 = vld [vmem:[#allocation6 + $0xc28] sm:$0xff] }
 0x1b0   : > { %3985 = vmatpush1.bf16.msra.mxu1 %v3984_v0  ;;  %3795 = vmatprep.subr.bf16.mxu0 %v3794_v1  ;;  %v3814_v0 = vpack.c.bf16 %v681_v58, %v673_v38  ;;  %v672_v1 = vld [vmem:[#allocation6 + $0x9a0] sm:$0xff]  ;;  %v761_v38 = vld [vmem:[#allocation6 + $0xc68] sm:$0xff]  ;;  %v755_v58 = vld [vmem:[#allocation6 + $0xc38] sm:$0xff] }
 0x1b1   : > { %3987 = vmatprep.subr.bf16.mxu1 %v3986_v5  ;;  %v682_v5 = vld [vmem:[#allocation6 + $0x9f0] sm:$0xff] }
 0x1b3   : > { %3797 = vmatpush1.bf16.msra.mxu0 %v3796_v10  ;;  %v3816_v10 = vpack.c.bf16 %v680_v2, %v672_v1  ;;  %v762_v2 = vld [vmem:[#allocation6 + $0xc70] sm:$0xff] }
 0x1b4   : > { %3989 = vmatpush1.bf16.msra.mxu1 %v3988_v11  ;;  %3799 = vmatprep.subr.bf16.mxu0 %v3798_v12  ;;  %v4008_v11 = vpack.c.bf16 %v682_v5, %v674_v3  ;;  %v3818_v12 = vpack.c.bf16 %v697_v49, %v689_v6  ;;  %v769_v3 = vld [vmem:[#allocation6 + $0xca8] sm:$0xff]  ;;  %v771_v5 = vld [vmem:[#allocation6 + $0xcb8] sm:$0xff] }
 0x1b5   : > { %3991 = vmatprep.subr.bf16.mxu1 %v3990_v16  ;;  %v4010_v16 = vpack.c.bf16 %v699_v9, %v691_v8  ;;  %v779_v6 = vld [vmem:[#allocation6 + $0xcf8] sm:$0xff]  ;;  %v768_v9 = vld [vmem:[#allocation6 + $0xca0] sm:$0xff] }
 0x1b7   : > { %3801 = vmatpush1.bf16.msra.mxu0 %v3800_v23  ;;  %v3820_v23 = vpack.c.bf16 %v696_v14, %v688_v13  ;;  %v778_v13 = vld [vmem:[#allocation6 + $0xcf0] sm:$0xff]  ;;  %v785_v14 = vld [vmem:[#allocation6 + $0xd28] sm:$0xff] }
 0x1b8   : > { %3993 = vmatpush1.bf16.msra.mxu1 %v3992_v24  ;;  %3803 = vmatprep.subr.bf16.mxu0 %v3802_v25  ;;  %v4012_v24 = vpack.c.bf16 %v698_v17, %v690_v15  ;;  %v3822_v25 = vpack.c.bf16 %v713_v19, %v705_v18  ;;  %v793_v15 = vld [vmem:[#allocation6 + $0xd68] sm:$0xff]  ;;  %v795_v17 = vld [vmem:[#allocation6 + $0xd78] sm:$0xff] }
 0x1b9   : > { %3995 = vmatprep.subr.bf16.mxu1 %v3994_v30  ;;  %v4014_v30 = vpack.c.bf16 %v715_v22, %v707_v21  ;;  %v3842_v21 = vpack.c.bf16 %v793_v15, %v785_v14  ;;  %v784_v22 = vld [vmem:[#allocation6 + $0xd20] sm:$0xff] }
 0x1ba   : > { %1701 = vmatmul.mubr.f32.vlgmr.msra.gmra.mrb[4].mxu0 %v4788_v46 }
 0x1bb   : > { %3805 = vmatpush1.bf16.msra.mxu0 %v3804_v36  ;;  %1932 = vmatmul.mubr.f32.vlgmr.msra.gmra.mrb[4].mxu1 %v4788_v46  ;;  %v3824_v36 = vpack.c.bf16 %v712_v27, %v704_v26  ;;  %v739_v46 = vld [vmem:[#allocation6 + $0xbb8] sm:$0xff]  ;;  %v794_v26 = vld [vmem:[#allocation6 + $0xd70] sm:$0xff]  ;;  %v801_v27 = vld [vmem:[#allocation6 + $0xda8] sm:$0xff] }
 0x1bc   : > { %3997 = vmatpush1.bf16.msra.mxu1 %v3996_v37  ;;  %3807 = vmatprep.subr.bf16.mxu0 %v3806_v39  ;;  %v4016_v37 = vpack.c.bf16 %v714_v31, %v706_v28  ;;  %v3826_v39 = vpack.c.bf16 %v729_v33, %v721_v32  ;;  %v4022_v55 = vpack.c.bf16 %v747_v47, %v739_v46  ;;  %v809_v28 = vld [vmem:[#allocation6 + $0xde8] sm:$0xff]  ;;  %v811_v31 = vld [vmem:[#allocation6 + $0xdf8] sm:$0xff]  ;;  %v816_v47 = vld [vmem:[#allocation6 + $0xe20] sm:$0xff] }
 0x1bd   : > { %3999 = vmatprep.subr.bf16.mxu1 %v3998_v42  ;;  %1706 = vmatprep.mubr.f32.mxu0 %v4789_v59  ;;  %v4018_v42 = vpack.c.bf16 %v731_v35, %v723_v34  ;;  %v3846_v34 = vpack.c.bf16 %v809_v28, %v801_v27  ;;  %v800_v35 = vld [vmem:[#allocation6 + $0xda0] sm:$0xff] }
 0x1be   : > { %1937 = vmatprep.mubr.f32.mxu1 %v4789_v59  ;;  %1707 = vmatmul.mubr.f32.gmra.mrb[6].mxu0 %v4790_v62  ;;  %v763_v59 = vld [vmem:[#allocation6 + $0xc78] sm:$0xff] }
 0x1bf   : > { %3809 = vmatpush1.bf16.msra.mxu0 %v3808_v50  ;;  %1938 = vmatmul.mubr.f32.gmra.mrb[6].mxu1 %v4790_v62  ;;  %v4020_v50 = vpack.c.bf16 %v730_v43, %v722_v20  ;;  %v3834_v62 = vpack.c.bf16 %v761_v38, %v753_v57  ;;  %v4026_v1 = vpack.c.bf16 %v763_v59, %v755_v58  ;;  %v825_v20 = vld [vmem:[#allocation6 + $0xe68] sm:$0xff]  ;;  %v827_v43 = vld [vmem:[#allocation6 + $0xe78] sm:$0xff]  ;;  %v832_v59 = vld [vmem:[#allocation6 + $0xea0] sm:$0xff] }
 0x1c0   : > { %4001 = vmatpush1.bf16.msra.mxu1 %v4000_v51  ;;  %3811 = vmatprep.subr.bf16.mxu0 %v3810_v52  ;;  %v3830_v51 = vpack.c.bf16 %v745_v45, %v737_v44  ;;  %v736_v52 = vld [vmem:[#allocation6 + $0xba0] sm:$0xff]  ;;  %v3850_v46 = vpack.c.bf16 %v825_v20, %v817_v41 }
 0x1c1   : > { %4003 = vmatprep.subr.bf16.mxu1 %v4002_v56  ;;  %1777 = vmatprep.mubr.f32.mxu0 %v4791_v7  ;;  %v746_v56 = vld [vmem:[#allocation6 + $0xbf0] sm:$0xff]  ;;  %v3832_v60 = vpack.c.bf16 %v744_v53, %v736_v52  ;;  %v833_v53 = vld [vmem:[#allocation6 + $0xea8] sm:$0xff] }
 0x1c2   : > { %2008 = vmatprep.mubr.f32.mxu1 %v4791_v7  ;;  %v4024_v61 = vpack.c.bf16 %v746_v56, %v738_v54  ;;  %v826_v52 = vld [vmem:[#allocation6 + $0xe70] sm:$0xff]  ;;  %v841_v54 = vld [vmem:[#allocation6 + $0xee8] sm:$0xff]  ;;  %v843_v56 = vld [vmem:[#allocation6 + $0xef8] sm:$0xff] }
 0x1c3   : > { %3813 = vmatpush1.bf16.msra.mxu0 %v3812_v48  ;;  %v752_v48 = vld [vmem:[#allocation6 + $0xc20] sm:$0xff]  ;;  %v3854_v58 = vpack.c.bf16 %v841_v54, %v833_v53  ;;  %v923_v53 = vld [vmem:[#allocation6 + $0x1178] sm:$0xff] }
 0x1c4   : > { %4005 = vmatpush1.bf16.msra.mxu1 %v4004_v63  ;;  %3815 = vmatprep.subr.bf16.mxu0 %v3814_v0  ;;  %v760_v63 = vld [vmem:[#allocation6 + $0xc60] sm:$0xff]  ;;  %v754_v0 = vld [vmem:[#allocation6 + $0xc30] sm:$0xff] }
 0x1c5   : > { %4007 = vmatprep.subr.bf16.mxu1 %v4006_v4  ;;  %v777_v4 = vld [vmem:[#allocation6 + $0xce8] sm:$0xff]  ;;  %v3836_v49 = vpack.c.bf16 %v760_v63, %v752_v48  ;;  %v4028_v7 = vpack.c.bf16 %v762_v2, %v754_v0  ;;  %v842_v48 = vld [vmem:[#allocation6 + $0xef0] sm:$0xff]  ;;  %v859_v2 = vld [vmem:[#allocation6 + $0xf78] sm:$0xff] }
 0x1c6   : > { %v3838_v8 = vpack.c.bf16 %v777_v4, %v769_v3  ;;  %v849_v63 = vld [vmem:[#allocation6 + $0xf28] sm:$0xff] }
 0x1c7   : > { %3817 = vmatpush1.bf16.msra.mxu0 %v3816_v10  ;;  %v776_v10 = vld [vmem:[#allocation6 + $0xce0] sm:$0xff]  ;;  %v857_v0 = vld [vmem:[#allocation6 + $0xf68] sm:$0xff] }
 0x1c8   : > { %4009 = vmatpush1.bf16.msra.mxu1 %v4008_v11  ;;  %3819 = vmatprep.subr.bf16.mxu0 %v3818_v12  ;;  %v770_v11 = vld [vmem:[#allocation6 + $0xcb0] sm:$0xff]  ;;  %v4030_v12 = vpack.c.bf16 %v779_v6, %v771_v5  ;;  %v3840_v18 = vpack.c.bf16 %v776_v10, %v768_v9  ;;  %v3858_v5 = vpack.c.bf16 %v857_v0, %v849_v63  ;;  %v848_v6 = vld [vmem:[#allocation6 + $0xf20] sm:$0xff]  ;;  %v865_v10 = vld [vmem:[#allocation6 + $0xfa8] sm:$0xff] }
 0x1c9   : > { %4011 = vmatprep.subr.bf16.mxu1 %v4010_v16  ;;  %v787_v16 = vld [vmem:[#allocation6 + $0xd38] sm:$0xff]  ;;  %v4032_v19 = vpack.c.bf16 %v778_v13, %v770_v11  ;;  %v858_v9 = vld [vmem:[#allocation6 + $0xf70] sm:$0xff]  ;;  %v873_v11 = vld [vmem:[#allocation6 + $0xfe8] sm:$0xff] }
 0x1ca   : > { %v875_v13 = vld [vmem:[#allocation6 + $0xff8] sm:$0xff] }
 0x1cb   : > { %3821 = vmatpush1.bf16.msra.mxu0 %v3820_v23  ;;  %v792_v23 = vld [vmem:[#allocation6 + $0xd60] sm:$0xff]  ;;  %v931_v63 = vld [vmem:[#allocation6 + $0x11b8] sm:$0xff] }
 0x1cc   : > { %4013 = vmatpush1.bf16.msra.mxu1 %v4012_v24  ;;  %3823 = vmatprep.subr.bf16.mxu0 %v3822_v25  ;;  %v786_v24 = vld [vmem:[#allocation6 + $0xd30] sm:$0xff]  ;;  %v4034_v25 = vpack.c.bf16 %v795_v17, %v787_v16  ;;  %v3844_v32 = vpack.c.bf16 %v792_v23, %v784_v22  ;;  %v3862_v16 = vpack.c.bf16 %v873_v11, %v865_v10  ;;  %v864_v17 = vld [vmem:[#allocation6 + $0xfa0] sm:$0xff]  ;;  %v881_v23 = vld [vmem:[#allocation6 + $0x1028] sm:$0xff] }
 0x1cd   : > { %4015 = vmatprep.subr.bf16.mxu1 %v4014_v30  ;;  %v803_v30 = vld [vmem:[#allocation6 + $0xdb8] sm:$0xff]  ;;  %v4036_v33 = vpack.c.bf16 %v794_v26, %v786_v24  ;;  %v874_v22 = vld [vmem:[#allocation6 + $0xff0] sm:$0xff]  ;;  %v889_v24 = vld [vmem:[#allocation6 + $0x1068] sm:$0xff] }
 0x1ce   : > { %v891_v26 = vld [vmem:[#allocation6 + $0x1078] sm:$0xff]  ;;  %v953_v10 = vld [vmem:[#allocation6 + $0x1268] sm:$0xff] }
 0x1cf   : > { %3825 = vmatpush1.bf16.msra.mxu0 %v3824_v36  ;;  %v808_v36 = vld [vmem:[#allocation6 + $0xde0] sm:$0xff]  ;;  %v939_v0 = vld [vmem:[#allocation6 + $0x11f8] sm:$0xff]  ;;  %v4795_v11 = vld [vmem:[#allocation2 + $0x28] sm:$0xff] }
 0x1d0   : > { %4017 = vmatpush1.bf16.msra.mxu1 %v4016_v37  ;;  %3827 = vmatprep.subr.bf16.mxu0 %v3826_v39  ;;  %v802_v37 = vld [vmem:[#allocation6 + $0xdb0] sm:$0xff]  ;;  %v4038_v39 = vpack.c.bf16 %v811_v31, %v803_v30  ;;  %v3848_v44 = vpack.c.bf16 %v808_v36, %v800_v35  ;;  %v3866_v30 = vpack.c.bf16 %v889_v24, %v881_v23  ;;  %v880_v31 = vld [vmem:[#allocation6 + $0x1020] sm:$0xff]  ;;  %v897_v36 = vld [vmem:[#allocation6 + $0x10a8] sm:$0xff] }
 0x1d1   : > { %4019 = vmatprep.subr.bf16.mxu1 %v4018_v42  ;;  %v819_v42 = vld [vmem:[#allocation6 + $0xe38] sm:$0xff]  ;;  %v4040_v45 = vpack.c.bf16 %v810_v40, %v802_v37  ;;  %v890_v35 = vld [vmem:[#allocation6 + $0x1070] sm:$0xff]  ;;  %v905_v37 = vld [vmem:[#allocation6 + $0x10e8] sm:$0xff] }
 0x1d2   : > { %v907_v40 = vld [vmem:[#allocation6 + $0x10f8] sm:$0xff]  ;;  %v961_v23 = vld [vmem:[#allocation6 + $0x12a8] sm:$0xff] }
 0x1d3   : > { %3829 = vmatpush1.bf16.msra.mxu0 %v3828_v29  ;;  %v824_v29 = vld [vmem:[#allocation6 + $0xe60] sm:$0xff]  ;;  %v969_v24 = vld [vmem:[#allocation6 + $0x12e8] sm:$0xff] }
 0x1d4   : > { %4021 = vmatpush1.bf16.msra.mxu1 %v4020_v50  ;;  %3831 = vmatprep.subr.bf16.mxu0 %v3830_v51  ;;  %v818_v50 = vld [vmem:[#allocation6 + $0xe30] sm:$0xff]  ;;  %v4042_v51 = vpack.c.bf16 %v827_v43, %v819_v42  ;;  %v3852_v57 = vpack.c.bf16 %v824_v29, %v816_v47  ;;  %v3870_v42 = vpack.c.bf16 %v905_v37, %v897_v36  ;;  %v896_v43 = vld [vmem:[#allocation6 + $0x10a0] sm:$0xff]  ;;  %v913_v29 = vld [vmem:[#allocation6 + $0x1128] sm:$0xff] }
 0x1d5   : > { %4023 = vmatprep.subr.bf16.mxu1 %v4022_v55  ;;  %v835_v55 = vld [vmem:[#allocation6 + $0xeb8] sm:$0xff]  ;;  %v4044_v38 = vpack.c.bf16 %v826_v52, %v818_v50  ;;  %v906_v47 = vld [vmem:[#allocation6 + $0x10f0] sm:$0xff]  ;;  %v921_v50 = vld [vmem:[#allocation6 + $0x1168] sm:$0xff] }
 0x1d6   : > { %v915_v52 = vld [vmem:[#allocation6 + $0x1138] sm:$0xff]  ;;  %v977_v36 = vld [vmem:[#allocation6 + $0x1328] sm:$0xff] }
 0x1d7   : > { %3833 = vmatpush1.bf16.msra.mxu0 %v3832_v60  ;;  %v840_v60 = vld [vmem:[#allocation6 + $0xee0] sm:$0xff]  ;;  %v985_v37 = vld [vmem:[#allocation6 + $0x1368] sm:$0xff] }
 0x1d8   : > { %4025 = vmatpush1.bf16.msra.mxu1 %v4024_v61  ;;  %3835 = vmatprep.subr.bf16.mxu0 %v3834_v62  ;;  %v834_v61 = vld [vmem:[#allocation6 + $0xeb0] sm:$0xff]  ;;  %v4046_v62 = vpack.c.bf16 %v843_v56, %v835_v55  ;;  %v3856_v3 = vpack.c.bf16 %v840_v60, %v832_v59  ;;  %v3874_v56 = vpack.c.bf16 %v921_v50, %v913_v29  ;;  %v993_v29 = vld [vmem:[#allocation6 + $0x13a8] sm:$0xff] }
 0x1d9   : > { %4027 = vmatprep.subr.bf16.mxu1 %v4026_v1  ;;  %v851_v1 = vld [vmem:[#allocation6 + $0xf38] sm:$0xff]  ;;  %v4048_v4 = vpack.c.bf16 %v842_v48, %v834_v61  ;;  %v4066_v59 = vpack.c.bf16 %v923_v53, %v915_v52  ;;  %v922_v60 = vld [vmem:[#allocation6 + $0x1170] sm:$0xff]  ;;  %v929_v61 = vld [vmem:[#allocation6 + $0x11a8] sm:$0xff] }
 0x1da   : > { %v4793_v48 = vld [vmem:[#allocation2 + $0x88] sm:$0xff]  ;;  %v1003_v52 = vld [vmem:[#allocation6 + $0x13f8] sm:$0xff] }
 0x1db   : > { %3837 = vmatpush1.bf16.msra.mxu0 %v3836_v49  ;;  %v856_v49 = vld [vmem:[#allocation6 + $0xf60] sm:$0xff]  ;;  %v1001_v50 = vld [vmem:[#allocation6 + $0x13e8] sm:$0xff] }
 0x1dc   : > { %4029 = vmatpush1.bf16.msra.mxu1 %v4028_v7  ;;  %3839 = vmatprep.subr.bf16.mxu0 %v3838_v8  ;;  %v850_v7 = vld [vmem:[#allocation6 + $0xf30] sm:$0xff]  ;;  %v4050_v8 = vpack.c.bf16 %v859_v2, %v851_v1  ;;  %v3860_v14 = vpack.c.bf16 %v856_v49, %v848_v6  ;;  %v4794_v1 = vld [vmem:[#allocation2 + $0x80] sm:$0xff] }
 0x1dd   : > { %4031 = vmatprep.subr.bf16.mxu1 %v4030_v12  ;;  %v867_v12 = vld [vmem:[#allocation6 + $0xfb8] sm:$0xff]  ;;  %v4052_v15 = vpack.c.bf16 %v858_v9, %v850_v7  ;;  %v936_v6 = vld [vmem:[#allocation6 + $0x11e0] sm:$0xff]  ;;  %v930_v49 = vld [vmem:[#allocation6 + $0x11b0] sm:$0xff]  ;;  %v4070_v7 = vpack.c.bf16 %v939_v0, %v931_v63 }
 0x1de   : > { %v945_v9 = vld [vmem:[#allocation6 + $0x1228] sm:$0xff] }
 0x1df   : > { %3841 = vmatpush1.bf16.msra.mxu0 %v3840_v18  ;;  %v872_v18 = vld [vmem:[#allocation6 + $0xfe0] sm:$0xff] }
 0x1e0   : > { %4033 = vmatpush1.bf16.msra.mxu1 %v4032_v19  ;;  %3843 = vmatprep.subr.bf16.mxu0 %v3842_v21  ;;  %v866_v19 = vld [vmem:[#allocation6 + $0xfb0] sm:$0xff]  ;;  %v4054_v21 = vpack.c.bf16 %v875_v13, %v867_v12  ;;  %v3864_v27 = vpack.c.bf16 %v872_v18, %v864_v17  ;;  %v947_v12 = vld [vmem:[#allocation6 + $0x1238] sm:$0xff]  ;;  %v944_v17 = vld [vmem:[#allocation6 + $0x1220] sm:$0xff] }
 0x1e1   : > { %4035 = vmatprep.subr.bf16.mxu1 %v4034_v25  ;;  %v883_v25 = vld [vmem:[#allocation6 + $0x1038] sm:$0xff]  ;;  %v4056_v28 = vpack.c.bf16 %v874_v22, %v866_v19  ;;  %v952_v18 = vld [vmem:[#allocation6 + $0x1260] sm:$0xff]  ;;  %v946_v19 = vld [vmem:[#allocation6 + $0x1230] sm:$0xff] }
 0x1e2   : > { %v955_v13 = vld [vmem:[#allocation6 + $0x1278] sm:$0xff]  ;;  %v954_v22 = vld [vmem:[#allocation6 + $0x1270] sm:$0xff] }
 0x1e3   : > { %3845 = vmatpush1.bf16.msra.mxu0 %v3844_v32  ;;  %v888_v32 = vld [vmem:[#allocation6 + $0x1060] sm:$0xff] }
 0x1e4   : > { %4037 = vmatpush1.bf16.msra.mxu1 %v4036_v33  ;;  %3847 = vmatprep.subr.bf16.mxu0 %v3846_v34  ;;  %v882_v33 = vld [vmem:[#allocation6 + $0x1030] sm:$0xff]  ;;  %v4058_v34 = vpack.c.bf16 %v891_v26, %v883_v25  ;;  %v3868_v41 = vpack.c.bf16 %v888_v32, %v880_v31  ;;  %v963_v25 = vld [vmem:[#allocation6 + $0x12b8] sm:$0xff]  ;;  %v960_v31 = vld [vmem:[#allocation6 + $0x12a0] sm:$0xff] }
 0x1e5   : > { %4039 = vmatprep.subr.bf16.mxu1 %v4038_v39  ;;  %v899_v39 = vld [vmem:[#allocation6 + $0x10b8] sm:$0xff]  ;;  %v4060_v20 = vpack.c.bf16 %v890_v35, %v882_v33  ;;  %v968_v32 = vld [vmem:[#allocation6 + $0x12e0] sm:$0xff]  ;;  %v962_v33 = vld [vmem:[#allocation6 + $0x12b0] sm:$0xff] }
 0x1e6   : > { %v971_v26 = vld [vmem:[#allocation6 + $0x12f8] sm:$0xff]  ;;  %v970_v35 = vld [vmem:[#allocation6 + $0x12f0] sm:$0xff] }
 0x1e7   : > { %3849 = vmatpush1.bf16.msra.mxu0 %v3848_v44  ;;  %v904_v44 = vld [vmem:[#allocation6 + $0x10e0] sm:$0xff] }
 0x1e8   : > { %4041 = vmatpush1.bf16.msra.mxu1 %v4040_v45  ;;  %3851 = vmatprep.subr.bf16.mxu0 %v3850_v46  ;;  %v898_v45 = vld [vmem:[#allocation6 + $0x10b0] sm:$0xff]  ;;  %v4062_v46 = vpack.c.bf16 %v907_v40, %v899_v39  ;;  %v3872_v54 = vpack.c.bf16 %v904_v44, %v896_v43  ;;  %v979_v39 = vld [vmem:[#allocation6 + $0x1338] sm:$0xff]  ;;  %v976_v43 = vld [vmem:[#allocation6 + $0x1320] sm:$0xff] }
 0x1e9   : > { %4043 = vmatprep.subr.bf16.mxu1 %v4042_v51  ;;  %v4792_v51 = vld [vmem:[#allocation2 + $0x10] sm:$0xff]  ;;  %v4064_v55 = vpack.c.bf16 %v906_v47, %v898_v45  ;;  %v987_v40 = vld [vmem:[#allocation6 + $0x1378] sm:$0xff]  ;;  %v984_v44 = vld [vmem:[#allocation6 + $0x1360] sm:$0xff] }
 0x1ea   : > { %v978_v45 = vld [vmem:[#allocation6 + $0x1330] sm:$0xff]  ;;  %v3892_v53 = vpack.c.bf16 %v984_v44, %v976_v43  ;;  %v1073_v44 = vld [vmem:[#allocation6 + $0x1628] sm:$0xff] }
 0x1eb   : > { %3853 = vmatpush1.bf16.msra.mxu0 %v3852_v57  ;;  %v912_v57 = vld [vmem:[#allocation6 + $0x1120] sm:$0xff]  ;;  %v986_v47 = vld [vmem:[#allocation6 + $0x1370] sm:$0xff] }
 0x1ec   : > { %4045 = vmatpush1.bf16.msra.mxu1 %v4044_v38  ;;  %3855 = vmatprep.subr.bf16.mxu0 %v3854_v58  ;;  %v920_v38 = vld [vmem:[#allocation6 + $0x1160] sm:$0xff]  ;;  %v914_v58 = vld [vmem:[#allocation6 + $0x1130] sm:$0xff] }
 0x1ed   : > { %4047 = vmatprep.subr.bf16.mxu1 %v4046_v62  ;;  %v937_v62 = vld [vmem:[#allocation6 + $0x11e8] sm:$0xff]  ;;  %v3876_v2 = vpack.c.bf16 %v920_v38, %v912_v57  ;;  %v1000_v57 = vld [vmem:[#allocation6 + $0x13e0] sm:$0xff]  ;;  %v994_v38 = vld [vmem:[#allocation6 + $0x13b0] sm:$0xff] }
 0x1ee   : > { %v1066_v43 = vld [vmem:[#allocation6 + $0x15f0] sm:$0xff] }
 0x1ef   : > { %3857 = vmatpush1.bf16.msra.mxu0 %v3856_v3  ;;  %v4068_v3 = vpack.c.bf16 %v922_v60, %v914_v58  ;;  %v1009_v60 = vld [vmem:[#allocation6 + $0x1428] sm:$0xff] }
 0x1f0   : > { %4049 = vmatpush1.bf16.msra.mxu1 %v4048_v4  ;;  %3859 = vmatprep.subr.bf16.mxu0 %v3858_v5  ;;  %v3878_v4 = vpack.c.bf16 %v937_v62, %v929_v61  ;;  %v928_v5 = vld [vmem:[#allocation6 + $0x11a0] sm:$0xff]  ;;  %v1017_v61 = vld [vmem:[#allocation6 + $0x1468] sm:$0xff]  ;;  %v1011_v62 = vld [vmem:[#allocation6 + $0x1438] sm:$0xff] }
 0x1f1   : > { %4051 = vmatprep.subr.bf16.mxu1 %v4050_v8  ;;  %v938_v8 = vld [vmem:[#allocation6 + $0x11f0] sm:$0xff] }
 0x1f3   : > { %3861 = vmatpush1.bf16.msra.mxu0 %v3860_v14  ;;  %v3880_v14 = vpack.c.bf16 %v936_v6, %v928_v5  ;;  %v1018_v6 = vld [vmem:[#allocation6 + $0x1470] sm:$0xff] }
 0x1f4   : > { %4053 = vmatpush1.bf16.msra.mxu1 %v4052_v15  ;;  %3863 = vmatprep.subr.bf16.mxu0 %v3862_v16  ;;  %v4072_v15 = vpack.c.bf16 %v938_v8, %v930_v49  ;;  %v3882_v16 = vpack.c.bf16 %v953_v10, %v945_v9  ;;  %v1025_v49 = vld [vmem:[#allocation6 + $0x14a8] sm:$0xff]  ;;  %v1027_v8 = vld [vmem:[#allocation6 + $0x14b8] sm:$0xff] }
 0x1f5   : > { %4055 = vmatprep.subr.bf16.mxu1 %v4054_v21  ;;  %v4074_v21 = vpack.c.bf16 %v955_v13, %v947_v12  ;;  %v1035_v9 = vld [vmem:[#allocation6 + $0x14f8] sm:$0xff]  ;;  %v1024_v13 = vld [vmem:[#allocation6 + $0x14a0] sm:$0xff] }
 0x1f7   : > { %3865 = vmatpush1.bf16.msra.mxu0 %v3864_v27  ;;  %v3884_v27 = vpack.c.bf16 %v952_v18, %v944_v17  ;;  %v1034_v17 = vld [vmem:[#allocation6 + $0x14f0] sm:$0xff]  ;;  %v1041_v18 = vld [vmem:[#allocation6 + $0x1528] sm:$0xff] }
 0x1f8   : > { %4057 = vmatpush1.bf16.msra.mxu1 %v4056_v28  ;;  %3867 = vmatprep.subr.bf16.mxu0 %v3866_v30  ;;  %v4076_v28 = vpack.c.bf16 %v954_v22, %v946_v19  ;;  %v3886_v30 = vpack.c.bf16 %v969_v24, %v961_v23  ;;  %v1049_v19 = vld [vmem:[#allocation6 + $0x1568] sm:$0xff]  ;;  %v1051_v22 = vld [vmem:[#allocation6 + $0x1578] sm:$0xff] }
 0x1f9   : > { %4059 = vmatprep.subr.bf16.mxu1 %v4058_v34  ;;  %v4078_v34 = vpack.c.bf16 %v971_v26, %v963_v25  ;;  %v3906_v25 = vpack.c.bf16 %v1049_v19, %v1041_v18  ;;  %v1040_v26 = vld [vmem:[#allocation6 + $0x1520] sm:$0xff] }
 0x1fa   : > { %1778 = vmatmul.mubr.f32.vlgmr.msra.gmra.mrb[4].mxu0 %v4792_v51 }
 0x1fb   : > { %3869 = vmatpush1.bf16.msra.mxu0 %v3868_v41  ;;  %2009 = vmatmul.mubr.f32.vlgmr.msra.gmra.mrb[4].mxu1 %v4792_v51  ;;  %v3888_v41 = vpack.c.bf16 %v968_v32, %v960_v31  ;;  %v995_v51 = vld [vmem:[#allocation6 + $0x13b8] sm:$0xff]  ;;  %v1050_v31 = vld [vmem:[#allocation6 + $0x1570] sm:$0xff]  ;;  %v1057_v32 = vld [vmem:[#allocation6 + $0x15a8] sm:$0xff] }
 0x1fc   : > { %4061 = vmatpush1.bf16.msra.mxu1 %v4060_v20  ;;  %3871 = vmatprep.subr.bf16.mxu0 %v3870_v42  ;;  %v4080_v20 = vpack.c.bf16 %v970_v35, %v962_v33  ;;  %v3890_v42 = vpack.c.bf16 %v985_v37, %v977_v36  ;;  %v4086_v58 = vpack.c.bf16 %v1003_v52, %v995_v51  ;;  %v1065_v33 = vld [vmem:[#allocation6 + $0x15e8] sm:$0xff]  ;;  %v1067_v35 = vld [vmem:[#allocation6 + $0x15f8] sm:$0xff]  ;;  %v1072_v52 = vld [vmem:[#allocation6 + $0x1620] sm:$0xff] }
 0x1fd   : > { %4063 = vmatprep.subr.bf16.mxu1 %v4062_v46  ;;  %1783 = vmatprep.mubr.f32.mxu0 %v4793_v48  ;;  %v4082_v46 = vpack.c.bf16 %v987_v40, %v979_v39  ;;  %v3910_v39 = vpack.c.bf16 %v1065_v33, %v1057_v32  ;;  %v1056_v40 = vld [vmem:[#allocation6 + $0x15a0] sm:$0xff]  ;;  %v4798_v32 = vld [vmem:[#allocation2 + $0x90] sm:$0xff]  ;;  %v1134_v33 = vlaneseq }
 0x1fe   : > { %2014 = vmatprep.mubr.f32.mxu1 %v4793_v48  ;;  %1784 = vmatmul.mubr.f32.gmra.mrb[6].mxu0 %v4794_v1  ;;  %v1019_v48 = vld [vmem:[#allocation6 + $0x1478] sm:$0xff] }
 0x1ff   : > { %3873 = vmatpush1.bf16.msra.mxu0 %v3872_v54  ;;  %2015 = vmatmul.mubr.f32.gmra.mrb[6].mxu1 %v4794_v1  ;;  %v4084_v54 = vpack.c.bf16 %v986_v47, %v978_v45  ;;  %v3898_v1 = vpack.c.bf16 %v1017_v61, %v1009_v60  ;;  %v4090_v5 = vpack.c.bf16 %v1019_v48, %v1011_v62  ;;  %v1081_v45 = vld [vmem:[#allocation6 + $0x1668] sm:$0xff]  ;;  %v1083_v47 = vld [vmem:[#allocation6 + $0x1678] sm:$0xff]  ;;  %v1088_v48 = vld [vmem:[#allocation6 + $0x16a0] sm:$0xff] }
 0x200   : > { %4065 = vmatpush1.bf16.msra.mxu1 %v4064_v55  ;;  %3875 = vmatprep.subr.bf16.mxu0 %v3874_v56  ;;  %v3894_v55 = vpack.c.bf16 %v1001_v50, %v993_v29  ;;  %v992_v56 = vld [vmem:[#allocation6 + $0x13a0] sm:$0xff]  ;;  %v3914_v51 = vpack.c.bf16 %v1081_v45, %v1073_v44 }
 0x201   : > { %4067 = vmatprep.subr.bf16.mxu1 %v4066_v59  ;;  %1854 = vmatprep.mubr.f32.mxu0 %v4795_v11  ;;  %v1002_v59 = vld [vmem:[#allocation6 + $0x13f0] sm:$0xff]  ;;  %v3896_v63 = vpack.c.bf16 %v1000_v57, %v992_v56  ;;  %v1089_v57 = vld [vmem:[#allocation6 + $0x16a8] sm:$0xff] }
 0x202   : > { %2085 = vmatprep.mubr.f32.mxu1 %v4795_v11  ;;  %v4088_v0 = vpack.c.bf16 %v1002_v59, %v994_v38  ;;  %v1082_v56 = vld [vmem:[#allocation6 + $0x1670] sm:$0xff]  ;;  %v1097_v38 = vld [vmem:[#allocation6 + $0x16e8] sm:$0xff]  ;;  %v1099_v59 = vld [vmem:[#allocation6 + $0x16f8] sm:$0xff] }
 0x203   : > { %3877 = vmatpush1.bf16.msra.mxu0 %v3876_v2  ;;  %v1008_v2 = vld [vmem:[#allocation6 + $0x1420] sm:$0xff]  ;;  %v3918_v62 = vpack.c.bf16 %v1097_v38, %v1089_v57 }
 0x204   : > { %4069 = vmatpush1.bf16.msra.mxu1 %v4068_v3  ;;  %3879 = vmatprep.subr.bf16.mxu0 %v3878_v4  ;;  %v1016_v3 = vld [vmem:[#allocation6 + $0x1460] sm:$0xff]  ;;  %v1010_v4 = vld [vmem:[#allocation6 + $0x1430] sm:$0xff] }
 0x205   : > { %4071 = vmatprep.subr.bf16.mxu1 %v4070_v7  ;;  %v1033_v7 = vld [vmem:[#allocation6 + $0x14e8] sm:$0xff]  ;;  %v3900_v10 = vpack.c.bf16 %v1016_v3, %v1008_v2  ;;  %v4092_v11 = vpack.c.bf16 %v1018_v6, %v1010_v4  ;;  %v1098_v2 = vld [vmem:[#allocation6 + $0x16f0] sm:$0xff]  ;;  %v1115_v6 = vld [vmem:[#allocation6 + $0x1778] sm:$0xff] }
 0x206   : > { %v3902_v12 = vpack.c.bf16 %v1033_v7, %v1025_v49  ;;  %v1105_v3 = vld [vmem:[#allocation6 + $0x1728] sm:$0xff] }
 0x207   : > { %3881 = vmatpush1.bf16.msra.mxu0 %v3880_v14  ;;  %v1032_v14 = vld [vmem:[#allocation6 + $0x14e0] sm:$0xff]  ;;  %v1113_v4 = vld [vmem:[#allocation6 + $0x1768] sm:$0xff] }
 0x208   : > { %4073 = vmatpush1.bf16.msra.mxu1 %v4072_v15  ;;  %3883 = vmatprep.subr.bf16.mxu0 %v3882_v16  ;;  %v1026_v15 = vld [vmem:[#allocation6 + $0x14b0] sm:$0xff]  ;;  %v4094_v16 = vpack.c.bf16 %v1035_v9, %v1027_v8  ;;  %v3904_v23 = vpack.c.bf16 %v1032_v14, %v1024_v13  ;;  %v3922_v8 = vpack.c.bf16 %v1113_v4, %v1105_v3  ;;  %v1104_v9 = vld [vmem:[#allocation6 + $0x1720] sm:$0xff]  ;;  %v1121_v14 = vld [vmem:[#allocation6 + $0x17a8] sm:$0xff] }
 0x209   : > { %4075 = vmatprep.subr.bf16.mxu1 %v4074_v21  ;;  %v1043_v21 = vld [vmem:[#allocation6 + $0x1538] sm:$0xff]  ;;  %v4096_v24 = vpack.c.bf16 %v1034_v17, %v1026_v15  ;;  %v1114_v13 = vld [vmem:[#allocation6 + $0x1770] sm:$0xff]  ;;  %v1129_v15 = vld [vmem:[#allocation6 + $0x17e8] sm:$0xff] }
 0x20a   : > { %v1131_v17 = vld [vmem:[#allocation6 + $0x17f8] sm:$0xff] }
 0x20b   : > { %3885 = vmatpush1.bf16.msra.mxu0 %v3884_v27  ;;  %v1048_v27 = vld [vmem:[#allocation6 + $0x1560] sm:$0xff] }
 0x20c   : > { %4077 = vmatpush1.bf16.msra.mxu1 %v4076_v28  ;;  %3887 = vmatprep.subr.bf16.mxu0 %v3886_v30  ;;  %v1042_v28 = vld [vmem:[#allocation6 + $0x1530] sm:$0xff]  ;;  %v4098_v30 = vpack.c.bf16 %v1051_v22, %v1043_v21  ;;  %v3908_v36 = vpack.c.bf16 %v1048_v27, %v1040_v26  ;;  %v3926_v21 = vpack.c.bf16 %v1129_v15, %v1121_v14  ;;  %v1120_v22 = vld [vmem:[#allocation6 + $0x17a0] sm:$0xff] }
 0x20d   : > { %4079 = vmatprep.subr.bf16.mxu1 %v4078_v34  ;;  %v1059_v34 = vld [vmem:[#allocation6 + $0x15b8] sm:$0xff]  ;;  %v4100_v37 = vpack.c.bf16 %v1050_v31, %v1042_v28  ;;  %v1130_v26 = vld [vmem:[#allocation6 + $0x17f0] sm:$0xff] }
 0x20e   : > { %v4797_v31 = vld [vmem:[#allocation2 + $0x98] sm:$0xff] }
 0x20f   : > { %3889 = vmatpush1.bf16.msra.mxu0 %v3888_v41  ;;  %v1064_v41 = vld [vmem:[#allocation6 + $0x15e0] sm:$0xff] }
 0x210   : > { %4081 = vmatpush1.bf16.msra.mxu1 %v4080_v20  ;;  %3891 = vmatprep.subr.bf16.mxu0 %v3890_v42  ;;  %v1058_v20 = vld [vmem:[#allocation6 + $0x15b0] sm:$0xff]  ;;  %v4102_v42 = vpack.c.bf16 %v1067_v35, %v1059_v34  ;;  %v3912_v29 = vpack.c.bf16 %v1064_v41, %v1056_v40  ;;  %v1135_v34 = vshrl.u32 %v1134_v33, 7 }
 0x211   : > { %4083 = vmatprep.subr.bf16.mxu1 %v4082_v46  ;;  %v1075_v46 = vld [vmem:[#allocation6 + $0x1638] sm:$0xff]  ;;  %v4104_v50 = vpack.c.bf16 %v1066_v43, %v1058_v20 }
 0x212   : > { %v1136_v35 = vsub.s32 0, %v1135_v34  ;;  %v1148_v40 = vsub.s32 3, %v1135_v34  ;;  %v1152_v3 = vsub.s32 4, %v1135_v34  ;;  %v1160_v4 = vsub.s32 6, %v1135_v34 }
 0x213   : > { %3893 = vmatpush1.bf16.msra.mxu0 %v3892_v53  ;;  %v1080_v53 = vld [vmem:[#allocation6 + $0x1660] sm:$0xff] }
 0x214   : > { %4085 = vmatpush1.bf16.msra.mxu1 %v4084_v54  ;;  %3895 = vmatprep.subr.bf16.mxu0 %v3894_v55  ;;  %v1074_v54 = vld [vmem:[#allocation6 + $0x1630] sm:$0xff]  ;;  %v4106_v55 = vpack.c.bf16 %v1083_v47, %v1075_v46  ;;  %v3916_v60 = vpack.c.bf16 %v1080_v53, %v1072_v52 }
 0x215   : > { %4087 = vmatprep.subr.bf16.mxu1 %v4086_v58  ;;  %v1091_v58 = vld [vmem:[#allocation6 + $0x16b8] sm:$0xff]  ;;  %v4108_v61 = vpack.c.bf16 %v1082_v56, %v1074_v54 }
 0x217   : > { %3897 = vmatpush1.bf16.msra.mxu0 %v3896_v63  ;;  %v1096_v63 = vld [vmem:[#allocation6 + $0x16e0] sm:$0xff] }
 0x218   : > { %4089 = vmatpush1.bf16.msra.mxu1 %v4088_v0  ;;  %3899 = vmatprep.subr.bf16.mxu0 %v3898_v1  ;;  %v1090_v0 = vld [vmem:[#allocation6 + $0x16b0] sm:$0xff]  ;;  %v4110_v1 = vpack.c.bf16 %v1099_v59, %v1091_v58  ;;  %v3920_v49 = vpack.c.bf16 %v1096_v63, %v1088_v48 }
 0x219   : > { %4091 = vmatprep.subr.bf16.mxu1 %v4090_v5  ;;  %v1107_v5 = vld [vmem:[#allocation6 + $0x1738] sm:$0xff]  ;;  %v4112_v7 = vpack.c.bf16 %v1098_v2, %v1090_v0 }
 0x21b   : > { %3901 = vmatpush1.bf16.msra.mxu0 %v3900_v10  ;;  %v1112_v10 = vld [vmem:[#allocation6 + $0x1760] sm:$0xff] }
 0x21c   : > { %4093 = vmatpush1.bf16.msra.mxu1 %v4092_v11  ;;  %3903 = vmatprep.subr.bf16.mxu0 %v3902_v12  ;;  %v1106_v11 = vld [vmem:[#allocation6 + $0x1730] sm:$0xff]  ;;  %v4114_v12 = vpack.c.bf16 %v1115_v6, %v1107_v5  ;;  %v3924_v18 = vpack.c.bf16 %v1112_v10, %v1104_v9  ;;  %v1156_v5 = vsub.s32 5, %v1135_v34  ;;  %v1164_v6 = vsub.s32 7, %v1135_v34 }
 0x21d   : > { %4095 = vmatprep.subr.bf16.mxu1 %v4094_v16  ;;  %v1123_v16 = vld [vmem:[#allocation6 + $0x17b8] sm:$0xff]  ;;  %v4116_v19 = vpack.c.bf16 %v1114_v13, %v1106_v11 }
 0x21f   : > { %3905 = vmatpush1.bf16.msra.mxu0 %v3904_v23  ;;  %v1128_v23 = vld [vmem:[#allocation6 + $0x17e0] sm:$0xff] }
 0x220   : > { %4097 = vmatpush1.bf16.msra.mxu1 %v4096_v24  ;;  %3907 = vmatprep.subr.bf16.mxu0 %v3906_v25  ;;  %v4118_v24 = vpack.c.bf16 %v1131_v17, %v1123_v16  ;;  %v1122_v25 = vld [vmem:[#allocation6 + $0x17b0] sm:$0xff]  ;;  %v3928_v27 = vpack.c.bf16 %v1128_v23, %v1120_v22 }
 0x221   : > { %4099 = vmatprep.subr.bf16.mxu1 %v4098_v30  ;;  %v4120_v28 = vpack.c.bf16 %v1130_v26, %v1122_v25  ;;  %v4796_v30 = vld [vmem:[#allocation2 + $0x20] sm:$0xff] }
 0x223   : > { %3909 = vmatpush1.bf16.msra.mxu0 %v3908_v36  ;;  %v1132_v36 = vld [vmem:[#allocation8] sm:$0xff] }
 0x224   : > { %4101 = vmatpush1.bf16.msra.mxu1 %v4100_v37  ;;  %3911 = vmatprep.subr.bf16.mxu0 %v3910_v39  ;;  %v1144_v37 = vsub.s32 2, %v1135_v34  ;;  %v1140_v39 = vsub.s32 1, %v1135_v34  ;;  %v1137_v41 = vrot.slane %v1132_v36, %v1136_v35  ;;  %v1149_v43 = vrot.slane %v1132_v36, %v1148_v40 }
 0x225   : > { %4103 = vmatprep.subr.bf16.mxu1 %v4102_v42  ;;  %v1165_v9 = vrot.slane %v1132_v36, %v1164_v6 }
 0x226   : > { %v1145_v20 = vrot.slane %v1132_v36, %v1144_v37  ;;  %v1141_v42 = vrot.slane %v1132_v36, %v1140_v39 }
 0x227   : > { %3913 = vmatpush1.bf16.msra.mxu0 %v3912_v29 }
 0x228   : > { %4105 = vmatpush1.bf16.msra.mxu1 %v4104_v50  ;;  %3915 = vmatprep.subr.bf16.mxu0 %v3914_v51 }
 0x229   : > { %4107 = vmatprep.subr.bf16.mxu1 %v4106_v55 }
 0x22b   : > { %3917 = vmatpush1.bf16.msra.mxu0 %v3916_v60 }
 0x22c   : > { %4109 = vmatpush1.bf16.msra.mxu1 %v4108_v61  ;;  %3919 = vmatprep.subr.bf16.mxu0 %v3918_v62 }
 0x22d   : > { %4111 = vmatprep.subr.bf16.mxu1 %v4110_v1 }
 0x22f   : > { %3921 = vmatpush1.bf16.msra.mxu0 %v3920_v49  ;;  %v1153_v49 = vrot.slane %v1132_v36, %v1152_v3 }
 0x230   : > { %4113 = vmatpush1.bf16.msra.mxu1 %v4112_v7  ;;  %3923 = vmatprep.subr.bf16.mxu0 %v3922_v8  ;;  %v1161_v7 = vrot.slane %v1132_v36, %v1160_v4  ;;  %v1157_v8 = vrot.slane %v1132_v36, %v1156_v5 }
 0x231   : > { %4115 = vmatprep.subr.bf16.mxu1 %v4114_v12 }
 0x233   : > { %3925 = vmatpush1.bf16.msra.mxu0 %v3924_v18 }
 0x234   : > { %4117 = vmatpush1.bf16.msra.mxu1 %v4116_v19  ;;  %3927 = vmatprep.subr.bf16.mxu0 %v3926_v21 }
 0x235   : > { %4119 = vmatprep.subr.bf16.mxu1 %v4118_v24 }
 0x237   : > { %3929 = vmatpush1.bf16.msra.mxu0 %v3928_v27 }
 0x238   : > { %4121 = vmatpush1.bf16.msra.mxu1 %v4120_v28 }
 0x23a   : > { %1855 = vmatmul.mubr.f32.vlgmr.msra.gmra.mrb[4].mxu0 %v4796_v30 }
 0x23b   : > { %2086 = vmatmul.mubr.f32.vlgmr.msra.gmra.mrb[4].mxu1 %v4796_v30  ;;  %1860 = vmatprep.mubr.f32.mxu0 %v4797_v31 }
 0x23c   : > { %2091 = vmatprep.mubr.f32.mxu1 %v4797_v31 }
 0x23e   : > { %1861 = vmatmul.mubr.f32.gmra.mrb[6].mxu0 %v4798_v32 }
 0x23f   : > { %2092 = vmatmul.mubr.f32.gmra.mrb[6].mxu1 %v4798_v32 }
 0x24d   : > { %v1394_v44 = vpop.f32.mrb[0].mxu0 }
 0x24e   : > { %v4570_v45 = vadd.f32 %v1394_v44, %v1137_v41  ;;  %v1625_v46 = vpop.f32.mrb[0].mxu1  ;;  %v1396_v47 = vpop.f32.mrb[1].mxu0 }
 0x24f   : > { %v4574_v29 = vadd.f32 %v1625_v46, %v1145_v20  ;;  %v4571_v50 = vadd.f32 %v1396_v47, %v1141_v42  ;;  %v1627_v51 = vpop.f32.mrb[1].mxu1 }
 0x250   : > { %v2098_v52 = vmax.f32 %v4570_v45, 0.0  ;;  %v4575_v53 = vadd.f32 %v1627_v51, %v1149_v43 }
 0x251   : > { %v2100_v54 = vmax.f32 %v4574_v29, 0.0  ;;  %v2099_v55 = vmax.f32 %v4571_v50, 0.0  ;;  %v1400_v56 = vpop.f32.mrb[2].mxu0 }
 0x252   : > { %2126 = vst [vmem:[#allocation2 + $0x30] sm:$0xff] %v2098_v52  ;;  %v2101_v57 = vmax.f32 %v4575_v53, 0.0  ;;  %v4572_v38 = vadd.f32 %v1400_v56, %v1137_v41  ;;  %v1631_v58 = vpop.f32.mrb[2].mxu1  ;;  %v1402_v59 = vpop.f32.mrb[3].mxu0 }
 0x253   : > { %2128 = vst [vmem:[#allocation2 + $0x40] sm:$0xff] %v2100_v54  ;;  %2127 = vst [vmem:[#allocation2 + $0x38] sm:$0xff] %v2099_v55  ;;  %v4576_v60 = vadd.f32 %v1631_v58, %v1145_v20  ;;  %v4573_v61 = vadd.f32 %v1402_v59, %v1141_v42  ;;  %v1633_v62 = vpop.f32.mrb[3].mxu1 }
 0x254   : > { %2129 = vst [vmem:[#allocation2 + $0x48] sm:$0xff] %v2101_v57  ;;  %v2106_v48 = vmax.f32 %v4572_v38, 0.0  ;;  %v4577_v63 = vadd.f32 %v1633_v62, %v1149_v43 }
 0x255   : > { %v2108_v0 = vmax.f32 %v4576_v60, 0.0  ;;  %v2107_v1 = vmax.f32 %v4573_v61, 0.0 }
 0x256   : > { %2134 = vst [vmem:[#allocation2 + $0xa0] sm:$0xff] %v2106_v48  ;;  %v2109_v2 = vmax.f32 %v4577_v63, 0.0 }
 0x257   : > { %2136 = vst [vmem:[#allocation2 + $0xb0] sm:$0xff] %v2108_v0  ;;  %2135 = vst [vmem:[#allocation2 + $0xa8] sm:$0xff] %v2107_v1 }
 0x258   : > { %2137 = vst [vmem:[#allocation2 + $0xb8] sm:$0xff] %v2109_v2 }
 0x30d   : > { %v1856_v10 = vpop.f32.mrb[4].mxu0 }
 0x30e   : > { %v4578_v11 = vadd.f32 %v1856_v10, %v1153_v49  ;;  %v2087_v12 = vpop.f32.mrb[4].mxu1  ;;  %v1858_v13 = vpop.f32.mrb[5].mxu0 }
 0x30f   : > { %v4582_v14 = vadd.f32 %v2087_v12, %v1161_v7  ;;  %v4579_v15 = vadd.f32 %v1858_v13, %v1157_v8  ;;  %v2089_v16 = vpop.f32.mrb[5].mxu1 }
 0x310   : > { %v2102_v17 = vmax.f32 %v4578_v11, 0.0  ;;  %v4583_v18 = vadd.f32 %v2089_v16, %v1165_v9 }
 0x311   : > { %v2104_v19 = vmax.f32 %v4582_v14, 0.0  ;;  %v2103_v21 = vmax.f32 %v4579_v15, 0.0  ;;  %v1862_v22 = vpop.f32.mrb[6].mxu0 }
 0x312   : > { %2130 = vst [vmem:[#allocation2 + $0x50] sm:$0xff] %v2102_v17  ;;  %v2105_v23 = vmax.f32 %v4583_v18, 0.0  ;;  %v4580_v24 = vadd.f32 %v1862_v22, %v1153_v49  ;;  %v2093_v25 = vpop.f32.mrb[6].mxu1  ;;  %v1864_v26 = vpop.f32.mrb[7].mxu0 }
 0x313   : > { %2132 = vst [vmem:[#allocation2 + $0x60] sm:$0xff] %v2104_v19  ;;  %2131 = vst [vmem:[#allocation2 + $0x58] sm:$0xff] %v2103_v21  ;;  %v4584_v27 = vadd.f32 %v2093_v25, %v1161_v7  ;;  %v4581_v28 = vadd.f32 %v1864_v26, %v1157_v8  ;;  %v2095_v30 = vpop.f32.mrb[7].mxu1 }
 0x314   : > { %2133 = vst [vmem:[#allocation2 + $0x68] sm:$0xff] %v2105_v23  ;;  %v2110_v31 = vmax.f32 %v4580_v24, 0.0  ;;  %v4585_v32 = vadd.f32 %v2095_v30, %v1165_v9 }
 0x315   : > { %v2112_v33 = vmax.f32 %v4584_v27, 0.0  ;;  %v2111_v34 = vmax.f32 %v4581_v28, 0.0 }
 0x316   : > { %2138 = vst [vmem:[#allocation2 + $0xc0] sm:$0xff] %v2110_v31  ;;  %v2113_v35 = vmax.f32 %v4585_v32, 0.0 }
 0x317   : > { %2140 = vst [vmem:[#allocation2 + $0xd0] sm:$0xff] %v2112_v33  ;;  %2139 = vst [vmem:[#allocation2 + $0xc8] sm:$0xff] %v2111_v34 }
 0x318   : > { %2141 = vst [vmem:[#allocation2 + $0xd8] sm:$0xff] %v2113_v35 }
 0x319 PF: > { %v2171_v36 = vld [vmem:[%s5323_s15 + $0x8] sm:$0xff]  ;;  %v2173_v37 = vld [vmem:[%s5323_s15 + $0x18] sm:$0xff]  ;;  %v2170_v20 = vld [vmem:[%s5323_s15] sm:$0xff]  ;;  %s3353_s24 = sshll.u32 %s5025_s21, 8  ;;  %s3190_s28 = sshll.u32 %s5333_s3, 4  ;;  %s5817_s28 = int_to_ptr.vmem [resolvable:$true] %s3190_s28 }
 0x31a   : > { %v2363_v39 = vld [vmem:[%s5323_s15 + $0x608] sm:$0xff]  ;;  %v4122_v40 = vpack.c.bf16 %v2173_v37, %v2171_v36  ;;  %v2365_v41 = vld [vmem:[%s5323_s15 + $0x618] sm:$0xff]  ;;  %v2172_v42 = vld [vmem:[%s5323_s15 + $0x10] sm:$0xff]  ;;  %s5922_s25 = sld [smem:[#allocation18_spill]]  ;;  %s5923_s9 = sld [smem:[#allocation24_spill]] }
 0x31b   : > { %v4314_v43 = vpack.c.bf16 %v2365_v41, %v2363_v39  ;;  %v4124_v44 = vpack.c.bf16 %v2172_v42, %v2170_v20  ;;  %v2362_v45 = vld [vmem:[%s5323_s15 + $0x600] sm:$0xff]  ;;  %v2364_v46 = vld [vmem:[%s5323_s15 + $0x610] sm:$0xff]  ;;  %v2175_v47 = vld [vmem:[%s5323_s15 + $0x28] sm:$0xff]  ;;  %s3174_s21 = scalar_lea.sflag [#allocation5], %s5320_s17  ;;  %s4943_s26 = scalar_lea.vmem %s5817_s28, 512 }
 0x31c   : > { %4123 = vmatprep.subr.bf16.mxu1 %v4122_v40  ;;  %v4316_v29 = vpack.c.bf16 %v2364_v46, %v2362_v45  ;;  %v2177_v50 = vld [vmem:[%s5323_s15 + $0x38] sm:$0xff]  ;;  %v2367_v51 = vld [vmem:[%s5323_s15 + $0x628] sm:$0xff]  ;;  %v2174_v55 = vld [vmem:[%s5323_s15 + $0x20] sm:$0xff]  ;;  %p4944_p11 = scmp.ne.s32.totalorder %s5817_s28, %s4943_s26  ;;  %s5046_s12 = smov [#allocation12]  }
 0x31d   : > { %v2369_v52 = vld [vmem:[%s5323_s15 + $0x638] sm:$0xff]  ;;  %4315 = vmatprep.subr.bf16.mxu0 %v4314_v43  ;;  %4125 = vmatpush1.bf16.msra.mxu1 %v4124_v44  ;;  %v4126_v53 = vpack.c.bf16 %v2177_v50, %v2175_v47  ;;  %v2176_v56 = vld [vmem:[%s5323_s15 + $0x30] sm:$0xff]  ;;  %v2366_v57 = vld [vmem:[%s5323_s15 + $0x620] sm:$0xff]  ;;  %s4947_s5 = sshll.u32 %s5046_s12, 4  ;;  %s4948_s5 = int_to_ptr.vmem [resolvable:$false] %s4947_s5 }
 0x31e   : > { %v4318_v54 = vpack.c.bf16 %v2369_v52, %v2367_v51  ;;  %4317 = vmatpush1.bf16.msra.mxu0 %v4316_v29  ;;  %v4128_v38 = vpack.c.bf16 %v2176_v56, %v2174_v55  ;;  %v2368_v58 = vld [vmem:[%s5323_s15 + $0x630] sm:$0xff]  ;;  %v2179_v59 = vld [vmem:[%s5323_s15 + $0x48] sm:$0xff]  ;;  %v2181_v60 = vld [vmem:[%s5323_s15 + $0x58] sm:$0xff]  ;;  %s4949_s16 = scalar_lea.vmem %s4948_s5, 1024  ;;  %p4950_p12 = scmp.lt.s32.totalorder %s5817_s28, %s4948_s5 }
 0x31f   : > { %4127 = vmatprep.subr.bf16.mxu1 %v4126_v53  ;;  %v4320_v61 = vpack.c.bf16 %v2368_v58, %v2366_v57  ;;  %v4130_v62 = vpack.c.bf16 %v2181_v60, %v2179_v59  ;;  %v2371_v48 = vld [vmem:[%s5323_s15 + $0x648] sm:$0xff]  ;;  %v2373_v63 = vld [vmem:[%s5323_s15 + $0x658] sm:$0xff]  ;;  %v2178_v0 = vld [vmem:[%s5323_s15 + $0x40] sm:$0xff]  ;;  %p4951_p1 = scmp.lt.s32.totalorder %s4949_s16, %s4943_s26 }
 0x320   : > { %4319 = vmatprep.subr.bf16.mxu0 %v4318_v54  ;;  %v4322_v1 = vpack.c.bf16 %v2373_v63, %v2371_v48  ;;  %v2180_v2 = vld [vmem:[%s5323_s15 + $0x50] sm:$0xff]  ;;  %v2370_v3 = vld [vmem:[%s5323_s15 + $0x640] sm:$0xff]  ;;  %v2183_v6 = vld [vmem:[%s5323_s15 + $0x68] sm:$0xff]  ;;  %s5815_s27 = scalar_lea.hbm %s5923_s9, %s3353_s24  ;;  %p5924_p13 = scmp.ne.s32.totalorder %s5922_s25, 0 }
 0x321   : > { %v2372_v4 = vld [vmem:[%s5323_s15 + $0x650] sm:$0xff]  ;;  %4129 = vmatpush1.bf16.msra.mxu1 %v4128_v38  ;;  %v4132_v5 = vpack.c.bf16 %v2180_v2, %v2178_v0  ;;  %v2185_v49 = vld [vmem:[%s5323_s15 + $0x78] sm:$0xff]  ;;  %v2375_v7 = vld [vmem:[%s5323_s15 + $0x668] sm:$0xff]  ;;  %p4952_p6 = por %p4951_p1, %p4950_p12 }
 0x322   : > { %4321 = vmatpush1.bf16.msra.mxu0 %v4320_v61  ;;  %4131 = vmatprep.subr.bf16.mxu1 %v4130_v62  ;;  %v4324_v8 = vpack.c.bf16 %v2372_v4, %v2370_v3  ;;  %v4134_v9 = vpack.c.bf16 %v2185_v49, %v2183_v6  ;;  %v2377_v10 = vld [vmem:[%s5323_s15 + $0x678] sm:$0xff]  ;;  %v2182_v11 = vld [vmem:[%s5323_s15 + $0x60] sm:$0xff]  ;;  %v2184_v12 = vld [vmem:[%s5323_s15 + $0x70] sm:$0xff]  ;;  %p4945_p10 = pnand %p4944_p11, %p5924_p13 }
 0x323   : > { %4323 = vmatprep.subr.bf16.mxu0 %v4322_v1  ;;  %v4326_v13 = vpack.c.bf16 %v2377_v10, %v2375_v7  ;;  %v2374_v14 = vld [vmem:[%s5323_s15 + $0x660] sm:$0xff]  ;;  %v2376_v15 = vld [vmem:[%s5323_s15 + $0x670] sm:$0xff]  ;;  %v2187_v16 = vld [vmem:[%s5323_s15 + $0x88] sm:$0xff]  ;;  %v4136_v21 = vpack.c.bf16 %v2184_v12, %v2182_v11 }
 0x324   : > { %v2189_v17 = vld [vmem:[%s5323_s15 + $0x98] sm:$0xff]  ;;  %v2379_v18 = vld [vmem:[%s5323_s15 + $0x688] sm:$0xff]  ;;  %v4328_v22 = vpack.c.bf16 %v2376_v15, %v2374_v14  ;;  %v2186_v24 = vld [vmem:[%s5323_s15 + $0x80] sm:$0xff]  ;;  %p4946_p2 = pneg %p4945_p10 }
 0x325   : > { %v2381_v19 = vld [vmem:[%s5323_s15 + $0x698] sm:$0xff]  ;;  %4133 = vmatpush1.bf16.msra.mxu1 %v4132_v5  ;;  %v4138_v23 = vpack.c.bf16 %v2189_v17, %v2187_v16  ;;  %v2188_v25 = vld [vmem:[%s5323_s15 + $0x90] sm:$0xff]  ;;  %v2378_v26 = vld [vmem:[%s5323_s15 + $0x680] sm:$0xff] }
 0x326   : > { %4325 = vmatpush1.bf16.msra.mxu0 %v4324_v8  ;;  %4135 = vmatprep.subr.bf16.mxu1 %v4134_v9  ;;  %v4330_v27 = vpack.c.bf16 %v2381_v19, %v2379_v18  ;;  %v2380_v28 = vld [vmem:[%s5323_s15 + $0x690] sm:$0xff]  ;;  %v2191_v30 = vld [vmem:[%s5323_s15 + $0xa8] sm:$0xff]  ;;  %v2193_v31 = vld [vmem:[%s5323_s15 + $0xb8] sm:$0xff]  ;;  %v4140_v34 = vpack.c.bf16 %v2188_v25, %v2186_v24  ;;  %p4953_p0 = pnand %p4952_p6, %p4946_p2 }
 0x327   : > { %4327 = vmatprep.subr.bf16.mxu0 %v4326_v13  ;;  %v2383_v32 = vld [vmem:[%s5323_s15 + $0x6a8] sm:$0xff]  ;;  %v2385_v33 = vld [vmem:[%s5323_s15 + $0x6b8] sm:$0xff]  ;;  %v4332_v35 = vpack.c.bf16 %v2380_v28, %v2378_v26  ;;  %v4142_v36 = vpack.c.bf16 %v2193_v31, %v2191_v30  ;;  %v2190_v37 = vld [vmem:[%s5323_s15 + $0xa0] sm:$0xff] }
 0x328   : > { %v2192_v39 = vld [vmem:[%s5323_s15 + $0xb0] sm:$0xff]  ;;  %v2382_v40 = vld [vmem:[%s5323_s15 + $0x6a0] sm:$0xff]  ;;  %v4334_v41 = vpack.c.bf16 %v2385_v33, %v2383_v32  ;;  %v2195_v42 = vld [vmem:[%s5323_s15 + $0xc8] sm:$0xff] }
 0x329   : > { %4137 = vmatpush1.bf16.msra.mxu1 %v4136_v21  ;;  %v2384_v20 = vld [vmem:[%s5323_s15 + $0x6b0] sm:$0xff]  ;;  %v2197_v43 = vld [vmem:[%s5323_s15 + $0xd8] sm:$0xff]  ;;  %v2387_v44 = vld [vmem:[%s5323_s15 + $0x6c8] sm:$0xff]  ;;  %v4144_v46 = vpack.c.bf16 %v2192_v39, %v2190_v37 }
 0x32a   : > { %4329 = vmatpush1.bf16.msra.mxu0 %v4328_v22  ;;  %4139 = vmatprep.subr.bf16.mxu1 %v4138_v23  ;;  %v2389_v45 = vld [vmem:[%s5323_s15 + $0x6d8] sm:$0xff]  ;;  %v4336_v47 = vpack.c.bf16 %v2384_v20, %v2382_v40  ;;  %v4146_v29 = vpack.c.bf16 %v2197_v43, %v2195_v42  ;;  %v2194_v50 = vld [vmem:[%s5323_s15 + $0xc0] sm:$0xff]  ;;  %v2196_v51 = vld [vmem:[%s5323_s15 + $0xd0] sm:$0xff] }
 0x32b   : > { %4331 = vmatprep.subr.bf16.mxu0 %v4330_v27  ;;  %v2386_v52 = vld [vmem:[%s5323_s15 + $0x6c0] sm:$0xff]  ;;  %v4338_v53 = vpack.c.bf16 %v2389_v45, %v2387_v44  ;;  %v2388_v54 = vld [vmem:[%s5323_s15 + $0x6d0] sm:$0xff]  ;;  %v2199_v55 = vld [vmem:[%s5323_s15 + $0xe8] sm:$0xff]  ;;  %v4148_v58 = vpack.c.bf16 %v2196_v51, %v2194_v50 }
 0x32c   : > { %v2201_v56 = vld [vmem:[%s5323_s15 + $0xf8] sm:$0xff]  ;;  %v2391_v57 = vld [vmem:[%s5323_s15 + $0x6e8] sm:$0xff]  ;;  %v4340_v59 = vpack.c.bf16 %v2388_v54, %v2386_v52  ;;  %v2198_v61 = vld [vmem:[%s5323_s15 + $0xe0] sm:$0xff] }
 0x32d   : > { %4141 = vmatpush1.bf16.msra.mxu1 %v4140_v34  ;;  %v2393_v38 = vld [vmem:[%s5323_s15 + $0x6f8] sm:$0xff]  ;;  %v4150_v60 = vpack.c.bf16 %v2201_v56, %v2199_v55  ;;  %v2200_v62 = vld [vmem:[%s5323_s15 + $0xf0] sm:$0xff]  ;;  %v2390_v48 = vld [vmem:[%s5323_s15 + $0x6e0] sm:$0xff] }
 0x32e   : > { %4333 = vmatpush1.bf16.msra.mxu0 %v4332_v35  ;;  %4143 = vmatprep.subr.bf16.mxu1 %v4142_v36  ;;  %v4342_v63 = vpack.c.bf16 %v2393_v38, %v2391_v57  ;;  %v2392_v0 = vld [vmem:[%s5323_s15 + $0x6f0] sm:$0xff]  ;;  %v2203_v1 = vld [vmem:[%s5323_s15 + $0x108] sm:$0xff]  ;;  %v2205_v2 = vld [vmem:[%s5323_s15 + $0x118] sm:$0xff]  ;;  %v4152_v5 = vpack.c.bf16 %v2200_v62, %v2198_v61 }
 0x32f   : > { %4335 = vmatprep.subr.bf16.mxu0 %v4334_v41  ;;  %v2395_v3 = vld [vmem:[%s5323_s15 + $0x708] sm:$0xff]  ;;  %v2397_v4 = vld [vmem:[%s5323_s15 + $0x718] sm:$0xff]  ;;  %v4344_v6 = vpack.c.bf16 %v2392_v0, %v2390_v48  ;;  %v4154_v49 = vpack.c.bf16 %v2205_v2, %v2203_v1  ;;  %v2202_v7 = vld [vmem:[%s5323_s15 + $0x100] sm:$0xff] }
 0x330   : > { %v2204_v8 = vld [vmem:[%s5323_s15 + $0x110] sm:$0xff]  ;;  %v2394_v9 = vld [vmem:[%s5323_s15 + $0x700] sm:$0xff]  ;;  %v4346_v10 = vpack.c.bf16 %v2397_v4, %v2395_v3  ;;  %v2207_v12 = vld [vmem:[%s5323_s15 + $0x128] sm:$0xff] }
 0x331   : > { %4145 = vmatpush1.bf16.msra.mxu1 %v4144_v46  ;;  %v2396_v11 = vld [vmem:[%s5323_s15 + $0x710] sm:$0xff]  ;;  %v2209_v13 = vld [vmem:[%s5323_s15 + $0x138] sm:$0xff]  ;;  %v2399_v14 = vld [vmem:[%s5323_s15 + $0x728] sm:$0xff]  ;;  %v4156_v16 = vpack.c.bf16 %v2204_v8, %v2202_v7 }
 0x332   : > { %4337 = vmatpush1.bf16.msra.mxu0 %v4336_v47  ;;  %4147 = vmatprep.subr.bf16.mxu1 %v4146_v29  ;;  %v2401_v15 = vld [vmem:[%s5323_s15 + $0x738] sm:$0xff]  ;;  %v4348_v17 = vpack.c.bf16 %v2396_v11, %v2394_v9  ;;  %v4158_v18 = vpack.c.bf16 %v2209_v13, %v2207_v12  ;;  %v2206_v19 = vld [vmem:[%s5323_s15 + $0x120] sm:$0xff]  ;;  %v2208_v21 = vld [vmem:[%s5323_s15 + $0x130] sm:$0xff] }
 0x333   : > { %4339 = vmatprep.subr.bf16.mxu0 %v4338_v53  ;;  %v2398_v22 = vld [vmem:[%s5323_s15 + $0x720] sm:$0xff]  ;;  %v4350_v23 = vpack.c.bf16 %v2401_v15, %v2399_v14  ;;  %v2400_v24 = vld [vmem:[%s5323_s15 + $0x730] sm:$0xff]  ;;  %v2211_v25 = vld [vmem:[%s5323_s15 + $0x148] sm:$0xff]  ;;  %v4160_v30 = vpack.c.bf16 %v2208_v21, %v2206_v19 }
 0x334   : > { %v2213_v26 = vld [vmem:[%s5323_s15 + $0x158] sm:$0xff]  ;;  %v2403_v27 = vld [vmem:[%s5323_s15 + $0x748] sm:$0xff]  ;;  %v4352_v31 = vpack.c.bf16 %v2400_v24, %v2398_v22  ;;  %v2210_v33 = vld [vmem:[%s5323_s15 + $0x140] sm:$0xff] }
 0x335   : > { %4149 = vmatpush1.bf16.msra.mxu1 %v4148_v58  ;;  %v2405_v28 = vld [vmem:[%s5323_s15 + $0x758] sm:$0xff]  ;;  %v4162_v32 = vpack.c.bf16 %v2213_v26, %v2211_v25  ;;  %v2212_v34 = vld [vmem:[%s5323_s15 + $0x150] sm:$0xff]  ;;  %v2402_v35 = vld [vmem:[%s5323_s15 + $0x740] sm:$0xff] }
 0x336   : > { %4341 = vmatpush1.bf16.msra.mxu0 %v4340_v59  ;;  %4151 = vmatprep.subr.bf16.mxu1 %v4150_v60  ;;  %v4354_v36 = vpack.c.bf16 %v2405_v28, %v2403_v27  ;;  %v2404_v37 = vld [vmem:[%s5323_s15 + $0x750] sm:$0xff]  ;;  %v2215_v39 = vld [vmem:[%s5323_s15 + $0x168] sm:$0xff]  ;;  %v2217_v40 = vld [vmem:[%s5323_s15 + $0x178] sm:$0xff]  ;;  %v4164_v42 = vpack.c.bf16 %v2212_v34, %v2210_v33 }
 0x337   : > { %4343 = vmatprep.subr.bf16.mxu0 %v4342_v63  ;;  %v2407_v41 = vld [vmem:[%s5323_s15 + $0x768] sm:$0xff]  ;;  %v2409_v20 = vld [vmem:[%s5323_s15 + $0x778] sm:$0xff]  ;;  %v2214_v43 = vld [vmem:[%s5323_s15 + $0x160] sm:$0xff]  ;;  %v4356_v44 = vpack.c.bf16 %v2404_v37, %v2402_v35  ;;  %v4166_v45 = vpack.c.bf16 %v2217_v40, %v2215_v39 }
 0x338   : > { %v2216_v46 = vld [vmem:[%s5323_s15 + $0x170] sm:$0xff]  ;;  %v2406_v47 = vld [vmem:[%s5323_s15 + $0x760] sm:$0xff]  ;;  %v4358_v50 = vpack.c.bf16 %v2409_v20, %v2407_v41  ;;  %v2219_v51 = vld [vmem:[%s5323_s15 + $0x188] sm:$0xff] }
 0x339   : > { %4153 = vmatpush1.bf16.msra.mxu1 %v4152_v5  ;;  %v2408_v29 = vld [vmem:[%s5323_s15 + $0x770] sm:$0xff]  ;;  %v2221_v52 = vld [vmem:[%s5323_s15 + $0x198] sm:$0xff]  ;;  %v2143_v53 = vld [vmem:[#allocation2 + $0x8] sm:$0xff]  ;;  %v4168_v57 = vpack.c.bf16 %v2216_v46, %v2214_v43 }
 0x33a   : > { %4345 = vmatpush1.bf16.msra.mxu0 %v4344_v6  ;;  %4155 = vmatprep.subr.bf16.mxu1 %v4154_v49  ;;  %v2411_v54 = vld [vmem:[%s5323_s15 + $0x788] sm:$0xff]  ;;  %v2413_v55 = vld [vmem:[%s5323_s15 + $0x798] sm:$0xff]  ;;  %v2149_v56 = vld [vmem:[#allocation2 + $0x38] sm:$0xff]  ;;  %v4360_v38 = vpack.c.bf16 %v2408_v29, %v2406_v47  ;;  %v4170_v58 = vpack.c.bf16 %v2221_v52, %v2219_v51 }
 0x33b   : > { %4347 = vmatprep.subr.bf16.mxu0 %v4346_v10  ;;  %2694 = vmatprep.mubr.f32.mxu1 %v2143_v53  ;;  %v2218_v59 = vld [vmem:[%s5323_s15 + $0x180] sm:$0xff]  ;;  %v2220_v60 = vld [vmem:[%s5323_s15 + $0x190] sm:$0xff]  ;;  %v4362_v62 = vpack.c.bf16 %v2413_v55, %v2411_v54  ;;  %v2223_v63 = vld [vmem:[%s5323_s15 + $0x1a8] sm:$0xff] }
 0x33c   : > { %2925 = vmatprep.mubr.f32.mxu0 %v2149_v56  ;;  %v2410_v61 = vld [vmem:[%s5323_s15 + $0x780] sm:$0xff]  ;;  %v2412_v48 = vld [vmem:[%s5323_s15 + $0x790] sm:$0xff]  ;;  %v2225_v0 = vld [vmem:[%s5323_s15 + $0x1b8] sm:$0xff]  ;;  %v4172_v3 = vpack.c.bf16 %v2220_v60, %v2218_v59 }
 0x33d   : > { %4157 = vmatpush1.bf16.msra.mxu1 %v4156_v16  ;;  %v2415_v1 = vld [vmem:[%s5323_s15 + $0x7a8] sm:$0xff]  ;;  %v2417_v2 = vld [vmem:[%s5323_s15 + $0x7b8] sm:$0xff]  ;;  %v4364_v4 = vpack.c.bf16 %v2412_v48, %v2410_v61  ;;  %v4174_v5 = vpack.c.bf16 %v2225_v0, %v2223_v63  ;;  %v2222_v6 = vld [vmem:[%s5323_s15 + $0x1a0] sm:$0xff] }
 0x33e   : > { %4349 = vmatpush1.bf16.msra.mxu0 %v4348_v17  ;;  %4159 = vmatprep.subr.bf16.mxu1 %v4158_v18  ;;  %v2224_v49 = vld [vmem:[%s5323_s15 + $0x1b0] sm:$0xff]  ;;  %v2414_v7 = vld [vmem:[%s5323_s15 + $0x7a0] sm:$0xff]  ;;  %v4366_v8 = vpack.c.bf16 %v2417_v2, %v2415_v1  ;;  %v2227_v10 = vld [vmem:[%s5323_s15 + $0x1c8] sm:$0xff] }
 0x33f   : > { %4351 = vmatprep.subr.bf16.mxu0 %v4350_v23  ;;  %v2416_v9 = vld [vmem:[%s5323_s15 + $0x7b0] sm:$0xff]  ;;  %v2229_v11 = vld [vmem:[%s5323_s15 + $0x1d8] sm:$0xff]  ;;  %v2419_v12 = vld [vmem:[%s5323_s15 + $0x7c8] sm:$0xff]  ;;  %v4176_v14 = vpack.c.bf16 %v2224_v49, %v2222_v6 }
 0x340   : > { %v2421_v13 = vld [vmem:[%s5323_s15 + $0x7d8] sm:$0xff]  ;;  %v4368_v15 = vpack.c.bf16 %v2416_v9, %v2414_v7  ;;  %v4178_v16 = vpack.c.bf16 %v2229_v11, %v2227_v10  ;;  %v2226_v17 = vld [vmem:[%s5323_s15 + $0x1c0] sm:$0xff]  ;;  %v2228_v18 = vld [vmem:[%s5323_s15 + $0x1d0] sm:$0xff] }
 0x341   : > { %4161 = vmatpush1.bf16.msra.mxu1 %v4160_v30  ;;  %v2418_v19 = vld [vmem:[%s5323_s15 + $0x7c0] sm:$0xff]  ;;  %v4370_v21 = vpack.c.bf16 %v2421_v13, %v2419_v12  ;;  %v2420_v22 = vld [vmem:[%s5323_s15 + $0x7d0] sm:$0xff]  ;;  %v2231_v23 = vld [vmem:[%s5323_s15 + $0x1e8] sm:$0xff]  ;;  %v4180_v27 = vpack.c.bf16 %v2228_v18, %v2226_v17 }
 0x342   : > { %4353 = vmatpush1.bf16.msra.mxu0 %v4352_v31  ;;  %4163 = vmatprep.subr.bf16.mxu1 %v4162_v32  ;;  %v2233_v24 = vld [vmem:[%s5323_s15 + $0x1f8] sm:$0xff]  ;;  %v2423_v25 = vld [vmem:[%s5323_s15 + $0x7e8] sm:$0xff]  ;;  %v4372_v28 = vpack.c.bf16 %v2420_v22, %v2418_v19  ;;  %v2230_v31 = vld [vmem:[%s5323_s15 + $0x1e0] sm:$0xff] }
 0x343   : > { %4355 = vmatprep.subr.bf16.mxu0 %v4354_v36  ;;  %v2425_v26 = vld [vmem:[%s5323_s15 + $0x7f8] sm:$0xff]  ;;  %v4182_v30 = vpack.c.bf16 %v2233_v24, %v2231_v23  ;;  %v2232_v32 = vld [vmem:[%s5323_s15 + $0x1f0] sm:$0xff]  ;;  %v2422_v33 = vld [vmem:[%s5323_s15 + $0x7e0] sm:$0xff] }
 0x344   : > { %v4374_v34 = vpack.c.bf16 %v2425_v26, %v2423_v25  ;;  %v2424_v35 = vld [vmem:[%s5323_s15 + $0x7f0] sm:$0xff]  ;;  %v2235_v36 = vld [vmem:[%s5323_s15 + $0x208] sm:$0xff]  ;;  %v2237_v37 = vld [vmem:[%s5323_s15 + $0x218] sm:$0xff]  ;;  %v4184_v41 = vpack.c.bf16 %v2232_v32, %v2230_v31 }
 0x345   : > { %4165 = vmatpush1.bf16.msra.mxu1 %v4164_v42  ;;  %v2427_v39 = vld [vmem:[%s5323_s15 + $0x808] sm:$0xff]  ;;  %v2429_v40 = vld [vmem:[%s5323_s15 + $0x818] sm:$0xff]  ;;  %v4376_v20 = vpack.c.bf16 %v2424_v35, %v2422_v33  ;;  %v4186_v42 = vpack.c.bf16 %v2237_v37, %v2235_v36  ;;  %v2234_v43 = vld [vmem:[%s5323_s15 + $0x200] sm:$0xff] }
 0x346   : > { %4357 = vmatpush1.bf16.msra.mxu0 %v4356_v44  ;;  %4167 = vmatprep.subr.bf16.mxu1 %v4166_v45  ;;  %v2236_v44 = vld [vmem:[%s5323_s15 + $0x210] sm:$0xff]  ;;  %v2426_v45 = vld [vmem:[%s5323_s15 + $0x800] sm:$0xff]  ;;  %v4378_v46 = vpack.c.bf16 %v2429_v40, %v2427_v39  ;;  %v2239_v29 = vld [vmem:[%s5323_s15 + $0x228] sm:$0xff] }
 0x347   : > { %4359 = vmatprep.subr.bf16.mxu0 %v4358_v50  ;;  %v2428_v47 = vld [vmem:[%s5323_s15 + $0x810] sm:$0xff]  ;;  %v2241_v50 = vld [vmem:[%s5323_s15 + $0x238] sm:$0xff]  ;;  %v2431_v51 = vld [vmem:[%s5323_s15 + $0x828] sm:$0xff]  ;;  %v4188_v54 = vpack.c.bf16 %v2236_v44, %v2234_v43 }
 0x348   : > { %v2433_v52 = vld [vmem:[%s5323_s15 + $0x838] sm:$0xff]  ;;  %v2148_v55 = vld [vmem:[#allocation2 + $0x30] sm:$0xff]  ;;  %v4380_v56 = vpack.c.bf16 %v2428_v47, %v2426_v45  ;;  %v2430_v59 = vld [vmem:[%s5323_s15 + $0x820] sm:$0xff] }
 0x349   : > { %4169 = vmatpush1.bf16.msra.mxu1 %v4168_v57  ;;  %v2142_v53 = vld [vmem:[#allocation2] sm:$0xff]  ;;  %v4190_v57 = vpack.c.bf16 %v2241_v50, %v2239_v29  ;;  %v4382_v60 = vpack.c.bf16 %v2433_v52, %v2431_v51  ;;  %v2432_v61 = vld [vmem:[%s5323_s15 + $0x830] sm:$0xff]  ;;  %v2435_v63 = vld [vmem:[%s5323_s15 + $0x848] sm:$0xff] }
 0x34a   : > { %4361 = vmatpush1.bf16.msra.mxu0 %v4360_v38  ;;  %4171 = vmatprep.subr.bf16.mxu1 %v4170_v58  ;;  %v2238_v38 = vld [vmem:[%s5323_s15 + $0x220] sm:$0xff]  ;;  %v2240_v58 = vld [vmem:[%s5323_s15 + $0x230] sm:$0xff]  ;;  %v2245_v48 = vld [vmem:[%s5323_s15 + $0x258] sm:$0xff]  ;;  %v4384_v2 = vpack.c.bf16 %v2432_v61, %v2430_v59 }
 0x34b   : > { %4363 = vmatprep.subr.bf16.mxu0 %v4362_v62  ;;  %v2243_v62 = vld [vmem:[%s5323_s15 + $0x248] sm:$0xff]  ;;  %v2437_v0 = vld [vmem:[%s5323_s15 + $0x858] sm:$0xff]  ;;  %v4192_v1 = vpack.c.bf16 %v2240_v58, %v2238_v38  ;;  %v2434_v6 = vld [vmem:[%s5323_s15 + $0x840] sm:$0xff] }
 0x34c   : > { %v4386_v49 = vpack.c.bf16 %v2437_v0, %v2435_v63  ;;  %v2436_v7 = vld [vmem:[%s5323_s15 + $0x850] sm:$0xff]  ;;  %v2249_v9 = vld [vmem:[%s5323_s15 + $0x278] sm:$0xff]  ;;  %v2439_v10 = vld [vmem:[%s5323_s15 + $0x868] sm:$0xff] }
 0x34d   : > { %4173 = vmatpush1.bf16.msra.mxu1 %v4172_v3  ;;  %v4194_v3 = vpack.c.bf16 %v2245_v48, %v2243_v62  ;;  %v2441_v11 = vld [vmem:[%s5323_s15 + $0x878] sm:$0xff]  ;;  %v4388_v13 = vpack.c.bf16 %v2436_v7, %v2434_v6  ;;  %v2438_v17 = vld [vmem:[%s5323_s15 + $0x860] sm:$0xff]  ;;  %v2440_v19 = vld [vmem:[%s5323_s15 + $0x870] sm:$0xff] }
 0x34e   : > { %4365 = vmatpush1.bf16.msra.mxu0 %v4364_v4  ;;  %4175 = vmatprep.subr.bf16.mxu1 %v4174_v5  ;;  %v2242_v4 = vld [vmem:[%s5323_s15 + $0x240] sm:$0xff]  ;;  %v2244_v5 = vld [vmem:[%s5323_s15 + $0x250] sm:$0xff]  ;;  %v4390_v18 = vpack.c.bf16 %v2441_v11, %v2439_v10  ;;  %v2253_v22 = vld [vmem:[%s5323_s15 + $0x298] sm:$0xff]  ;;  %v4392_v26 = vpack.c.bf16 %v2440_v19, %v2438_v17 }
 0x34f   : > { %4367 = vmatprep.subr.bf16.mxu0 %v4366_v8  ;;  %v2247_v8 = vld [vmem:[%s5323_s15 + $0x268] sm:$0xff]  ;;  %v4196_v12 = vpack.c.bf16 %v2244_v5, %v2242_v4  ;;  %v2445_v24 = vld [vmem:[%s5323_s15 + $0x898] sm:$0xff]  ;;  %v2442_v31 = vld [vmem:[%s5323_s15 + $0x880] sm:$0xff] }
 0x350   : > { %v2443_v23 = vld [vmem:[%s5323_s15 + $0x888] sm:$0xff]  ;;  %v2444_v33 = vld [vmem:[%s5323_s15 + $0x890] sm:$0xff]  ;;  %v2257_v35 = vld [vmem:[%s5323_s15 + $0x2b8] sm:$0xff] }
 0x351   : > { %4177 = vmatpush1.bf16.msra.mxu1 %v4176_v14  ;;  %v4198_v14 = vpack.c.bf16 %v2249_v9, %v2247_v8  ;;  %v4394_v32 = vpack.c.bf16 %v2445_v24, %v2443_v23  ;;  %v2447_v36 = vld [vmem:[%s5323_s15 + $0x8a8] sm:$0xff]  ;;  %v2449_v37 = vld [vmem:[%s5323_s15 + $0x8b8] sm:$0xff]  ;;  %v4396_v40 = vpack.c.bf16 %v2444_v33, %v2442_v31  ;;  %v2446_v43 = vld [vmem:[%s5323_s15 + $0x8a0] sm:$0xff] }
 0x352   : > { %4369 = vmatpush1.bf16.msra.mxu0 %v4368_v15  ;;  %4179 = vmatprep.subr.bf16.mxu1 %v4178_v16  ;;  %v2246_v15 = vld [vmem:[%s5323_s15 + $0x260] sm:$0xff]  ;;  %v2248_v16 = vld [vmem:[%s5323_s15 + $0x270] sm:$0xff]  ;;  %v4398_v44 = vpack.c.bf16 %v2449_v37, %v2447_v36  ;;  %v2261_v47 = vld [vmem:[%s5323_s15 + $0x2d8] sm:$0xff] }
 0x353   : > { %4371 = vmatprep.subr.bf16.mxu0 %v4370_v21  ;;  %v2251_v21 = vld [vmem:[%s5323_s15 + $0x288] sm:$0xff]  ;;  %v4200_v25 = vpack.c.bf16 %v2248_v16, %v2246_v15  ;;  %v2448_v45 = vld [vmem:[%s5323_s15 + $0x8b0] sm:$0xff]  ;;  %v2453_v50 = vld [vmem:[%s5323_s15 + $0x8d8] sm:$0xff] }
 0x354   : > { %v2451_v29 = vld [vmem:[%s5323_s15 + $0x8c8] sm:$0xff]  ;;  %v2258_v52 = vld [vmem:[%s5323_s15 + $0x2c0] sm:$0xff]  ;;  %v2452_v38 = vld [vmem:[%s5323_s15 + $0x8d0] sm:$0xff] }
 0x355   : > { %4181 = vmatpush1.bf16.msra.mxu1 %v4180_v27  ;;  %v4202_v27 = vpack.c.bf16 %v2253_v22, %v2251_v21  ;;  %v2163_v58 = vld [vmem:[#allocation2 + $0xa8] sm:$0xff]  ;;  %v4402_v59 = vpack.c.bf16 %v2453_v50, %v2451_v29  ;;  %v2265_v61 = vld [vmem:[%s5323_s15 + $0x2f8] sm:$0xff]  ;;  %v2156_v62 = vld [vmem:[#allocation2 + $0x70] sm:$0xff] }
 0x356   : > { %4373 = vmatpush1.bf16.msra.mxu0 %v4372_v28  ;;  %4183 = vmatprep.subr.bf16.mxu1 %v4182_v30  ;;  %v2250_v28 = vld [vmem:[%s5323_s15 + $0x280] sm:$0xff]  ;;  %v2252_v30 = vld [vmem:[%s5323_s15 + $0x290] sm:$0xff]  ;;  %v2455_v48 = vld [vmem:[%s5323_s15 + $0x8e8] sm:$0xff] }
 0x357   : > { %4375 = vmatprep.subr.bf16.mxu0 %v4374_v34  ;;  %v2255_v34 = vld [vmem:[%s5323_s15 + $0x2a8] sm:$0xff]  ;;  %v4204_v39 = vpack.c.bf16 %v2252_v30, %v2250_v28  ;;  %v2457_v63 = vld [vmem:[%s5323_s15 + $0x8f8] sm:$0xff]  ;;  %v2264_v6 = vld [vmem:[%s5323_s15 + $0x2f0] sm:$0xff] }
 0x358   : > { %v2162_v0 = vld [vmem:[#allocation2 + $0xa0] sm:$0xff]  ;;  %v2151_v7 = vld [vmem:[#allocation2 + $0x48] sm:$0xff]  ;;  %v4406_v8 = vpack.c.bf16 %v2457_v63, %v2455_v48  ;;  %v2456_v9 = vld [vmem:[%s5323_s15 + $0x8f0] sm:$0xff] }
 0x359   : > { %4185 = vmatpush1.bf16.msra.mxu1 %v4184_v41  ;;  %v4206_v41 = vpack.c.bf16 %v2257_v35, %v2255_v34  ;;  %v2267_v10 = vld [vmem:[%s5323_s15 + $0x308] sm:$0xff]  ;;  %v2269_v11 = vld [vmem:[%s5323_s15 + $0x318] sm:$0xff]  ;;  %v2266_v17 = vld [vmem:[%s5323_s15 + $0x300] sm:$0xff] }
 0x35a   : > { %4377 = vmatpush1.bf16.msra.mxu0 %v4376_v20  ;;  %4187 = vmatprep.subr.bf16.mxu1 %v4186_v42  ;;  %v2254_v20 = vld [vmem:[%s5323_s15 + $0x2a0] sm:$0xff]  ;;  %v2256_v42 = vld [vmem:[%s5323_s15 + $0x2b0] sm:$0xff]  ;;  %v4218_v16 = vpack.c.bf16 %v2269_v11, %v2267_v10  ;;  %v2271_v23 = vld [vmem:[%s5323_s15 + $0x328] sm:$0xff] }
 0x35b   : > { %4379 = vmatprep.subr.bf16.mxu0 %v4378_v46  ;;  %v2259_v46 = vld [vmem:[%s5323_s15 + $0x2c8] sm:$0xff]  ;;  %v4208_v51 = vpack.c.bf16 %v2256_v42, %v2254_v20  ;;  %v2458_v19 = vld [vmem:[%s5323_s15 + $0x900] sm:$0xff]  ;;  %v2460_v22 = vld [vmem:[%s5323_s15 + $0x910] sm:$0xff] }
 0x35c   : > { %2695 = vmatmul.mubr.f32.vlgmr.msra.gmra.mrb[0].mxu1 %v2142_v53  ;;  %v2260_v53 = vld [vmem:[%s5323_s15 + $0x2d0] sm:$0xff]  ;;  %v2273_v24 = vld [vmem:[%s5323_s15 + $0x338] sm:$0xff]  ;;  %v4412_v28 = vpack.c.bf16 %v2460_v22, %v2458_v19  ;;  %v2270_v31 = vld [vmem:[%s5323_s15 + $0x320] sm:$0xff] }
 0x35d   : > { %4189 = vmatpush1.bf16.msra.mxu1 %v4188_v54  ;;  %2926 = vmatmul.mubr.f32.vlgmr.msra.gmra.mrb[0].mxu0 %v2148_v55  ;;  %v2157_v54 = vld [vmem:[#allocation2 + $0x78] sm:$0xff]  ;;  %v4400_v55 = vpack.c.bf16 %v2448_v45, %v2446_v43  ;;  %v4222_v30 = vpack.c.bf16 %v2273_v24, %v2271_v23  ;;  %v2462_v33 = vld [vmem:[%s5323_s15 + $0x920] sm:$0xff]  ;;  %v2275_v36 = vld [vmem:[%s5323_s15 + $0x348] sm:$0xff] }
 0x35e   : > { %4381 = vmatpush1.bf16.msra.mxu0 %v4380_v56  ;;  %4191 = vmatprep.subr.bf16.mxu1 %v4190_v57  ;;  %v4210_v56 = vpack.c.bf16 %v2261_v47, %v2259_v46  ;;  %v2450_v57 = vld [vmem:[%s5323_s15 + $0x8c0] sm:$0xff]  ;;  %v2464_v35 = vld [vmem:[%s5323_s15 + $0x930] sm:$0xff]  ;;  %v2277_v37 = vld [vmem:[%s5323_s15 + $0x358] sm:$0xff] }
 0x35f   : > { %4383 = vmatprep.subr.bf16.mxu0 %v4382_v60  ;;  %v2263_v60 = vld [vmem:[%s5323_s15 + $0x2e8] sm:$0xff]  ;;  %2700 = vmatprep.mubr.f32.mxu1 %v2157_v54  ;;  %v4404_v4 = vpack.c.bf16 %v2452_v38, %v2450_v57  ;;  %v4416_v20 = vpack.c.bf16 %v2464_v35, %v2462_v33  ;;  %v4226_v42 = vpack.c.bf16 %v2277_v37, %v2275_v36  ;;  %v2274_v43 = vld [vmem:[%s5323_s15 + $0x340] sm:$0xff]  ;;  %v2468_v47 = vld [vmem:[%s5323_s15 + $0x950] sm:$0xff] }
 0x360   : > { %2931 = vmatprep.mubr.f32.mxu0 %v2163_v58  ;;  %2701 = vmatmul.mubr.f32.gmra.mrb[2].mxu1 %v2156_v62  ;;  %v4214_v5 = vpack.c.bf16 %v2265_v61, %v2263_v60  ;;  %v2466_v45 = vld [vmem:[%s5323_s15 + $0x940] sm:$0xff]  ;;  %v2279_v29 = vld [vmem:[%s5323_s15 + $0x368] sm:$0xff]  ;;  %v2281_v50 = vld [vmem:[%s5323_s15 + $0x378] sm:$0xff] }
 0x361   : > { %4193 = vmatpush1.bf16.msra.mxu1 %v4192_v1  ;;  %v4212_v1 = vpack.c.bf16 %v2260_v53, %v2258_v52  ;;  %2932 = vmatmul.mubr.f32.gmra.mrb[2].mxu0 %v2162_v0  ;;  %v2473_v52 = vld [vmem:[%s5323_s15 + $0x978] sm:$0xff]  ;;  %v4420_v54 = vpack.c.bf16 %v2468_v47, %v2466_v45  ;;  %v2280_v57 = vld [vmem:[%s5323_s15 + $0x370] sm:$0xff]  ;;  %v2470_v38 = vld [vmem:[%s5323_s15 + $0x960] sm:$0xff] }
 0x362   : > { %4385 = vmatpush1.bf16.msra.mxu0 %v4384_v2  ;;  %4195 = vmatprep.subr.bf16.mxu1 %v4194_v3  ;;  %v2262_v2 = vld [vmem:[%s5323_s15 + $0x2e0] sm:$0xff]  ;;  %v2145_v3 = vld [vmem:[#allocation2 + $0x18] sm:$0xff]  ;;  %v2283_v60 = vld [vmem:[%s5323_s15 + $0x388] sm:$0xff] }
 0x363   : > { %4387 = vmatprep.subr.bf16.mxu0 %v4386_v49  ;;  %v2454_v49 = vld [vmem:[%s5323_s15 + $0x8e0] sm:$0xff]  ;;  %2771 = vmatprep.mubr.f32.mxu1 %v2145_v3  ;;  %v2285_v61 = vld [vmem:[%s5323_s15 + $0x398] sm:$0xff]  ;;  %v2475_v62 = vld [vmem:[%s5323_s15 + $0x988] sm:$0xff] }
 0x364   : > { %3002 = vmatprep.mubr.f32.mxu0 %v2151_v7  ;;  %v4408_v15 = vpack.c.bf16 %v2456_v9, %v2454_v49  ;;  %v2477_v48 = vld [vmem:[%s5323_s15 + $0x998] sm:$0xff]  ;;  %v2284_v3 = vld [vmem:[%s5323_s15 + $0x390] sm:$0xff]  ;;  %v2287_v49 = vld [vmem:[%s5323_s15 + $0x3a8] sm:$0xff] }
 0x365   : > { %4197 = vmatpush1.bf16.msra.mxu1 %v4196_v12  ;;  %v2459_v12 = vld [vmem:[%s5323_s15 + $0x908] sm:$0xff]  ;;  %v2289_v7 = vld [vmem:[%s5323_s15 + $0x3b8] sm:$0xff] }
 0x366   : > { %4389 = vmatpush1.bf16.msra.mxu0 %v4388_v13  ;;  %4199 = vmatprep.subr.bf16.mxu1 %v4198_v14  ;;  %v2461_v13 = vld [vmem:[%s5323_s15 + $0x918] sm:$0xff]  ;;  %v4216_v14 = vpack.c.bf16 %v2264_v6, %v2262_v2  ;;  %v2282_v2 = vld [vmem:[%s5323_s15 + $0x380] sm:$0xff]  ;;  %v2476_v6 = vld [vmem:[%s5323_s15 + $0x990] sm:$0xff] }
 0x367   : > { %4391 = vmatprep.subr.bf16.mxu0 %v4390_v18  ;;  %v2268_v18 = vld [vmem:[%s5323_s15 + $0x310] sm:$0xff]  ;;  %v4410_v21 = vpack.c.bf16 %v2461_v13, %v2459_v12  ;;  %v2481_v9 = vld [vmem:[%s5323_s15 + $0x9b8] sm:$0xff]  ;;  %v4236_v10 = vpack.c.bf16 %v2284_v3, %v2282_v2  ;;  %v4238_v12 = vpack.c.bf16 %v2289_v7, %v2287_v49  ;;  %v2286_v13 = vld [vmem:[%s5323_s15 + $0x3a0] sm:$0xff] }
 0x368   : > { %v2293_v19 = vld [vmem:[%s5323_s15 + $0x3d8] sm:$0xff]  ;;  %v2494_v2 = vld [vmem:[%s5323_s15 + $0xa20] sm:$0xff]  ;;  %v2499_v49 = vld [vmem:[%s5323_s15 + $0xa48] sm:$0xff] }
 0x369   : > { %4201 = vmatpush1.bf16.msra.mxu1 %v4200_v25  ;;  %v2463_v25 = vld [vmem:[%s5323_s15 + $0x928] sm:$0xff]  ;;  %v2485_v22 = vld [vmem:[%s5323_s15 + $0x9d8] sm:$0xff] }
 0x36a   : > { %4393 = vmatpush1.bf16.msra.mxu0 %v4392_v26  ;;  %4203 = vmatprep.subr.bf16.mxu1 %v4202_v27  ;;  %v2465_v26 = vld [vmem:[%s5323_s15 + $0x938] sm:$0xff]  ;;  %v4220_v27 = vpack.c.bf16 %v2268_v18, %v2266_v17  ;;  %v2480_v17 = vld [vmem:[%s5323_s15 + $0x9b0] sm:$0xff]  ;;  %v2291_v18 = vld [vmem:[%s5323_s15 + $0x3c8] sm:$0xff] }
 0x36b   : > { %4395 = vmatprep.subr.bf16.mxu0 %v4394_v32  ;;  %v2272_v32 = vld [vmem:[%s5323_s15 + $0x330] sm:$0xff]  ;;  %v4414_v34 = vpack.c.bf16 %v2465_v26, %v2463_v25  ;;  %v4242_v25 = vpack.c.bf16 %v2293_v19, %v2291_v18  ;;  %v2290_v26 = vld [vmem:[%s5323_s15 + $0x3c0] sm:$0xff]  ;;  %v2297_v33 = vld [vmem:[%s5323_s15 + $0x3f8] sm:$0xff] }
 0x36c   : > { %v2489_v35 = vld [vmem:[%s5323_s15 + $0x9f8] sm:$0xff]  ;;  %v2500_v19 = vld [vmem:[%s5323_s15 + $0xa50] sm:$0xff] }
 0x36d   : > { %4205 = vmatpush1.bf16.msra.mxu1 %v4204_v39  ;;  %v2467_v39 = vld [vmem:[%s5323_s15 + $0x948] sm:$0xff]  ;;  %v2301_v45 = vld [vmem:[%s5323_s15 + $0x418] sm:$0xff] }
 0x36e   : > { %4397 = vmatpush1.bf16.msra.mxu0 %v4396_v40  ;;  %4207 = vmatprep.subr.bf16.mxu1 %v4206_v41  ;;  %v2469_v40 = vld [vmem:[%s5323_s15 + $0x958] sm:$0xff]  ;;  %v4224_v41 = vpack.c.bf16 %v2272_v32, %v2270_v31  ;;  %v2484_v31 = vld [vmem:[%s5323_s15 + $0x9d0] sm:$0xff]  ;;  %v2295_v32 = vld [vmem:[%s5323_s15 + $0x3e8] sm:$0xff] }
 0x36f   : > { %4399 = vmatprep.subr.bf16.mxu0 %v4398_v44  ;;  %v2276_v44 = vld [vmem:[%s5323_s15 + $0x350] sm:$0xff]  ;;  %v4418_v46 = vpack.c.bf16 %v2469_v40, %v2467_v39  ;;  %v4246_v39 = vpack.c.bf16 %v2297_v33, %v2295_v32  ;;  %v2294_v40 = vld [vmem:[%s5323_s15 + $0x3e0] sm:$0xff]  ;;  %v2493_v47 = vld [vmem:[%s5323_s15 + $0xa18] sm:$0xff] }
 0x370   : > { %v4228_v53 = vpack.c.bf16 %v2276_v44, %v2274_v43  ;;  %v2488_v43 = vld [vmem:[%s5323_s15 + $0x9f0] sm:$0xff]  ;;  %v2299_v44 = vld [vmem:[%s5323_s15 + $0x408] sm:$0xff]  ;;  %v2501_v7 = vld [vmem:[%s5323_s15 + $0xa58] sm:$0xff] }
 0x371   : > { %4209 = vmatpush1.bf16.msra.mxu1 %v4208_v51  ;;  %v2471_v51 = vld [vmem:[%s5323_s15 + $0x968] sm:$0xff]  ;;  %v4450_v18 = vpack.c.bf16 %v2501_v7, %v2499_v49  ;;  %v2312_v32 = vld [vmem:[%s5323_s15 + $0x470] sm:$0xff]  ;;  %v2502_v33 = vld [vmem:[%s5323_s15 + $0xa60] sm:$0xff] }
 0x372   : > { %4401 = vmatpush1.bf16.msra.mxu0 %v4400_v55  ;;  %4211 = vmatprep.subr.bf16.mxu1 %v4210_v56  ;;  %v4230_v55 = vpack.c.bf16 %v2281_v50, %v2279_v29  ;;  %v2278_v56 = vld [vmem:[%s5323_s15 + $0x360] sm:$0xff]  ;;  %v4422_v58 = vpack.c.bf16 %v2473_v52, %v2471_v51  ;;  %v4250_v51 = vpack.c.bf16 %v2301_v45, %v2299_v44  ;;  %v2316_v44 = vld [vmem:[%s5323_s15 + $0x490] sm:$0xff]  ;;  %v2327_v49 = vld [vmem:[%s5323_s15 + $0x4e8] sm:$0xff] }
 0x373   : > { %4403 = vmatprep.subr.bf16.mxu0 %v4402_v59  ;;  %v2472_v59 = vld [vmem:[%s5323_s15 + $0x970] sm:$0xff]  ;;  %v4232_v63 = vpack.c.bf16 %v2280_v57, %v2278_v56  ;;  %v2298_v52 = vld [vmem:[%s5323_s15 + $0x400] sm:$0xff]  ;;  %v2303_v57 = vld [vmem:[%s5323_s15 + $0x428] sm:$0xff] }
 0x374   : > { %v4424_v0 = vpack.c.bf16 %v2472_v59, %v2470_v38  ;;  %v2492_v56 = vld [vmem:[%s5323_s15 + $0xa10] sm:$0xff]  ;;  %v2305_v38 = vld [vmem:[%s5323_s15 + $0x438] sm:$0xff]  ;;  %v2506_v45 = vld [vmem:[%s5323_s15 + $0xa80] sm:$0xff] }
 0x375   : > { %4213 = vmatpush1.bf16.msra.mxu1 %v4212_v1  ;;  %v4234_v1 = vpack.c.bf16 %v2285_v61, %v2283_v60  ;;  %v2497_v59 = vld [vmem:[%s5323_s15 + $0xa38] sm:$0xff]  ;;  %v2144_v60 = vld [vmem:[#allocation2 + $0x10] sm:$0xff] }
 0x376   : > { %4405 = vmatpush1.bf16.msra.mxu0 %v4404_v4  ;;  %4215 = vmatprep.subr.bf16.mxu1 %v4214_v5  ;;  %v2474_v4 = vld [vmem:[%s5323_s15 + $0x980] sm:$0xff]  ;;  %v4426_v5 = vpack.c.bf16 %v2477_v48, %v2475_v62  ;;  %v2150_v62 = vld [vmem:[#allocation2 + $0x40] sm:$0xff] }
 0x377   : > { %4407 = vmatprep.subr.bf16.mxu0 %v4406_v8  ;;  %v2479_v8 = vld [vmem:[%s5323_s15 + $0x9a8] sm:$0xff]  ;;  %v4428_v11 = vpack.c.bf16 %v2476_v6, %v2474_v4  ;;  %v2496_v4 = vld [vmem:[%s5323_s15 + $0xa30] sm:$0xff]  ;;  %v2309_v6 = vld [vmem:[%s5323_s15 + $0x458] sm:$0xff] }
 0x378   : > { %v2329_v7 = vld [vmem:[%s5323_s15 + $0x4f8] sm:$0xff] }
 0x379   : > { %4217 = vmatpush1.bf16.msra.mxu1 %v4216_v14  ;;  %v2288_v14 = vld [vmem:[%s5323_s15 + $0x3b0] sm:$0xff] }
 0x37a   : > { %4409 = vmatpush1.bf16.msra.mxu0 %v4408_v15  ;;  %4219 = vmatprep.subr.bf16.mxu1 %v4218_v16  ;;  %v2478_v15 = vld [vmem:[%s5323_s15 + $0x9a0] sm:$0xff]  ;;  %v4430_v16 = vpack.c.bf16 %v2481_v9, %v2479_v8  ;;  %v4240_v23 = vpack.c.bf16 %v2288_v14, %v2286_v13  ;;  %v4448_v13 = vpack.c.bf16 %v2496_v4, %v2494_v2 }
 0x37b   : > { %4411 = vmatprep.subr.bf16.mxu0 %v4410_v21  ;;  %v2483_v21 = vld [vmem:[%s5323_s15 + $0x9c8] sm:$0xff]  ;;  %v4432_v24 = vpack.c.bf16 %v2480_v17, %v2478_v15  ;;  %v2159_v8 = vld [vmem:[#allocation2 + $0x88] sm:$0xff]  ;;  %v2308_v15 = vld [vmem:[%s5323_s15 + $0x450] sm:$0xff] }
 0x37c   : > { %v2164_v17 = vld [vmem:[#allocation2 + $0xb0] sm:$0xff]  ;;  %v2322_v2 = vld [vmem:[%s5323_s15 + $0x4c0] sm:$0xff] }
 0x37d   : > { %4221 = vmatpush1.bf16.msra.mxu1 %v4220_v27  ;;  %v2292_v27 = vld [vmem:[%s5323_s15 + $0x3d0] sm:$0xff]  ;;  %v2514_v4 = vld [vmem:[%s5323_s15 + $0xac0] sm:$0xff] }
 0x37e   : > { %4413 = vmatpush1.bf16.msra.mxu0 %v4412_v28  ;;  %4223 = vmatprep.subr.bf16.mxu1 %v4222_v30  ;;  %v2482_v28 = vld [vmem:[%s5323_s15 + $0x9c0] sm:$0xff]  ;;  %v4434_v30 = vpack.c.bf16 %v2485_v22, %v2483_v21  ;;  %v4244_v36 = vpack.c.bf16 %v2292_v27, %v2290_v26  ;;  %v2311_v21 = vld [vmem:[%s5323_s15 + $0x468] sm:$0xff]  ;;  %v2313_v22 = vld [vmem:[%s5323_s15 + $0x478] sm:$0xff] }
 0x37f   : > { %4415 = vmatprep.subr.bf16.mxu0 %v4414_v34  ;;  %v2487_v34 = vld [vmem:[%s5323_s15 + $0x9e8] sm:$0xff]  ;;  %v4436_v37 = vpack.c.bf16 %v2484_v31, %v2482_v28  ;;  %v2153_v27 = vld [vmem:[#allocation2 + $0x58] sm:$0xff]  ;;  %v2310_v31 = vld [vmem:[%s5323_s15 + $0x460] sm:$0xff] }
 0x381   : > { %4225 = vmatpush1.bf16.msra.mxu1 %v4224_v41  ;;  %v2296_v41 = vld [vmem:[%s5323_s15 + $0x3f0] sm:$0xff] }
 0x382   : > { %4417 = vmatpush1.bf16.msra.mxu0 %v4416_v20  ;;  %4227 = vmatprep.subr.bf16.mxu1 %v4226_v42  ;;  %v2486_v20 = vld [vmem:[%s5323_s15 + $0x9e0] sm:$0xff]  ;;  %v4438_v42 = vpack.c.bf16 %v2489_v35, %v2487_v34  ;;  %v4248_v29 = vpack.c.bf16 %v2296_v41, %v2294_v40  ;;  %v2504_v35 = vld [vmem:[%s5323_s15 + $0xa70] sm:$0xff]  ;;  %v2509_v40 = vld [vmem:[%s5323_s15 + $0xa98] sm:$0xff]  ;;  %v4264_v41 = vpack.c.bf16 %v2312_v32, %v2310_v31 }
 0x383   : > { %4419 = vmatprep.subr.bf16.mxu0 %v4418_v46  ;;  %v2491_v46 = vld [vmem:[%s5323_s15 + $0xa08] sm:$0xff]  ;;  %v4440_v50 = vpack.c.bf16 %v2488_v43, %v2486_v20  ;;  %v4456_v20 = vpack.c.bf16 %v2504_v35, %v2502_v33  ;;  %v2314_v43 = vld [vmem:[%s5323_s15 + $0x480] sm:$0xff]  ;;  %v2524_v31 = vld [vmem:[%s5323_s15 + $0xb10] sm:$0xff] }
 0x384   : > { %v2335_v32 = vld [vmem:[%s5323_s15 + $0x528] sm:$0xff]  ;;  %v2337_v33 = vld [vmem:[%s5323_s15 + $0x538] sm:$0xff] }
 0x385   : > { %4229 = vmatpush1.bf16.msra.mxu1 %v4228_v53  ;;  %v2300_v53 = vld [vmem:[%s5323_s15 + $0x410] sm:$0xff]  ;;  %v2529_v35 = vld [vmem:[%s5323_s15 + $0xb38] sm:$0xff] }
 0x386   : > { %4421 = vmatpush1.bf16.msra.mxu0 %v4420_v54  ;;  %4231 = vmatprep.subr.bf16.mxu1 %v4230_v55  ;;  %v2490_v54 = vld [vmem:[%s5323_s15 + $0xa00] sm:$0xff]  ;;  %v4442_v55 = vpack.c.bf16 %v2493_v47, %v2491_v46  ;;  %v4252_v61 = vpack.c.bf16 %v2300_v53, %v2298_v52  ;;  %v2508_v47 = vld [vmem:[%s5323_s15 + $0xa90] sm:$0xff]  ;;  %v2513_v52 = vld [vmem:[%s5323_s15 + $0xab8] sm:$0xff]  ;;  %v4268_v53 = vpack.c.bf16 %v2316_v44, %v2314_v43 }
 0x387   : > { %4423 = vmatprep.subr.bf16.mxu0 %v4422_v58  ;;  %v2495_v58 = vld [vmem:[%s5323_s15 + $0xa28] sm:$0xff]  ;;  %v4444_v48 = vpack.c.bf16 %v2492_v56, %v2490_v54  ;;  %v4460_v54 = vpack.c.bf16 %v2508_v47, %v2506_v45  ;;  %v2318_v56 = vld [vmem:[%s5323_s15 + $0x4a0] sm:$0xff]  ;;  %v2528_v43 = vld [vmem:[%s5323_s15 + $0xb30] sm:$0xff] }
 0x388   : > { %v4446_v3 = vpack.c.bf16 %v2497_v59, %v2495_v58  ;;  %v2512_v59 = vld [vmem:[%s5323_s15 + $0xab0] sm:$0xff]  ;;  %v2339_v44 = vld [vmem:[%s5323_s15 + $0x548] sm:$0xff]  ;;  %v2341_v45 = vld [vmem:[%s5323_s15 + $0x558] sm:$0xff] }
 0x389   : > { %4233 = vmatpush1.bf16.msra.mxu1 %v4232_v63  ;;  %v4254_v63 = vpack.c.bf16 %v2305_v38, %v2303_v57  ;;  %v2320_v57 = vld [vmem:[%s5323_s15 + $0x4b0] sm:$0xff]  ;;  %v2510_v38 = vld [vmem:[%s5323_s15 + $0xaa0] sm:$0xff]  ;;  %v2533_v47 = vld [vmem:[%s5323_s15 + $0xb58] sm:$0xff] }
 0x38a   : > { %4425 = vmatpush1.bf16.msra.mxu0 %v4424_v0  ;;  %4235 = vmatprep.subr.bf16.mxu1 %v4234_v1  ;;  %v2302_v0 = vld [vmem:[%s5323_s15 + $0x420] sm:$0xff]  ;;  %v2304_v1 = vld [vmem:[%s5323_s15 + $0x430] sm:$0xff] }
 0x38b   : > { %4427 = vmatprep.subr.bf16.mxu0 %v4426_v5  ;;  %v2307_v5 = vld [vmem:[%s5323_s15 + $0x448] sm:$0xff]  ;;  %v4256_v9 = vpack.c.bf16 %v2304_v1, %v2302_v0  ;;  %v4464_v0 = vpack.c.bf16 %v2512_v59, %v2510_v38  ;;  %v2345_v38 = vld [vmem:[%s5323_s15 + $0x578] sm:$0xff] }
 0x38c   : > { %v4258_v14 = vpack.c.bf16 %v2309_v6, %v2307_v5  ;;  %v2516_v6 = vld [vmem:[%s5323_s15 + $0xad0] sm:$0xff]  ;;  %v2537_v59 = vld [vmem:[%s5323_s15 + $0xb78] sm:$0xff] }
 0x38d   : > { %4237 = vmatpush1.bf16.msra.mxu1 %v4236_v10  ;;  %v2306_v10 = vld [vmem:[%s5323_s15 + $0x440] sm:$0xff] }
 0x38e   : > { %4429 = vmatpush1.bf16.msra.mxu0 %v4428_v11  ;;  %4239 = vmatprep.subr.bf16.mxu1 %v4238_v12  ;;  %v2165_v11 = vld [vmem:[#allocation2 + $0xb8] sm:$0xff]  ;;  %v2158_v12 = vld [vmem:[#allocation2 + $0x80] sm:$0xff]  ;;  %v4260_v26 = vpack.c.bf16 %v2308_v15, %v2306_v10  ;;  %v2518_v15 = vld [vmem:[%s5323_s15 + $0xae0] sm:$0xff] }
 0x38f   : > { %4431 = vmatprep.subr.bf16.mxu0 %v4430_v16  ;;  %v2498_v16 = vld [vmem:[%s5323_s15 + $0xa40] sm:$0xff] }
 0x390   : > { %v4452_v28 = vpack.c.bf16 %v2500_v19, %v2498_v16  ;;  %v2333_v19 = vld [vmem:[%s5323_s15 + $0x518] sm:$0xff] }
 0x391   : > { %4241 = vmatpush1.bf16.msra.mxu1 %v4240_v23  ;;  %v2503_v23 = vld [vmem:[%s5323_s15 + $0xa68] sm:$0xff] }
 0x392   : > { %4433 = vmatpush1.bf16.msra.mxu0 %v4432_v24  ;;  %4243 = vmatprep.subr.bf16.mxu1 %v4242_v25  ;;  %v2505_v24 = vld [vmem:[%s5323_s15 + $0xa78] sm:$0xff]  ;;  %v2147_v25 = vld [vmem:[#allocation2 + $0x28] sm:$0xff] }
 0x393   : > { %4435 = vmatprep.subr.bf16.mxu0 %v4434_v30  ;;  %v4262_v30 = vpack.c.bf16 %v2313_v22, %v2311_v21  ;;  %v4454_v34 = vpack.c.bf16 %v2505_v24, %v2503_v23  ;;  %v2523_v21 = vld [vmem:[%s5323_s15 + $0xb08] sm:$0xff]  ;;  %v2525_v22 = vld [vmem:[%s5323_s15 + $0xb18] sm:$0xff] }
 0x395   : > { %4245 = vmatpush1.bf16.msra.mxu1 %v4244_v36  ;;  %v2315_v36 = vld [vmem:[%s5323_s15 + $0x488] sm:$0xff] }
 0x396   : > { %4437 = vmatpush1.bf16.msra.mxu0 %v4436_v37  ;;  %4247 = vmatprep.subr.bf16.mxu1 %v4246_v39  ;;  %v2317_v37 = vld [vmem:[%s5323_s15 + $0x498] sm:$0xff]  ;;  %v2507_v39 = vld [vmem:[%s5323_s15 + $0xa88] sm:$0xff] }
 0x397   : > { %4439 = vmatprep.subr.bf16.mxu0 %v4438_v42  ;;  %v4266_v42 = vpack.c.bf16 %v2317_v37, %v2315_v36  ;;  %v4458_v46 = vpack.c.bf16 %v2509_v40, %v2507_v39  ;;  %v4286_v39 = vpack.c.bf16 %v2337_v33, %v2335_v32  ;;  %v2334_v40 = vld [vmem:[%s5323_s15 + $0x520] sm:$0xff] }
 0x399   : > { %4249 = vmatpush1.bf16.msra.mxu1 %v4248_v29  ;;  %v2319_v29 = vld [vmem:[%s5323_s15 + $0x4a8] sm:$0xff] }
 0x39a   : > { %4441 = vmatpush1.bf16.msra.mxu0 %v4440_v50  ;;  %4251 = vmatprep.subr.bf16.mxu1 %v4250_v51  ;;  %v2321_v50 = vld [vmem:[%s5323_s15 + $0x4b8] sm:$0xff]  ;;  %v2511_v51 = vld [vmem:[%s5323_s15 + $0xaa8] sm:$0xff] }
 0x39b   : > { %4443 = vmatprep.subr.bf16.mxu0 %v4442_v55  ;;  %v4270_v55 = vpack.c.bf16 %v2321_v50, %v2319_v29  ;;  %v4462_v58 = vpack.c.bf16 %v2513_v52, %v2511_v51  ;;  %v4290_v51 = vpack.c.bf16 %v2341_v45, %v2339_v44  ;;  %v2338_v52 = vld [vmem:[%s5323_s15 + $0x540] sm:$0xff] }
 0x39c   : > { %2772 = vmatmul.mubr.f32.vlgmr.msra.gmra.mrb[0].mxu1 %v2144_v60  ;;  %v2323_v60 = vld [vmem:[%s5323_s15 + $0x4c8] sm:$0xff] }
 0x39d   : > { %4253 = vmatpush1.bf16.msra.mxu1 %v4252_v61  ;;  %3003 = vmatmul.mubr.f32.vlgmr.msra.gmra.mrb[0].mxu0 %v2150_v62  ;;  %v2325_v61 = vld [vmem:[%s5323_s15 + $0x4d8] sm:$0xff]  ;;  %v2515_v62 = vld [vmem:[%s5323_s15 + $0xac8] sm:$0xff] }
 0x39e   : > { %4445 = vmatpush1.bf16.msra.mxu0 %v4444_v48  ;;  %4255 = vmatprep.subr.bf16.mxu1 %v4254_v63  ;;  %v2517_v48 = vld [vmem:[%s5323_s15 + $0xad8] sm:$0xff]  ;;  %v4272_v63 = vpack.c.bf16 %v2320_v57, %v2318_v56  ;;  %v4274_v1 = vpack.c.bf16 %v2325_v61, %v2323_v60  ;;  %v2532_v56 = vld [vmem:[%s5323_s15 + $0xb50] sm:$0xff]  ;;  %v2343_v57 = vld [vmem:[%s5323_s15 + $0x568] sm:$0xff] }
 0x39f   : > { %4447 = vmatprep.subr.bf16.mxu0 %v4446_v3  ;;  %2777 = vmatprep.mubr.f32.mxu1 %v2159_v8  ;;  %v2324_v3 = vld [vmem:[%s5323_s15 + $0x4d0] sm:$0xff]  ;;  %v4466_v5 = vpack.c.bf16 %v2517_v48, %v2515_v62  ;;  %v2519_v8 = vld [vmem:[%s5323_s15 + $0xae8] sm:$0xff]  ;;  %v4294_v62 = vpack.c.bf16 %v2345_v38, %v2343_v57  ;;  %v2342_v48 = vld [vmem:[%s5323_s15 + $0x560] sm:$0xff] }
 0x3a0   : > { %3008 = vmatprep.mubr.f32.mxu0 %v2165_v11  ;;  %2778 = vmatmul.mubr.f32.gmra.mrb[2].mxu1 %v2158_v12  ;;  %v4276_v10 = vpack.c.bf16 %v2324_v3, %v2322_v2  ;;  %v4468_v11 = vpack.c.bf16 %v2516_v6, %v2514_v4  ;;  %v4278_v12 = vpack.c.bf16 %v2329_v7, %v2327_v49  ;;  %v2536_v2 = vld [vmem:[%s5323_s15 + $0xb70] sm:$0xff]  ;;  %v2347_v3 = vld [vmem:[%s5323_s15 + $0x588] sm:$0xff]  ;;  %v2349_v4 = vld [vmem:[%s5323_s15 + $0x598] sm:$0xff] }
 0x3a1   : > { %4257 = vmatpush1.bf16.msra.mxu1 %v4256_v9  ;;  %3009 = vmatmul.mubr.f32.gmra.mrb[2].mxu0 %v2164_v17  ;;  %v2521_v9 = vld [vmem:[%s5323_s15 + $0xaf8] sm:$0xff]  ;;  %v2520_v17 = vld [vmem:[%s5323_s15 + $0xaf0] sm:$0xff]  ;;  %v2554_v38 = vld [vmem:[%s5323_s15 + $0xc00] sm:$0xff] }
 0x3a2   : > { %4449 = vmatpush1.bf16.msra.mxu0 %v4448_v13  ;;  %4259 = vmatprep.subr.bf16.mxu1 %v4258_v14  ;;  %v2326_v13 = vld [vmem:[%s5323_s15 + $0x4e0] sm:$0xff]  ;;  %v2328_v14 = vld [vmem:[%s5323_s15 + $0x4f0] sm:$0xff]  ;;  %v4470_v16 = vpack.c.bf16 %v2521_v9, %v2519_v8  ;;  %v4472_v24 = vpack.c.bf16 %v2520_v17, %v2518_v15  ;;  %v2541_v6 = vld [vmem:[%s5323_s15 + $0xb98] sm:$0xff]  ;;  %v4298_v8 = vpack.c.bf16 %v2349_v4, %v2347_v3 }
 0x3a3   : > { %4451 = vmatprep.subr.bf16.mxu0 %v4450_v18  ;;  %2848 = vmatprep.mubr.f32.mxu1 %v2147_v25  ;;  %v2331_v18 = vld [vmem:[%s5323_s15 + $0x508] sm:$0xff]  ;;  %v4280_v23 = vpack.c.bf16 %v2328_v14, %v2326_v13  ;;  %v2346_v9 = vld [vmem:[%s5323_s15 + $0x580] sm:$0xff]  ;;  %v2540_v13 = vld [vmem:[%s5323_s15 + $0xb90] sm:$0xff] }
 0x3a4   : > { %3079 = vmatprep.mubr.f32.mxu0 %v2153_v27  ;;  %v4282_v25 = vpack.c.bf16 %v2333_v19, %v2331_v18  ;;  %v2332_v27 = vld [vmem:[%s5323_s15 + $0x510] sm:$0xff]  ;;  %v2351_v14 = vld [vmem:[%s5323_s15 + $0x5a8] sm:$0xff]  ;;  %v2353_v15 = vld [vmem:[%s5323_s15 + $0x5b8] sm:$0xff] }
 0x3a5   : > { %4261 = vmatpush1.bf16.msra.mxu1 %v4260_v26  ;;  %v2330_v26 = vld [vmem:[%s5323_s15 + $0x500] sm:$0xff]  ;;  %v2545_v17 = vld [vmem:[%s5323_s15 + $0xbb8] sm:$0xff]  ;;  %v2563_v3 = vld [vmem:[%s5323_s15 + $0xc48] sm:$0xff] }
 0x3a6   : > { %4453 = vmatpush1.bf16.msra.mxu0 %v4452_v28  ;;  %4263 = vmatprep.subr.bf16.mxu1 %v4262_v30  ;;  %v2522_v28 = vld [vmem:[%s5323_s15 + $0xb00] sm:$0xff]  ;;  %v4474_v30 = vpack.c.bf16 %v2525_v22, %v2523_v21  ;;  %v4284_v36 = vpack.c.bf16 %v2332_v27, %v2330_v26  ;;  %v4302_v21 = vpack.c.bf16 %v2353_v15, %v2351_v14  ;;  %v2544_v26 = vld [vmem:[%s5323_s15 + $0xbb0] sm:$0xff]  ;;  %v2355_v27 = vld [vmem:[%s5323_s15 + $0x5c8] sm:$0xff] }
 0x3a7   : > { %4455 = vmatprep.subr.bf16.mxu0 %v4454_v34  ;;  %v2527_v34 = vld [vmem:[%s5323_s15 + $0xb28] sm:$0xff]  ;;  %v4476_v37 = vpack.c.bf16 %v2524_v31, %v2522_v28  ;;  %v2350_v22 = vld [vmem:[%s5323_s15 + $0x5a0] sm:$0xff]  ;;  %v2357_v28 = vld [vmem:[%s5323_s15 + $0x5d8] sm:$0xff] }
 0x3a8   : > { %v2549_v31 = vld [vmem:[%s5323_s15 + $0xbd8] sm:$0xff]  ;;  %v2169_v15 = vld [vmem:[#allocation2 + $0xd8] sm:$0xff] }
 0x3a9   : > { %4265 = vmatpush1.bf16.msra.mxu1 %v4264_v41  ;;  %v2336_v41 = vld [vmem:[%s5323_s15 + $0x530] sm:$0xff]  ;;  %v2565_v4 = vld [vmem:[%s5323_s15 + $0xc58] sm:$0xff] }
 0x3aa   : > { %4457 = vmatpush1.bf16.msra.mxu0 %v4456_v20  ;;  %4267 = vmatprep.subr.bf16.mxu1 %v4266_v42  ;;  %v2526_v20 = vld [vmem:[%s5323_s15 + $0xb20] sm:$0xff]  ;;  %v4478_v42 = vpack.c.bf16 %v2529_v35, %v2527_v34  ;;  %v4288_v29 = vpack.c.bf16 %v2336_v41, %v2334_v40  ;;  %v4306_v34 = vpack.c.bf16 %v2357_v28, %v2355_v27  ;;  %v2548_v40 = vld [vmem:[%s5323_s15 + $0xbd0] sm:$0xff]  ;;  %v2359_v41 = vld [vmem:[%s5323_s15 + $0x5e8] sm:$0xff] }
 0x3ab   : > { %4459 = vmatprep.subr.bf16.mxu0 %v4458_v46  ;;  %v2531_v46 = vld [vmem:[%s5323_s15 + $0xb48] sm:$0xff]  ;;  %v4480_v50 = vpack.c.bf16 %v2528_v43, %v2526_v20  ;;  %v2354_v35 = vld [vmem:[%s5323_s15 + $0x5c0] sm:$0xff]  ;;  %v2361_v20 = vld [vmem:[%s5323_s15 + $0x5f8] sm:$0xff] }
 0x3ac   : > { %v2553_v43 = vld [vmem:[%s5323_s15 + $0xbf8] sm:$0xff] }
 0x3ad   : > { %4269 = vmatpush1.bf16.msra.mxu1 %v4268_v53  ;;  %v2340_v53 = vld [vmem:[%s5323_s15 + $0x550] sm:$0xff]  ;;  %v2577_v27 = vld [vmem:[%s5323_s15 + $0xcb8] sm:$0xff] }
 0x3ae   : > { %4461 = vmatpush1.bf16.msra.mxu0 %v4460_v54  ;;  %4271 = vmatprep.subr.bf16.mxu1 %v4270_v55  ;;  %v2530_v54 = vld [vmem:[%s5323_s15 + $0xb40] sm:$0xff]  ;;  %v4482_v55 = vpack.c.bf16 %v2533_v47, %v2531_v46  ;;  %v4292_v60 = vpack.c.bf16 %v2340_v53, %v2338_v52  ;;  %v4310_v46 = vpack.c.bf16 %v2361_v20, %v2359_v41  ;;  %v2552_v52 = vld [vmem:[%s5323_s15 + $0xbf0] sm:$0xff]  ;;  %v2555_v53 = vld [vmem:[%s5323_s15 + $0xc08] sm:$0xff] }
 0x3af   : > { %4463 = vmatprep.subr.bf16.mxu0 %v4462_v58  ;;  %v2535_v58 = vld [vmem:[%s5323_s15 + $0xb68] sm:$0xff]  ;;  %v4484_v61 = vpack.c.bf16 %v2532_v56, %v2530_v54  ;;  %v2358_v47 = vld [vmem:[%s5323_s15 + $0x5e0] sm:$0xff]  ;;  %v2557_v54 = vld [vmem:[%s5323_s15 + $0xc18] sm:$0xff] }
 0x3b0   : > { %v4506_v57 = vpack.c.bf16 %v2557_v54, %v2555_v53  ;;  %v2585_v41 = vld [vmem:[%s5323_s15 + $0xcf8] sm:$0xff] }
 0x3b1   : > { %4273 = vmatpush1.bf16.msra.mxu1 %v4272_v63  ;;  %v2344_v63 = vld [vmem:[%s5323_s15 + $0x570] sm:$0xff]  ;;  %v2593_v53 = vld [vmem:[%s5323_s15 + $0xd38] sm:$0xff] }
 0x3b2   : > { %4465 = vmatpush1.bf16.msra.mxu0 %v4464_v0  ;;  %4275 = vmatprep.subr.bf16.mxu1 %v4274_v1  ;;  %v2534_v0 = vld [vmem:[%s5323_s15 + $0xb60] sm:$0xff]  ;;  %v4486_v1 = vpack.c.bf16 %v2537_v59, %v2535_v58  ;;  %v4296_v49 = vpack.c.bf16 %v2344_v63, %v2342_v48  ;;  %v2556_v58 = vld [vmem:[%s5323_s15 + $0xc10] sm:$0xff]  ;;  %v2559_v59 = vld [vmem:[%s5323_s15 + $0xc28] sm:$0xff] }
 0x3b3   : > { %4467 = vmatprep.subr.bf16.mxu0 %v4466_v5  ;;  %v2539_v5 = vld [vmem:[%s5323_s15 + $0xb88] sm:$0xff]  ;;  %v4488_v7 = vpack.c.bf16 %v2536_v2, %v2534_v0  ;;  %v2558_v63 = vld [vmem:[%s5323_s15 + $0xc20] sm:$0xff]  ;;  %v2560_v0 = vld [vmem:[%s5323_s15 + $0xc30] sm:$0xff] }
 0x3b4   : > { %v2152_v48 = vld [vmem:[#allocation2 + $0x50] sm:$0xff] }
 0x3b5   : > { %4277 = vmatpush1.bf16.msra.mxu1 %v4276_v10  ;;  %v2348_v10 = vld [vmem:[%s5323_s15 + $0x590] sm:$0xff] }
 0x3b6   : > { %4469 = vmatpush1.bf16.msra.mxu0 %v4468_v11  ;;  %4279 = vmatprep.subr.bf16.mxu1 %v4278_v12  ;;  %v2538_v11 = vld [vmem:[%s5323_s15 + $0xb80] sm:$0xff]  ;;  %v4490_v12 = vpack.c.bf16 %v2541_v6, %v2539_v5  ;;  %v4300_v18 = vpack.c.bf16 %v2348_v10, %v2346_v9  ;;  %v2160_v6 = vld [vmem:[#allocation2 + $0x90] sm:$0xff]  ;;  %v2564_v10 = vld [vmem:[%s5323_s15 + $0xc50] sm:$0xff] }
 0x3b7   : > { %4471 = vmatprep.subr.bf16.mxu0 %v4470_v16  ;;  %v2543_v16 = vld [vmem:[%s5323_s15 + $0xba8] sm:$0xff]  ;;  %v4492_v19 = vpack.c.bf16 %v2540_v13, %v2538_v11  ;;  %v2167_v5 = vld [vmem:[#allocation2 + $0xc8] sm:$0xff] }
 0x3b8   : > { %v2562_v9 = vld [vmem:[%s5323_s15 + $0xc40] sm:$0xff]  ;;  %v2567_v11 = vld [vmem:[%s5323_s15 + $0xc68] sm:$0xff] }
 0x3b9   : > { %4281 = vmatpush1.bf16.msra.mxu1 %v4280_v23  ;;  %v2352_v23 = vld [vmem:[%s5323_s15 + $0x5b0] sm:$0xff]  ;;  %v2155_v13 = vld [vmem:[#allocation2 + $0x68] sm:$0xff]  ;;  %v4516_v14 = vpack.c.bf16 %v2564_v10, %v2562_v9  ;;  %v2607_v9 = vld [vmem:[%s5323_s15 + $0xda8] sm:$0xff] }
 0x3ba   : > { %4473 = vmatpush1.bf16.msra.mxu0 %v4472_v24  ;;  %4283 = vmatprep.subr.bf16.mxu1 %v4282_v25  ;;  %v2542_v24 = vld [vmem:[%s5323_s15 + $0xba0] sm:$0xff]  ;;  %v4494_v25 = vpack.c.bf16 %v2545_v17, %v2543_v16  ;;  %v4304_v32 = vpack.c.bf16 %v2352_v23, %v2350_v22  ;;  %v2609_v10 = vld [vmem:[%s5323_s15 + $0xdb8] sm:$0xff] }
 0x3bb   : > { %4475 = vmatprep.subr.bf16.mxu0 %v4474_v30  ;;  %v2547_v30 = vld [vmem:[%s5323_s15 + $0xbc8] sm:$0xff]  ;;  %v4496_v33 = vpack.c.bf16 %v2544_v26, %v2542_v24  ;;  %v2566_v17 = vld [vmem:[%s5323_s15 + $0xc60] sm:$0xff] }
 0x3bc   : > { %v2570_v24 = vld [vmem:[%s5323_s15 + $0xc80] sm:$0xff]  ;;  %v2575_v26 = vld [vmem:[%s5323_s15 + $0xca8] sm:$0xff] }
 0x3bd   : > { %4285 = vmatpush1.bf16.msra.mxu1 %v4284_v36  ;;  %v2356_v36 = vld [vmem:[%s5323_s15 + $0x5d0] sm:$0xff] }
 0x3be   : > { %4477 = vmatpush1.bf16.msra.mxu0 %v4476_v37  ;;  %4287 = vmatprep.subr.bf16.mxu1 %v4286_v39  ;;  %v2546_v37 = vld [vmem:[%s5323_s15 + $0xbc0] sm:$0xff]  ;;  %v4498_v39 = vpack.c.bf16 %v2549_v31, %v2547_v30  ;;  %v4308_v44 = vpack.c.bf16 %v2356_v36, %v2354_v35  ;;  %v4526_v30 = vpack.c.bf16 %v2577_v27, %v2575_v26  ;;  %v2616_v27 = vld [vmem:[%s5323_s15 + $0xdf0] sm:$0xff] }
 0x3bf   : > { %4479 = vmatprep.subr.bf16.mxu0 %v4478_v42  ;;  %v2551_v42 = vld [vmem:[%s5323_s15 + $0xbe8] sm:$0xff]  ;;  %v4500_v45 = vpack.c.bf16 %v2548_v40, %v2546_v37  ;;  %v2574_v31 = vld [vmem:[%s5323_s15 + $0xca0] sm:$0xff] }
 0x3c0   : > { %v2578_v37 = vld [vmem:[%s5323_s15 + $0xcc0] sm:$0xff]  ;;  %v2583_v40 = vld [vmem:[%s5323_s15 + $0xce8] sm:$0xff] }
 0x3c1   : > { %4289 = vmatpush1.bf16.msra.mxu1 %v4288_v29  ;;  %v2360_v29 = vld [vmem:[%s5323_s15 + $0x5f0] sm:$0xff]  ;;  %v2614_v26 = vld [vmem:[%s5323_s15 + $0xde0] sm:$0xff] }
 0x3c2   : > { %4481 = vmatpush1.bf16.msra.mxu0 %v4480_v50  ;;  %4291 = vmatprep.subr.bf16.mxu1 %v4290_v51  ;;  %v2550_v50 = vld [vmem:[%s5323_s15 + $0xbe0] sm:$0xff]  ;;  %v4502_v51 = vpack.c.bf16 %v2553_v43, %v2551_v42  ;;  %v4534_v42 = vpack.c.bf16 %v2585_v41, %v2583_v40 }
 0x3c3   : > { %4483 = vmatprep.subr.bf16.mxu0 %v4482_v55  ;;  %v4312_v55 = vpack.c.bf16 %v2360_v29, %v2358_v47  ;;  %v4504_v56 = vpack.c.bf16 %v2552_v52, %v2550_v50  ;;  %v2582_v43 = vld [vmem:[%s5323_s15 + $0xce0] sm:$0xff]  ;;  %v2591_v52 = vld [vmem:[%s5323_s15 + $0xd28] sm:$0xff] }
 0x3c4   : > { %v2586_v50 = vld [vmem:[%s5323_s15 + $0xd00] sm:$0xff] }
 0x3c5   : > { %4293 = vmatpush1.bf16.msra.mxu1 %v4292_v60  ;;  %v2561_v60 = vld [vmem:[%s5323_s15 + $0xc38] sm:$0xff] }
 0x3c6   : > { %4485 = vmatpush1.bf16.msra.mxu0 %v4484_v61  ;;  %4295 = vmatprep.subr.bf16.mxu1 %v4294_v62  ;;  %v2146_v61 = vld [vmem:[#allocation2 + $0x20] sm:$0xff]  ;;  %v4508_v62 = vpack.c.bf16 %v2556_v58, %v2554_v38  ;;  %v4510_v2 = vpack.c.bf16 %v2561_v60, %v2559_v59  ;;  %v2595_v38 = vld [vmem:[%s5323_s15 + $0xd48] sm:$0xff] }
 0x3c7   : > { %4487 = vmatprep.subr.bf16.mxu0 %v4486_v1  ;;  %v2161_v1 = vld [vmem:[#allocation2 + $0x98] sm:$0xff]  ;;  %v2597_v58 = vld [vmem:[%s5323_s15 + $0xd58] sm:$0xff] }
 0x3c8   : > { %v4546_v60 = vpack.c.bf16 %v2597_v58, %v2595_v38 }
 0x3c9   : > { %4297 = vmatpush1.bf16.msra.mxu1 %v4296_v49  ;;  %v4512_v49 = vpack.c.bf16 %v2560_v0, %v2558_v63  ;;  %v2601_v63 = vld [vmem:[%s5323_s15 + $0xd78] sm:$0xff] }
 0x3ca   : > { %4489 = vmatpush1.bf16.msra.mxu0 %v4488_v7  ;;  %4299 = vmatprep.subr.bf16.mxu1 %v4298_v8  ;;  %v2166_v7 = vld [vmem:[#allocation2 + $0xc0] sm:$0xff]  ;;  %v4514_v8 = vpack.c.bf16 %v2565_v4, %v2563_v3  ;;  %v2600_v3 = vld [vmem:[%s5323_s15 + $0xd70] sm:$0xff]  ;;  %v2603_v4 = vld [vmem:[%s5323_s15 + $0xd88] sm:$0xff] }
 0x3cb   : > { %4491 = vmatprep.subr.bf16.mxu0 %v4490_v12  ;;  %v2569_v12 = vld [vmem:[%s5323_s15 + $0xc78] sm:$0xff] }
 0x3cc   : > { %v4518_v16 = vpack.c.bf16 %v2569_v12, %v2567_v11  ;;  %v4558_v12 = vpack.c.bf16 %v2609_v10, %v2607_v9 }
 0x3cd   : > { %4301 = vmatpush1.bf16.msra.mxu1 %v4300_v18  ;;  %v2568_v18 = vld [vmem:[%s5323_s15 + $0xc70] sm:$0xff] }
 0x3ce   : > { %4493 = vmatpush1.bf16.msra.mxu0 %v4492_v19  ;;  %4303 = vmatprep.subr.bf16.mxu1 %v4302_v21  ;;  %v2571_v19 = vld [vmem:[%s5323_s15 + $0xc88] sm:$0xff]  ;;  %v2573_v21 = vld [vmem:[%s5323_s15 + $0xc98] sm:$0xff]  ;;  %v4520_v22 = vpack.c.bf16 %v2568_v18, %v2566_v17 }
 0x3cf   : > { %4495 = vmatprep.subr.bf16.mxu0 %v4494_v25  ;;  %v4522_v23 = vpack.c.bf16 %v2573_v21, %v2571_v19  ;;  %v2572_v25 = vld [vmem:[%s5323_s15 + $0xc90] sm:$0xff]  ;;  %v2610_v19 = vld [vmem:[%s5323_s15 + $0xdc0] sm:$0xff] }
 0x3d0   : > { %v4524_v28 = vpack.c.bf16 %v2572_v25, %v2570_v24  ;;  %v2612_v21 = vld [vmem:[%s5323_s15 + $0xdd0] sm:$0xff] }
 0x3d1   : > { %4305 = vmatpush1.bf16.msra.mxu1 %v4304_v32  ;;  %v2576_v32 = vld [vmem:[%s5323_s15 + $0xcb0] sm:$0xff]  ;;  %v4564_v24 = vpack.c.bf16 %v2612_v21, %v2610_v19 }
 0x3d2   : > { %4497 = vmatpush1.bf16.msra.mxu0 %v4496_v33  ;;  %4307 = vmatprep.subr.bf16.mxu1 %v4306_v34  ;;  %v2579_v33 = vld [vmem:[%s5323_s15 + $0xcc8] sm:$0xff]  ;;  %v2581_v34 = vld [vmem:[%s5323_s15 + $0xcd8] sm:$0xff]  ;;  %v4528_v35 = vpack.c.bf16 %v2576_v32, %v2574_v31  ;;  %v2620_v32 = vlaneseq }
 0x3d3   : > { %4499 = vmatprep.subr.bf16.mxu0 %v4498_v39  ;;  %v4530_v36 = vpack.c.bf16 %v2581_v34, %v2579_v33  ;;  %v2580_v39 = vld [vmem:[%s5323_s15 + $0xcd0] sm:$0xff]  ;;  %v2154_v31 = vld [vmem:[#allocation2 + $0x60] sm:$0xff] }
 0x3d4   : > { %v4532_v20 = vpack.c.bf16 %v2580_v39, %v2578_v37  ;;  %v2621_v33 = vshrl.u32 %v2620_v32, 7 }
 0x3d5   : > { %4309 = vmatpush1.bf16.msra.mxu1 %v4308_v44  ;;  %v2584_v44 = vld [vmem:[%s5323_s15 + $0xcf0] sm:$0xff] }
 0x3d6   : > { %4501 = vmatpush1.bf16.msra.mxu0 %v4500_v45  ;;  %4311 = vmatprep.subr.bf16.mxu1 %v4310_v46  ;;  %v2587_v45 = vld [vmem:[%s5323_s15 + $0xd08] sm:$0xff]  ;;  %v2589_v46 = vld [vmem:[%s5323_s15 + $0xd18] sm:$0xff]  ;;  %v4536_v47 = vpack.c.bf16 %v2584_v44, %v2582_v43  ;;  %v2622_v34 = vsub.s32 0, %v2621_v33  ;;  %v2626_v37 = vsub.s32 1, %v2621_v33 }
 0x3d7   : > { %4503 = vmatprep.subr.bf16.mxu0 %v4502_v51  ;;  %v4538_v29 = vpack.c.bf16 %v2589_v46, %v2587_v45  ;;  %v2588_v51 = vld [vmem:[%s5323_s15 + $0xd10] sm:$0xff] }
 0x3d8   : > { %v4540_v54 = vpack.c.bf16 %v2588_v51, %v2586_v50 }
 0x3d9   : > { %4313 = vmatpush1.bf16.msra.mxu1 %v4312_v55  ;;  %v4542_v55 = vpack.c.bf16 %v2593_v53, %v2591_v52 }
 0x3da   : > { %4505 = vmatpush1.bf16.msra.mxu0 %v4504_v56  ;;  %4618 = vmatprep.subr.bf16.mxu1 %v4506_v57  ;;  %v2590_v56 = vld [vmem:[%s5323_s15 + $0xd20] sm:$0xff] }
 0x3db   : > { %4507 = vmatprep.subr.bf16.mxu0 %v4506_v57  ;;  %v2592_v57 = vld [vmem:[%s5323_s15 + $0xd30] sm:$0xff] }
 0x3dc   : > { %2849 = vmatmul.mubr.f32.vlgmr.msra.gmra.mrb[0].mxu1 %v2146_v61  ;;  %v4544_v59 = vpack.c.bf16 %v2592_v57, %v2590_v56  ;;  %v2594_v61 = vld [vmem:[%s5323_s15 + $0xd40] sm:$0xff] }
 0x3dd   : > { %3080 = vmatmul.mubr.f32.vlgmr.msra.gmra.mrb[0].mxu0 %v2152_v48  ;;  %4634 = vmatpush1.bf16.msra.mxu1 %v4508_v62  ;;  %v2599_v48 = vld [vmem:[%s5323_s15 + $0xd68] sm:$0xff] }
 0x3de   : > { %4509 = vmatpush1.bf16.msra.mxu0 %v4508_v62  ;;  %2854 = vmatprep.mubr.f32.mxu1 %v2161_v1  ;;  %v2596_v62 = vld [vmem:[%s5323_s15 + $0xd50] sm:$0xff]  ;;  %v4550_v1 = vpack.c.bf16 %v2601_v63, %v2599_v48 }
 0x3df   : > { %3085 = vmatprep.mubr.f32.mxu0 %v2167_v5  ;;  %4511 = vmatprep.subr.bf16.mxu0 %v4510_v2  ;;  %v4548_v0 = vpack.c.bf16 %v2596_v62, %v2594_v61  ;;  %v2605_v5 = vld [vmem:[%s5323_s15 + $0xd98] sm:$0xff] }
 0x3e0   : > { %2855 = vmatmul.mubr.f32.gmra.mrb[2].mxu1 %v2160_v6  ;;  %4619 = vmatprep.subr.bf16.mxu1 %v4510_v2  ;;  %v2598_v2 = vld [vmem:[%s5323_s15 + $0xd60] sm:$0xff] }
 0x3e1   : > { %3086 = vmatmul.mubr.f32.gmra.mrb[2].mxu0 %v2166_v7  ;;  %4635 = vmatpush1.bf16.msra.mxu1 %v4512_v49  ;;  %v4552_v6 = vpack.c.bf16 %v2600_v3, %v2598_v2  ;;  %v2602_v7 = vld [vmem:[%s5323_s15 + $0xd80] sm:$0xff] }
 0x3e2   : > { %4513 = vmatpush1.bf16.msra.mxu0 %v4512_v49  ;;  %4620 = vmatprep.subr.bf16.mxu1 %v4514_v8  ;;  %v4554_v49 = vpack.c.bf16 %v2605_v5, %v2603_v4 }
 0x3e3   : > { %4515 = vmatprep.subr.bf16.mxu0 %v4514_v8  ;;  %3156 = vmatprep.mubr.f32.mxu0 %v2155_v13  ;;  %v2604_v8 = vld [vmem:[%s5323_s15 + $0xd90] sm:$0xff]  ;;  %v2606_v13 = vld [vmem:[%s5323_s15 + $0xda0] sm:$0xff] }
 0x3e4   : > { %3162 = vmatprep.mubr.f32.mxu1 %v2169_v15  ;;  %v4556_v11 = vpack.c.bf16 %v2604_v8, %v2602_v7  ;;  %v2611_v15 = vld [vmem:[%s5323_s15 + $0xdc8] sm:$0xff] }
 0x3e5   : > { %4636 = vmatpush1.bf16.msra.mxu1 %v4516_v14 }
 0x3e6   : > { %4517 = vmatpush1.bf16.msra.mxu0 %v4516_v14  ;;  %4621 = vmatprep.subr.bf16.mxu1 %v4518_v16  ;;  %v2608_v14 = vld [vmem:[%s5323_s15 + $0xdb0] sm:$0xff] }
 0x3e7   : > { %4519 = vmatprep.subr.bf16.mxu0 %v4518_v16  ;;  %v2613_v16 = vld [vmem:[%s5323_s15 + $0xdd8] sm:$0xff]  ;;  %v4560_v17 = vpack.c.bf16 %v2608_v14, %v2606_v13 }
 0x3e8   : > { %v4562_v18 = vpack.c.bf16 %v2613_v16, %v2611_v15 }
 0x3e9   : > { %4637 = vmatpush1.bf16.msra.mxu1 %v4520_v22 }
 0x3ea   : > { %4521 = vmatpush1.bf16.msra.mxu0 %v4520_v22  ;;  %4622 = vmatprep.subr.bf16.mxu1 %v4522_v23  ;;  %v2615_v22 = vld [vmem:[%s5323_s15 + $0xde8] sm:$0xff] }
 0x3eb   : > { %4523 = vmatprep.subr.bf16.mxu0 %v4522_v23  ;;  %v2617_v23 = vld [vmem:[%s5323_s15 + $0xdf8] sm:$0xff] }
 0x3ec   : > { %v4566_v25 = vpack.c.bf16 %v2617_v23, %v2615_v22 }
 0x3ed   : > { %4638 = vmatpush1.bf16.msra.mxu1 %v4524_v28 }
 0x3ee   : > { %4525 = vmatpush1.bf16.msra.mxu0 %v4524_v28  ;;  %4623 = vmatprep.subr.bf16.mxu1 %v4526_v30  ;;  %v4568_v28 = vpack.c.bf16 %v2616_v27, %v2614_v26 }
 0x3ef   : > { %4527 = vmatprep.subr.bf16.mxu0 %v4526_v30  ;;  %v2168_v30 = vld [vmem:[#allocation2 + $0xd0] sm:$0xff] }
 0x3f1   : > { %4639 = vmatpush1.bf16.msra.mxu1 %v4528_v35 }
 0x3f2   : > { %4529 = vmatpush1.bf16.msra.mxu0 %v4528_v35  ;;  %4624 = vmatprep.subr.bf16.mxu1 %v4530_v36  ;;  %v2618_v35 = vld [vmem:[%s5331_s1] sm:$0x3] }
 0x3f3   : > { %4531 = vmatprep.subr.bf16.mxu0 %v4530_v36  ;;  %v2623_v40 = vrot.slane %v2618_v35, %v2622_v34  ;;  %v2627_v41 = vrot.slane %v2618_v35, %v2626_v37 }
 0x3f5   : > { %4640 = vmatpush1.bf16.msra.mxu1 %v4532_v20 }
 0x3f6   : > { %4533 = vmatpush1.bf16.msra.mxu0 %v4532_v20  ;;  %4625 = vmatprep.subr.bf16.mxu1 %v4534_v42 }
 0x3f7   : > { %4535 = vmatprep.subr.bf16.mxu0 %v4534_v42 }
 0x3f9   : > { %4641 = vmatpush1.bf16.msra.mxu1 %v4536_v47 }
 0x3fa   : > { %4537 = vmatpush1.bf16.msra.mxu0 %v4536_v47  ;;  %4626 = vmatprep.subr.bf16.mxu1 %v4538_v29 }
 0x3fb   : > { %4539 = vmatprep.subr.bf16.mxu0 %v4538_v29 }
 0x3fd   : > { %4642 = vmatpush1.bf16.msra.mxu1 %v4540_v54 }
 0x3fe   : > { %4541 = vmatpush1.bf16.msra.mxu0 %v4540_v54  ;;  %4627 = vmatprep.subr.bf16.mxu1 %v4542_v55 }
 0x3ff   : > { %4543 = vmatprep.subr.bf16.mxu0 %v4542_v55 }
 0x401   : > { %4643 = vmatpush1.bf16.msra.mxu1 %v4544_v59 }
 0x402   : > { %4545 = vmatpush1.bf16.msra.mxu0 %v4544_v59  ;;  %4628 = vmatprep.subr.bf16.mxu1 %v4546_v60 }
 0x403   : > { %4547 = vmatprep.subr.bf16.mxu0 %v4546_v60 }
 0x405   : > { %4644 = vmatpush1.bf16.msra.mxu1 %v4548_v0 }
 0x406   : > { %4549 = vmatpush1.bf16.msra.mxu0 %v4548_v0  ;;  %4629 = vmatprep.subr.bf16.mxu1 %v4550_v1 }
 0x407   : > { %4551 = vmatprep.subr.bf16.mxu0 %v4550_v1 }
 0x409   : > { %4645 = vmatpush1.bf16.msra.mxu1 %v4552_v6 }
 0x40a   : > { %4553 = vmatpush1.bf16.msra.mxu0 %v4552_v6  ;;  %4630 = vmatprep.subr.bf16.mxu1 %v4554_v49 }
 0x40b   : > { %4555 = vmatprep.subr.bf16.mxu0 %v4554_v49 }
 0x40d   : > { %4646 = vmatpush1.bf16.msra.mxu1 %v4556_v11 }
 0x40e   : > { %4557 = vmatpush1.bf16.msra.mxu0 %v4556_v11  ;;  %4631 = vmatprep.subr.bf16.mxu1 %v4558_v12 }
 0x40f   : > { %4559 = vmatprep.subr.bf16.mxu0 %v4558_v12 }
 0x411   : > { %4647 = vmatpush1.bf16.msra.mxu1 %v4560_v17 }
 0x412   : > { %4561 = vmatpush1.bf16.msra.mxu0 %v4560_v17  ;;  %4632 = vmatprep.subr.bf16.mxu1 %v4562_v18 }
 0x413   : > { %4563 = vmatprep.subr.bf16.mxu0 %v4562_v18 }
 0x415   : > { %4648 = vmatpush1.bf16.msra.mxu1 %v4564_v24 }
 0x416   : > { %4565 = vmatpush1.bf16.msra.mxu0 %v4564_v24  ;;  %4633 = vmatprep.subr.bf16.mxu1 %v4566_v25 }
 0x417   : > { %4567 = vmatprep.subr.bf16.mxu0 %v4566_v25 }
 0x419   : > { %4649 = vmatpush1.bf16.msra.mxu1 %v4568_v28 }
 0x41a   : > { %4569 = vmatpush1.bf16.msra.mxu0 %v4568_v28 }
 0x41c   : > { %3163 = vmatmul.mubr.f32.vlgmr.msra.gmra.mrb[4].mxu1 %v2168_v30 }
 0x41d   : > { %3157 = vmatmul.mubr.f32.vlgmr.msra.gmra.mrb[0].mxu0 %v2154_v31 }
 0x4af   : > { %v2850_v36 = vpop.f32.mrb[0].mxu1 }
 0x4b0   : > { %v2852_v39 = vpop.f32.mrb[1].mxu1  ;;  %v4650_v50 = vadd.f32 %v2850_v36, %v2623_v40 }
 0x4b1   : > { %v4652_v52 = vadd.f32 %v2852_v39, %v2627_v41 }
 0x4b3   : > { %v2856_v20 = vpop.f32.mrb[2].mxu1 }
 0x4b4   : > { %v4654_v42 = vadd.f32 %v2856_v20, %v2623_v40  ;;  %v3087_v43 = vpop.f32.mrb[2].mxu0  ;;  %v2858_v44 = vpop.f32.mrb[3].mxu1 }
 0x4b5   : > { %v4657_v45 = vadd.f32 %v2858_v44, %v2627_v41  ;;  %v3089_v46 = vpop.f32.mrb[3].mxu0 }
 0x4b6   : > { %v4655_v47 = vadd.f32 %v4654_v42, %v3087_v43 }
 0x4b7   : > { %v4658_v29 = vadd.f32 %v4657_v45, %v3089_v46 }
 0x4ef   : > { %v3164_v51 = vpop.f32.mrb[4].mxu1 }
 0x4f0   : > { %v3158_v53 = vpop.f32.mrb[0].mxu0  ;;  %v4656_v54 = vadd.f32 %v4655_v47, %v3164_v51  ;;  %v3166_v55 = vpop.f32.mrb[5].mxu1 }
 0x4f1   : > { %v4651_v56 = vadd.f32 %v4650_v50, %v3158_v53  ;;  %v3160_v57 = vpop.f32.mrb[1].mxu0  ;;  %v4659_v38 = vadd.f32 %v4658_v29, %v3166_v55 }
 0x4f2   : > { %3171 = vst [vmem:[%s5333_s3 + $0x10] sm:$0xff] %v4656_v54  ;;  %v4653_v58 = vadd.f32 %v4652_v52, %v3160_v57 }
 0x4f3   : > { %3169 = vst [vmem:[%s5333_s3] sm:$0xff] %v4651_v56  ;;  %3172 = vst [vmem:[%s5333_s3 + $0x18] sm:$0xff] %v4659_v38 }
 0x4f4   : > { %3170 = vst [vmem:[%s5333_s3 + $0x8] sm:$0xff] %v4653_v58 }
 0x4f5   : > { %4956 = shalt.err (!%p4953_p0)
}
 0x4f6   : > { %s4957_s7 = scalar_lea.hbm %s5815_s27, 512  ;;  %s4961_s10 = scalar_lea.hbm %s5923_s9, 2048 }
 0x4f7   : > { %p4958_p5 = scmp.ne.s32.totalorder %s5815_s27, %s4957_s7  ;;  %p4962_p9 = scmp.lt.u32.totalorder %s5815_s27, %s5923_s9 }
 0x4f8   : > { %p4963_p8 = scmp.lt.u32.totalorder %s4961_s10, %s4957_s7  ;;  %p4965_p11 = scmp.lt.u32.totalorder %s4957_s7, %s5815_s27 }
 0x4f9   : > { %p4959_p3 = pnand %p4958_p5, %p5924_p13 }
 0x4fa   : > { %p4964_p4 = por %p4963_p8, %p4962_p9 }
 0x4fb   : > { %p4960_p7 = pneg %p4959_p3 }
 0x4fc   : > { %p4966_p10 = por %p4965_p11, %p4964_p4 }
 0x4fe   : > { %p4967_p2 = pnand %p4966_p10, %p4960_p7 }
 0x500   : > { %4970 = shalt.err (!%p4967_p2)
}
 0x501   : > { %s5047_s15 = smov 256   ;;  %s5048_s11 = smov 1024  }
 0x502   : > { %s5049_s8 = smov 16  }
 0x503   : > { %4696 = dma.vmem_to_hbm [thread:$0]  (%p5924_p13), %s5817_s28, 512, %s5815_s27, %s3174_s21, %s5047_s15, %s5048_s11, %s5049_s8  }
 0x504 PF: > { %s5925_s1 = sld [smem:[#allocation17_spill]]  ;;  %s5926_s3 = sld [smem:[#allocation19_spill]] }
 0x505   : > { %p4726_p12 = scmp.ge.s32.totalorder %s5033_s23, 2 }
 0x50a   : > { %s3205_s24 = sand.u32 1, %s5925_s1   ;;  %p5927_p1 = scmp.ne.s32.totalorder %s5926_s3, 0 }
 0x50b   : > { %s3206_s13 = scalar_lea.sflag [#allocation5], %s3205_s24 }
 0x50c   : > { %p4716_p6 = pnand %p4726_p12, %p5927_p1 }
 0x50e   : > { %5008 = dma.done.wait (!%p4716_p6), %s3206_s13, 512  }
 0x50f   : > { %5010 = vsyncadd (!%p4716_p6), %s3206_s13, 4294966784  ;;  %s23_s23 = sadd.s32 1, %s5033_s23   ;;  %s5928_s26 = sld [smem:[#allocation21_spill]] }
 0x510   : > { %p20_p0 = scmp.ge.s32.totalorder %s23_s23, 6   ;;  %s5929_s17 = sld [smem:[#allocation20_spill]] }
 0x511   : > { %s5930_s18 = smov %s5017_s19  ;;  %s5931_s19 = smov %s5021_s20 }
 0x512   : > { %s5933_s21 = smov %s5029_s22  ;;  %22 = sbr.rel (!%p20_p0) target bundleno = 12 (0xc), region = 114 }
 0x515   : > { %s5932_s20 = smov %s5928_s26 }
 0x516   : > { %s5934_s22 = smov %s5929_s17 }
 0x519   :  { %3211 = vsyncpa [#allocation4], 1 }
 0x51a   :  { %3213 = vsyncpa [#allocation4 + $0x1], 1 }
 0x51b   :  { %3214 = vsyncpa [#allocation7], 1 }
 0x51c   :  { %3215 = vsyncpa [#allocation10], 1 }
 0x51d   :  { %3217 = vsyncpa [#allocation10 + $0x1], 1 }
 0x51e   :  { %3218 = vsyncpa [#allocation5], 1 }
 0x51f   :  { %3220 = vsyncpa [#allocation5 + $0x1], 1 }

</bundles_post_ra>
